<compile_context>
chip_gen: v7x
topology: tpu7x:2x2x1
jax: 0.10.0
libtpu: 0.0.40
codegen_flags: <defaults>
</compile_context>

<pallas_src>
import jax
import jax.numpy as jnp
from jax.experimental import pallas as pl
from jax.experimental.pallas import tpu as pltpu

# ---- small, deterministic model config ----
VOCAB = 100
TYPE_VOCAB = 2
MAX_POS = 32
B, S, H = 2, 8, 32
N_HEADS, HEAD_DIM = 4, 8
INTER = 64
N_LAYERS = 2
N_CLASSES = 3
LN_EPS = 1e-12
BS = B * S


# ----------------------------- in-kernel helpers -----------------------------
def _layer_norm(x, g, b):
    mu = jnp.mean(x, axis=-1, keepdims=True)
    var = jnp.mean((x - mu) ** 2, axis=-1, keepdims=True)
    return (x - mu) * jax.lax.rsqrt(var + LN_EPS) * g + b


def _gelu(x):
    # tanh approximation of GELU (EUP-friendly).
    # TODO(synk): HF BERT default 'gelu' is erf-based; tanh approx differs slightly.
    c = 0.7978845608028654  # sqrt(2/pi)
    return 0.5 * x * (1.0 + jnp.tanh(c * (x + 0.044715 * x * x * x)))


# ------------------------------ fused kernel ---------------------------------
def fused_bert_kernel(emb_ref, pos_ref, mask_ref,
                      eg_ref, ebias_ref,
                      wq_ref, bq_ref, wk_ref, bk_ref, wv_ref, bv_ref,
                      wo_ref, bo_ref, ln1g_ref, ln1b_ref,
                      w1_ref, b1_ref, w2_ref, b2_ref, ln2g_ref, ln2b_ref,
                      wp_ref, bp_ref, wc_ref, bc_ref,
                      hidden_ref, pooled_ref, logits_ref):
    # --- embeddings: add positions + LayerNorm (row gathers done in XLA glue) ---
    x3 = emb_ref[...].reshape(B, S, H) + pos_ref[...][None, :, :]
    x = _layer_norm(x3, eg_ref[...], ebias_ref[...]).reshape(BS, H)   # [B*S, H]

    # Additive key-padding bias, materialized ONCE at full [B, S, S] so the
    # unrolled head loops below reuse it without re-emitting broadcasts.
    key_bias = jnp.broadcast_to(
        ((1.0 - mask_ref[...]) * -1e9)[:, None, :], (B, S, S))        # [B, S, S]
    scale = 1.0 / (HEAD_DIM ** 0.5)

    for l in range(N_LAYERS):                                         # static layer loop
        wq, bq = wq_ref[l], bq_ref[l]
        wk, bk = wk_ref[l], bk_ref[l]
        wv, bv = wv_ref[l], bv_ref[l]
        wo, bo = wo_ref[l], bo_ref[l]

        # QKV on the full [B*S, H] slab (batch folded into sublanes).
        # Scale folded into q once per layer (not per score).
        q = (jnp.dot(x, wq, preferred_element_type=jnp.float32) + bq) * scale
        k = jnp.dot(x, wk, preferred_element_type=jnp.float32) + bk
        v = jnp.dot(x, wv, preferred_element_type=jnp.float32) + bv

        q3 = q.reshape(B, S, H)
        k3 = k.reshape(B, S, H)
        v3 = v.reshape(B, S, H)

        # Per-head accumulator starts at the (broadcast) output-projection bias,
        # so no trailing "+ bo" and no lane-axis concat of head contexts.
        acc = jnp.broadcast_to(bo, (BS, H))
        for h in range(N_HEADS):                                      # static head loop
            sl = slice(h * HEAD_DIM, (h + 1) * HEAD_DIM)
            qh, kh, vh = q3[:, :, sl], k3[:, :, sl], v3[:, :, sl]     # [B, S, hd]

            # batched over B via dot_general batch dims
            scores = jnp.einsum('bqd,bkd->bqk', qh, kh,
                                preferred_element_type=jnp.float32) + key_bias
            scores = scores - jnp.max(scores, axis=-1, keepdims=True)
            p = jnp.exp(scores)
            p = p * pl.reciprocal(jnp.sum(p, axis=-1, keepdims=True), approx=True)

            ctx = jnp.einsum('bqk,bkd->bqd', p, vh,
                             preferred_element_type=jnp.float32)      # [B, S, hd]

            # fuse the per-head output projection: accumulate instead of concat
            acc = acc + jnp.dot(ctx.reshape(BS, HEAD_DIM), wo[sl, :],
                                preferred_element_type=jnp.float32)   # [B*S, H]

        h1 = _layer_norm(x + acc, ln1g_ref[l], ln1b_ref[l])

        ff = jnp.dot(h1, w1_ref[l], preferred_element_type=jnp.float32) + b1_ref[l]
        ff = _gelu(ff)
        ff = jnp.dot(ff, w2_ref[l], preferred_element_type=jnp.float32) + b2_ref[l]
        x = _layer_norm(h1 + ff, ln2g_ref[l], ln2b_ref[l])

    # last_hidden_state written once as a lane-dense [B*S, H] slab
    hidden_ref[...] = x

    # --- pooler + classification head on the in-register CLS rows -----------
    cls = jnp.concatenate([x[b * S:b * S + 1, :] for b in range(B)], axis=0)  # [B, H]
    pooled = jnp.tanh(
        jnp.dot(cls, wp_ref[...], preferred_element_type=jnp.float32) + bp_ref[...])
    pooled_ref[...] = pooled
    logits_ref[...] = (
        jnp.dot(pooled, wc_ref[...], preferred_element_type=jnp.float32) + bc_ref[...])


# ------------------------------ pallas wrapper --------------------------------
def _full_spec(shape):
    n = len(shape)
    return pl.BlockSpec(shape, lambda i, n=n: (0,) * n)


def fused_bert_forward(emb, pos, mask, params):
    inputs = [
        emb, pos, mask,
        params['emb_ln_g'], params['emb_ln_b'],
        params['wq'], params['bq'], params['wk'], params['bk'],
        params['wv'], params['bv'], params['wo'], params['bo'],
        params['ln1_g'], params['ln1_b'],
        params['w1'], params['b1'], params['w2'], params['b2'],
        params['ln2_g'], params['ln2_b'],
        params['pool_w'], params['pool_b'], params['cls_w'], params['cls_b'],
    ]
    out_shapes = (jax.ShapeDtypeStruct((BS, H), jnp.float32),
                  jax.ShapeDtypeStruct((B, H), jnp.float32),
                  jax.ShapeDtypeStruct((B, N_CLASSES), jnp.float32))
    return pl.pallas_call(
        fused_bert_kernel,
        out_shape=out_shapes,
        grid=(1,),                     # single step: whole model in one launch
        in_specs=[_full_spec(a.shape) for a in inputs],
        out_specs=(_full_spec((BS, H)), _full_spec((B, H)),
                   _full_spec((B, N_CLASSES))),
        compiler_params=pltpu.CompilerParams(
            dimension_semantics=("arbitrary",)),
    )(*inputs)


# --------------------------------- forward ------------------------------------
@jax.jit
def model_forward(params, input_ids, token_type_ids, attention_mask):
    # TODO(synk): embedding row gather stays in XLA glue (a 16-row dynamic gather
    # has no clean/beneficial Pallas mapping at these shapes and XLA fuses the
    # two gathers + add into one op); add + LN + all other compute is fused.
    emb = (params['word_emb'][input_ids]
           + params['type_emb'][token_type_ids]).astype(jnp.float32).reshape(BS, H)
    pos = params['pos_emb'][:S]                                   # [S, H]
    mask = attention_mask.astype(jnp.float32)                     # [B, S]

    hidden, pooler_output, logits = fused_bert_forward(emb, pos, mask, params)

    return {'token_representations': hidden.reshape(B, S, H),
            'pooler_output': pooler_output,
            'logits': logits}


# ------------------------------- param init -----------------------------------
def init_params(key):
    def dense(k, shape):
        return jax.random.normal(k, shape, jnp.float32) * 0.02

    keys = jax.random.split(key, 11)
    # TODO(synk): AutoModel.from_pretrained checkpoint loading has no Pallas
    # equivalent; weights are deterministic random-normal instead.
    params = {
        'word_emb': dense(keys[0], (VOCAB, H)),
        'pos_emb': dense(keys[1], (MAX_POS, H)),
        'type_emb': dense(keys[2], (TYPE_VOCAB, H)),
        'emb_ln_g': jnp.ones((1, H), jnp.float32),
        'emb_ln_b': jnp.zeros((1, H), jnp.float32),
        'pool_w': dense(keys[3], (H, H)),
        'pool_b': jnp.zeros((1, H), jnp.float32),
        'cls_w': dense(keys[4], (H, N_CLASSES)),
        'cls_b': jnp.zeros((1, N_CLASSES), jnp.float32),
        # per-layer weights stacked on a leading layer axis
        'wq': dense(keys[5], (N_LAYERS, H, H)), 'bq': jnp.zeros((N_LAYERS, 1, H), jnp.float32),
        'wk': dense(keys[6], (N_LAYERS, H, H)), 'bk': jnp.zeros((N_LAYERS, 1, H), jnp.float32),
        'wv': dense(keys[7], (N_LAYERS, H, H)), 'bv': jnp.zeros((N_LAYERS, 1, H), jnp.float32),
        'wo': dense(keys[8], (N_LAYERS, H, H)), 'bo': jnp.zeros((N_LAYERS, 1, H), jnp.float32),
        'ln1_g': jnp.ones((N_LAYERS, 1, H), jnp.float32),
        'ln1_b': jnp.zeros((N_LAYERS, 1, H), jnp.float32),
        'w1': dense(keys[9], (N_LAYERS, H, INTER)),
        'b1': jnp.zeros((N_LAYERS, 1, INTER), jnp.float32),
        'w2': dense(keys[10], (N_LAYERS, INTER, H)),
        'b2': jnp.zeros((N_LAYERS, 1, H), jnp.float32),
        'ln2_g': jnp.ones((N_LAYERS, 1, H), jnp.float32),
        'ln2_b': jnp.zeros((N_LAYERS, 1, H), jnp.float32),
    }
    return params


# ---------------------------------- main ---------------------------------------
if __name__ == "__main__":
    key = jax.random.PRNGKey(0)
    k_ids, k_params = jax.random.split(key, 2)

    # deterministic synthetic "instance" dict
    input_ids = jax.random.randint(k_ids, (B, S), 0, VOCAB, dtype=jnp.int32)
    token_type_ids = jnp.zeros((B, S), dtype=jnp.int32)
    # second sequence has 2 padded (masked-out) positions
    attention_mask = jnp.concatenate(
        [jnp.ones((B, S - 2), jnp.int32),
         jnp.array([[1, 1], [0, 0]], jnp.int32)], axis=1)

    params = init_params(k_params)

    out = model_forward(params, input_ids, token_type_ids, attention_mask)
    jax.block_until_ready(out)

    assert out['token_representations'].shape == (B, S, H)
    assert out['pooler_output'].shape == (B, H)
    assert out['logits'].shape == (B, N_CLASSES)
    assert all(bool(jnp.all(jnp.isfinite(v))) for v in out.values())
    print("KERNEL_OK")
</pallas_src>

<mosaic_0001>
module attributes {stable_mosaic.version = 11 : i64} {
  func.func @fused_bert_kernel(%arg0: i32, %arg1: memref<16x32xf32, #tpu.memory_space<vmem>>, %arg2: memref<8x32xf32, #tpu.memory_space<vmem>>, %arg3: memref<2x8xf32, #tpu.memory_space<vmem>>, %arg4: memref<1x32xf32, #tpu.memory_space<vmem>>, %arg5: memref<1x32xf32, #tpu.memory_space<vmem>>, %arg6: memref<2x32x32xf32, #tpu.memory_space<vmem>>, %arg7: memref<2x1x32xf32, #tpu.memory_space<vmem>>, %arg8: memref<2x32x32xf32, #tpu.memory_space<vmem>>, %arg9: memref<2x1x32xf32, #tpu.memory_space<vmem>>, %arg10: memref<2x32x32xf32, #tpu.memory_space<vmem>>, %arg11: memref<2x1x32xf32, #tpu.memory_space<vmem>>, %arg12: memref<2x32x32xf32, #tpu.memory_space<vmem>>, %arg13: memref<2x1x32xf32, #tpu.memory_space<vmem>>, %arg14: memref<2x1x32xf32, #tpu.memory_space<vmem>>, %arg15: memref<2x1x32xf32, #tpu.memory_space<vmem>>, %arg16: memref<2x32x64xf32, #tpu.memory_space<vmem>>, %arg17: memref<2x1x64xf32, #tpu.memory_space<vmem>>, %arg18: memref<2x64x32xf32, #tpu.memory_space<vmem>>, %arg19: memref<2x1x32xf32, #tpu.memory_space<vmem>>, %arg20: memref<2x1x32xf32, #tpu.memory_space<vmem>>, %arg21: memref<2x1x32xf32, #tpu.memory_space<vmem>>, %arg22: memref<32x32xf32, #tpu.memory_space<vmem>>, %arg23: memref<1x32xf32, #tpu.memory_space<vmem>>, %arg24: memref<32x3xf32, #tpu.memory_space<vmem>>, %arg25: memref<1x3xf32, #tpu.memory_space<vmem>>, %arg26: memref<16x32xf32, #tpu.memory_space<vmem>>, %arg27: memref<2x32xf32, #tpu.memory_space<vmem>>, %arg28: memref<2x3xf32, #tpu.memory_space<vmem>>) attributes {dimension_semantics = [#tpu.dimension_semantics<arbitrary>], iteration_bounds = array<i64: 1>, scalar_prefetch = 0 : i64, scratch_operands = 0 : i64, tpu.core_type = #tpu.core_type<tc>, window_params = [{pipeline_mode = #tpu.pipeline_mode<synchronous>, transform_indices = @transform_0, window_bounds = array<i64: 16, 32>}, {pipeline_mode = #tpu.pipeline_mode<synchronous>, transform_indices = @transform_1, window_bounds = array<i64: 8, 32>}, {pipeline_mode = #tpu.pipeline_mode<synchronous>, transform_indices = @transform_2, window_bounds = array<i64: 2, 8>}, {pipeline_mode = #tpu.pipeline_mode<synchronous>, transform_indices = @transform_3, window_bounds = array<i64: 1, 32>}, {pipeline_mode = #tpu.pipeline_mode<synchronous>, transform_indices = @transform_4, window_bounds = array<i64: 1, 32>}, {pipeline_mode = #tpu.pipeline_mode<synchronous>, transform_indices = @transform_5, window_bounds = array<i64: 2, 32, 32>}, {pipeline_mode = #tpu.pipeline_mode<synchronous>, transform_indices = @transform_6, window_bounds = array<i64: 2, 1, 32>}, {pipeline_mode = #tpu.pipeline_mode<synchronous>, transform_indices = @transform_7, window_bounds = array<i64: 2, 32, 32>}, {pipeline_mode = #tpu.pipeline_mode<synchronous>, transform_indices = @transform_8, window_bounds = array<i64: 2, 1, 32>}, {pipeline_mode = #tpu.pipeline_mode<synchronous>, transform_indices = @transform_9, window_bounds = array<i64: 2, 32, 32>}, {pipeline_mode = #tpu.pipeline_mode<synchronous>, transform_indices = @transform_10, window_bounds = array<i64: 2, 1, 32>}, {pipeline_mode = #tpu.pipeline_mode<synchronous>, transform_indices = @transform_11, window_bounds = array<i64: 2, 32, 32>}, {pipeline_mode = #tpu.pipeline_mode<synchronous>, transform_indices = @transform_12, window_bounds = array<i64: 2, 1, 32>}, {pipeline_mode = #tpu.pipeline_mode<synchronous>, transform_indices = @transform_13, window_bounds = array<i64: 2, 1, 32>}, {pipeline_mode = #tpu.pipeline_mode<synchronous>, transform_indices = @transform_14, window_bounds = array<i64: 2, 1, 32>}, {pipeline_mode = #tpu.pipeline_mode<synchronous>, transform_indices = @transform_15, window_bounds = array<i64: 2, 32, 64>}, {pipeline_mode = #tpu.pipeline_mode<synchronous>, transform_indices = @transform_16, window_bounds = array<i64: 2, 1, 64>}, {pipeline_mode = #tpu.pipeline_mode<synchronous>, transform_indices = @transform_17, window_bounds = array<i64: 2, 64, 32>}, {pipeline_mode = #tpu.pipeline_mode<synchronous>, transform_indices = @transform_18, window_bounds = array<i64: 2, 1, 32>}, {pipeline_mode = #tpu.pipeline_mode<synchronous>, transform_indices = @transform_19, window_bounds = array<i64: 2, 1, 32>}, {pipeline_mode = #tpu.pipeline_mode<synchronous>, transform_indices = @transform_20, window_bounds = array<i64: 2, 1, 32>}, {pipeline_mode = #tpu.pipeline_mode<synchronous>, transform_indices = @transform_21, window_bounds = array<i64: 32, 32>}, {pipeline_mode = #tpu.pipeline_mode<synchronous>, transform_indices = @transform_22, window_bounds = array<i64: 1, 32>}, {pipeline_mode = #tpu.pipeline_mode<synchronous>, transform_indices = @transform_23, window_bounds = array<i64: 32, 3>}, {pipeline_mode = #tpu.pipeline_mode<synchronous>, transform_indices = @transform_24, window_bounds = array<i64: 1, 3>}, {pipeline_mode = #tpu.pipeline_mode<synchronous>, transform_indices = @transform_25, window_bounds = array<i64: 16, 32>}, {pipeline_mode = #tpu.pipeline_mode<synchronous>, transform_indices = @transform_26, window_bounds = array<i64: 2, 32>}, {pipeline_mode = #tpu.pipeline_mode<synchronous>, transform_indices = @transform_27, window_bounds = array<i64: 2, 3>}]} {
    %c0 = arith.constant 0 : index
    %c0_0 = arith.constant 0 : index
    %0 = vector.load %arg1[%c0, %c0_0] : memref<16x32xf32, #tpu.memory_space<vmem>>, vector<16x32xf32>
    %1 = vector.shape_cast %0 : vector<16x32xf32> to vector<2x8x32xf32>
    %c0_1 = arith.constant 0 : index
    %c0_2 = arith.constant 0 : index
    %2 = vector.load %arg2[%c0_1, %c0_2] : memref<8x32xf32, #tpu.memory_space<vmem>>, vector<8x32xf32>
    %3 = vector.shape_cast %2 : vector<8x32xf32> to vector<1x8x32xf32>
    %4 = vector.broadcast %3 : vector<1x8x32xf32> to vector<2x8x32xf32>
    %5 = arith.addf %1, %4 : vector<2x8x32xf32>
    %c0_3 = arith.constant 0 : index
    %c0_4 = arith.constant 0 : index
    %6 = vector.load %arg4[%c0_3, %c0_4] : memref<1x32xf32, #tpu.memory_space<vmem>>, vector<1x32xf32>
    %c0_5 = arith.constant 0 : index
    %c0_6 = arith.constant 0 : index
    %7 = vector.load %arg5[%c0_5, %c0_6] : memref<1x32xf32, #tpu.memory_space<vmem>>, vector<1x32xf32>
    %cst = arith.constant dense<0.000000e+00> : vector<2x8xf32>
    %8 = vector.multi_reduction <add>, %5, %cst [2] : vector<2x8x32xf32> to vector<2x8xf32>
    %9 = vector.shape_cast %8 : vector<2x8xf32> to vector<2x8x1xf32>
    %cst_7 = arith.constant 3.200000e+01 : f32
    %10 = vector.broadcast %cst_7 : f32 to vector<2x8x1xf32>
    %11 = arith.divf %9, %10 : vector<2x8x1xf32>
    %12 = vector.broadcast %11 : vector<2x8x1xf32> to vector<2x8x32xf32>
    %13 = arith.subf %5, %12 : vector<2x8x32xf32>
    %14 = arith.mulf %13, %13 : vector<2x8x32xf32>
    %cst_8 = arith.constant dense<0.000000e+00> : vector<2x8xf32>
    %15 = vector.multi_reduction <add>, %14, %cst_8 [2] : vector<2x8x32xf32> to vector<2x8xf32>
    %16 = vector.shape_cast %15 : vector<2x8xf32> to vector<2x8x1xf32>
    %cst_9 = arith.constant 3.200000e+01 : f32
    %17 = vector.broadcast %cst_9 : f32 to vector<2x8x1xf32>
    %18 = arith.divf %16, %17 : vector<2x8x1xf32>
    %19 = vector.broadcast %11 : vector<2x8x1xf32> to vector<2x8x32xf32>
    %20 = arith.subf %5, %19 : vector<2x8x32xf32>
    %cst_10 = arith.constant 9.99999996E-13 : f32
    %21 = vector.broadcast %cst_10 : f32 to vector<2x8x1xf32>
    %22 = arith.addf %18, %21 : vector<2x8x1xf32>
    %23 = math.rsqrt %22 : vector<2x8x1xf32>
    %24 = vector.broadcast %23 : vector<2x8x1xf32> to vector<2x8x32xf32>
    %25 = arith.mulf %20, %24 : vector<2x8x32xf32>
    %26 = vector.shape_cast %6 : vector<1x32xf32> to vector<1x1x32xf32>
    %27 = vector.broadcast %26 : vector<1x1x32xf32> to vector<2x8x32xf32>
    %28 = arith.mulf %25, %27 : vector<2x8x32xf32>
    %29 = vector.shape_cast %7 : vector<1x32xf32> to vector<1x1x32xf32>
    %30 = vector.broadcast %29 : vector<1x1x32xf32> to vector<2x8x32xf32>
    %31 = arith.addf %28, %30 : vector<2x8x32xf32>
    %32 = vector.shape_cast %31 : vector<2x8x32xf32> to vector<16x32xf32>
    %c0_11 = arith.constant 0 : index
    %c0_12 = arith.constant 0 : index
    %33 = vector.load %arg3[%c0_11, %c0_12] : memref<2x8xf32, #tpu.memory_space<vmem>>, vector<2x8xf32>
    %cst_13 = arith.constant 1.000000e+00 : f32
    %34 = vector.broadcast %cst_13 : f32 to vector<2x8xf32>
    %35 = arith.subf %34, %33 : vector<2x8xf32>
    %cst_14 = arith.constant -1.000000e+09 : f32
    %36 = vector.broadcast %cst_14 : f32 to vector<2x8xf32>
    %37 = arith.mulf %35, %36 : vector<2x8xf32>
    %38 = vector.shape_cast %37 : vector<2x8xf32> to vector<2x1x8xf32>
    %39 = vector.shape_cast %38 : vector<2x1x8xf32> to vector<2x1x8xf32>
    %40 = vector.broadcast %39 : vector<2x1x8xf32> to vector<2x8x8xf32>
    %c0_15 = arith.constant 0 : index
    %c0_16 = arith.constant 0 : index
    %c0_17 = arith.constant 0 : index
    %41 = vector.load %arg6[%c0_15, %c0_16, %c0_17] : memref<2x32x32xf32, #tpu.memory_space<vmem>>, vector<1x32x32xf32>
    %42 = vector.shape_cast %41 : vector<1x32x32xf32> to vector<32x32xf32>
    %c0_18 = arith.constant 0 : index
    %c0_19 = arith.constant 0 : index
    %c0_20 = arith.constant 0 : index
    %43 = vector.load %arg7[%c0_18, %c0_19, %c0_20] : memref<2x1x32xf32, #tpu.memory_space<vmem>>, vector<1x1x32xf32>
    %44 = vector.shape_cast %43 : vector<1x1x32xf32> to vector<1x32xf32>
    %c0_21 = arith.constant 0 : index
    %c0_22 = arith.constant 0 : index
    %c0_23 = arith.constant 0 : index
    %45 = vector.load %arg8[%c0_21, %c0_22, %c0_23] : memref<2x32x32xf32, #tpu.memory_space<vmem>>, vector<1x32x32xf32>
    %46 = vector.shape_cast %45 : vector<1x32x32xf32> to vector<32x32xf32>
    %c0_24 = arith.constant 0 : index
    %c0_25 = arith.constant 0 : index
    %c0_26 = arith.constant 0 : index
    %47 = vector.load %arg9[%c0_24, %c0_25, %c0_26] : memref<2x1x32xf32, #tpu.memory_space<vmem>>, vector<1x1x32xf32>
    %48 = vector.shape_cast %47 : vector<1x1x32xf32> to vector<1x32xf32>
    %c0_27 = arith.constant 0 : index
    %c0_28 = arith.constant 0 : index
    %c0_29 = arith.constant 0 : index
    %49 = vector.load %arg10[%c0_27, %c0_28, %c0_29] : memref<2x32x32xf32, #tpu.memory_space<vmem>>, vector<1x32x32xf32>
    %50 = vector.shape_cast %49 : vector<1x32x32xf32> to vector<32x32xf32>
    %c0_30 = arith.constant 0 : index
    %c0_31 = arith.constant 0 : index
    %c0_32 = arith.constant 0 : index
    %51 = vector.load %arg11[%c0_30, %c0_31, %c0_32] : memref<2x1x32xf32, #tpu.memory_space<vmem>>, vector<1x1x32xf32>
    %52 = vector.shape_cast %51 : vector<1x1x32xf32> to vector<1x32xf32>
    %c0_33 = arith.constant 0 : index
    %c0_34 = arith.constant 0 : index
    %c0_35 = arith.constant 0 : index
    %53 = vector.load %arg12[%c0_33, %c0_34, %c0_35] : memref<2x32x32xf32, #tpu.memory_space<vmem>>, vector<1x32x32xf32>
    %54 = vector.shape_cast %53 : vector<1x32x32xf32> to vector<32x32xf32>
    %c0_36 = arith.constant 0 : index
    %c0_37 = arith.constant 0 : index
    %c0_38 = arith.constant 0 : index
    %55 = vector.load %arg13[%c0_36, %c0_37, %c0_38] : memref<2x1x32xf32, #tpu.memory_space<vmem>>, vector<1x1x32xf32>
    %56 = vector.shape_cast %55 : vector<1x1x32xf32> to vector<1x32xf32>
    %cst_39 = arith.constant dense<0.000000e+00> : vector<16x32xf32>
    %57 = tpu.matmul %32, %42, %cst_39 {dimension_numbers = #tpu.dot_dimension_numbers<[1], [0], [0], [1], [0, 0, 1, 1], [], []>} : vector<16x32xf32>, vector<32x32xf32>, vector<16x32xf32> -> vector<16x32xf32>
    %58 = vector.broadcast %44 : vector<1x32xf32> to vector<16x32xf32>
    %59 = arith.addf %57, %58 : vector<16x32xf32>
    %cst_40 = arith.constant 0.353553385 : f32
    %60 = vector.broadcast %cst_40 : f32 to vector<16x32xf32>
    %61 = arith.mulf %59, %60 : vector<16x32xf32>
    %cst_41 = arith.constant dense<0.000000e+00> : vector<16x32xf32>
    %62 = tpu.matmul %32, %46, %cst_41 {dimension_numbers = #tpu.dot_dimension_numbers<[1], [0], [0], [1], [0, 0, 1, 1], [], []>} : vector<16x32xf32>, vector<32x32xf32>, vector<16x32xf32> -> vector<16x32xf32>
    %63 = vector.broadcast %48 : vector<1x32xf32> to vector<16x32xf32>
    %64 = arith.addf %62, %63 : vector<16x32xf32>
    %cst_42 = arith.constant dense<0.000000e+00> : vector<16x32xf32>
    %65 = tpu.matmul %32, %50, %cst_42 {dimension_numbers = #tpu.dot_dimension_numbers<[1], [0], [0], [1], [0, 0, 1, 1], [], []>} : vector<16x32xf32>, vector<32x32xf32>, vector<16x32xf32> -> vector<16x32xf32>
    %66 = vector.broadcast %52 : vector<1x32xf32> to vector<16x32xf32>
    %67 = arith.addf %65, %66 : vector<16x32xf32>
    %68 = vector.shape_cast %61 : vector<16x32xf32> to vector<2x8x32xf32>
    %69 = vector.shape_cast %64 : vector<16x32xf32> to vector<2x8x32xf32>
    %70 = vector.shape_cast %67 : vector<16x32xf32> to vector<2x8x32xf32>
    %71 = vector.shape_cast %56 : vector<1x32xf32> to vector<1x32xf32>
    %72 = vector.broadcast %71 : vector<1x32xf32> to vector<16x32xf32>
    %73 = vector.extract_strided_slice %68 {offsets = [0, 0, 0], sizes = [2, 8, 8], strides = [1, 1, 1]} : vector<2x8x32xf32> to vector<2x8x8xf32>
    %74 = vector.extract_strided_slice %69 {offsets = [0, 0, 0], sizes = [2, 8, 8], strides = [1, 1, 1]} : vector<2x8x32xf32> to vector<2x8x8xf32>
    %75 = vector.extract_strided_slice %70 {offsets = [0, 0, 0], sizes = [2, 8, 8], strides = [1, 1, 1]} : vector<2x8x32xf32> to vector<2x8x8xf32>
    "tpu.trace_start"() <{level = 10 : i32, message = "bqd,bkd->bqk"}> : () -> ()
    %cst_43 = arith.constant dense<0.000000e+00> : vector<2x8x8xf32>
    %76 = tpu.matmul %73, %74, %cst_43 {dimension_numbers = #tpu.dot_dimension_numbers<[2], [2], [1], [1], [0, 0, 0, 1, 1, 1], [0], [0]>} : vector<2x8x8xf32>, vector<2x8x8xf32>, vector<2x8x8xf32> -> vector<2x8x8xf32>
    "tpu.trace_stop"() : () -> ()
    %77 = arith.addf %76, %40 : vector<2x8x8xf32>
    %cst_44 = arith.constant dense<0xFF800000> : vector<2x8xf32>
    %78 = vector.multi_reduction <maximumf>, %77, %cst_44 [2] : vector<2x8x8xf32> to vector<2x8xf32>
    %79 = vector.shape_cast %78 : vector<2x8xf32> to vector<2x8x1xf32>
    %80 = vector.broadcast %79 : vector<2x8x1xf32> to vector<2x8x8xf32>
    %81 = arith.subf %77, %80 : vector<2x8x8xf32>
    %82 = math.exp %81 : vector<2x8x8xf32>
    %cst_45 = arith.constant dense<0.000000e+00> : vector<2x8xf32>
    %83 = vector.multi_reduction <add>, %82, %cst_45 [2] : vector<2x8x8xf32> to vector<2x8xf32>
    %84 = vector.shape_cast %83 : vector<2x8xf32> to vector<2x8x1xf32>
    %85 = tpu.reciprocal %84 {approx = true} : vector<2x8x1xf32> -> vector<2x8x1xf32>
    %86 = vector.broadcast %85 : vector<2x8x1xf32> to vector<2x8x8xf32>
    %87 = arith.mulf %82, %86 : vector<2x8x8xf32>
    "tpu.trace_start"() <{level = 10 : i32, message = "bqk,bkd->bqd"}> : () -> ()
    %cst_46 = arith.constant dense<0.000000e+00> : vector<2x8x8xf32>
    %88 = tpu.matmul %87, %75, %cst_46 {dimension_numbers = #tpu.dot_dimension_numbers<[2], [1], [1], [2], [0, 0, 0, 1, 1, 2], [0], [0]>} : vector<2x8x8xf32>, vector<2x8x8xf32>, vector<2x8x8xf32> -> vector<2x8x8xf32>
    "tpu.trace_stop"() : () -> ()
    %89 = vector.shape_cast %88 : vector<2x8x8xf32> to vector<16x8xf32>
    %90 = vector.extract_strided_slice %54 {offsets = [0, 0], sizes = [8, 32], strides = [1, 1]} : vector<32x32xf32> to vector<8x32xf32>
    %cst_47 = arith.constant dense<0.000000e+00> : vector<16x32xf32>
    %91 = tpu.matmul %89, %90, %cst_47 {dimension_numbers = #tpu.dot_dimension_numbers<[1], [0], [0], [1], [0, 0, 1, 1], [], []>} : vector<16x8xf32>, vector<8x32xf32>, vector<16x32xf32> -> vector<16x32xf32>
    %92 = arith.addf %72, %91 : vector<16x32xf32>
    %93 = vector.extract_strided_slice %68 {offsets = [0, 0, 8], sizes = [2, 8, 8], strides = [1, 1, 1]} : vector<2x8x32xf32> to vector<2x8x8xf32>
    %94 = vector.extract_strided_slice %69 {offsets = [0, 0, 8], sizes = [2, 8, 8], strides = [1, 1, 1]} : vector<2x8x32xf32> to vector<2x8x8xf32>
    %95 = vector.extract_strided_slice %70 {offsets = [0, 0, 8], sizes = [2, 8, 8], strides = [1, 1, 1]} : vector<2x8x32xf32> to vector<2x8x8xf32>
    "tpu.trace_start"() <{level = 10 : i32, message = "bqd,bkd->bqk"}> : () -> ()
    %cst_48 = arith.constant dense<0.000000e+00> : vector<2x8x8xf32>
    %96 = tpu.matmul %93, %94, %cst_48 {dimension_numbers = #tpu.dot_dimension_numbers<[2], [2], [1], [1], [0, 0, 0, 1, 1, 1], [0], [0]>} : vector<2x8x8xf32>, vector<2x8x8xf32>, vector<2x8x8xf32> -> vector<2x8x8xf32>
    "tpu.trace_stop"() : () -> ()
    %97 = arith.addf %96, %40 : vector<2x8x8xf32>
    %cst_49 = arith.constant dense<0xFF800000> : vector<2x8xf32>
    %98 = vector.multi_reduction <maximumf>, %97, %cst_49 [2] : vector<2x8x8xf32> to vector<2x8xf32>
    %99 = vector.shape_cast %98 : vector<2x8xf32> to vector<2x8x1xf32>
    %100 = vector.broadcast %99 : vector<2x8x1xf32> to vector<2x8x8xf32>
    %101 = arith.subf %97, %100 : vector<2x8x8xf32>
    %102 = math.exp %101 : vector<2x8x8xf32>
    %cst_50 = arith.constant dense<0.000000e+00> : vector<2x8xf32>
    %103 = vector.multi_reduction <add>, %102, %cst_50 [2] : vector<2x8x8xf32> to vector<2x8xf32>
    %104 = vector.shape_cast %103 : vector<2x8xf32> to vector<2x8x1xf32>
    %105 = tpu.reciprocal %104 {approx = true} : vector<2x8x1xf32> -> vector<2x8x1xf32>
    %106 = vector.broadcast %105 : vector<2x8x1xf32> to vector<2x8x8xf32>
    %107 = arith.mulf %102, %106 : vector<2x8x8xf32>
    "tpu.trace_start"() <{level = 10 : i32, message = "bqk,bkd->bqd"}> : () -> ()
    %cst_51 = arith.constant dense<0.000000e+00> : vector<2x8x8xf32>
    %108 = tpu.matmul %107, %95, %cst_51 {dimension_numbers = #tpu.dot_dimension_numbers<[2], [1], [1], [2], [0, 0, 0, 1, 1, 2], [0], [0]>} : vector<2x8x8xf32>, vector<2x8x8xf32>, vector<2x8x8xf32> -> vector<2x8x8xf32>
    "tpu.trace_stop"() : () -> ()
    %109 = vector.shape_cast %108 : vector<2x8x8xf32> to vector<16x8xf32>
    %110 = vector.extract_strided_slice %54 {offsets = [8, 0], sizes = [8, 32], strides = [1, 1]} : vector<32x32xf32> to vector<8x32xf32>
    %cst_52 = arith.constant dense<0.000000e+00> : vector<16x32xf32>
    %111 = tpu.matmul %109, %110, %cst_52 {dimension_numbers = #tpu.dot_dimension_numbers<[1], [0], [0], [1], [0, 0, 1, 1], [], []>} : vector<16x8xf32>, vector<8x32xf32>, vector<16x32xf32> -> vector<16x32xf32>
    %112 = arith.addf %92, %111 : vector<16x32xf32>
    %113 = vector.extract_strided_slice %68 {offsets = [0, 0, 16], sizes = [2, 8, 8], strides = [1, 1, 1]} : vector<2x8x32xf32> to vector<2x8x8xf32>
    %114 = vector.extract_strided_slice %69 {offsets = [0, 0, 16], sizes = [2, 8, 8], strides = [1, 1, 1]} : vector<2x8x32xf32> to vector<2x8x8xf32>
    %115 = vector.extract_strided_slice %70 {offsets = [0, 0, 16], sizes = [2, 8, 8], strides = [1, 1, 1]} : vector<2x8x32xf32> to vector<2x8x8xf32>
    "tpu.trace_start"() <{level = 10 : i32, message = "bqd,bkd->bqk"}> : () -> ()
    %cst_53 = arith.constant dense<0.000000e+00> : vector<2x8x8xf32>
    %116 = tpu.matmul %113, %114, %cst_53 {dimension_numbers = #tpu.dot_dimension_numbers<[2], [2], [1], [1], [0, 0, 0, 1, 1, 1], [0], [0]>} : vector<2x8x8xf32>, vector<2x8x8xf32>, vector<2x8x8xf32> -> vector<2x8x8xf32>
    "tpu.trace_stop"() : () -> ()
    %117 = arith.addf %116, %40 : vector<2x8x8xf32>
    %cst_54 = arith.constant dense<0xFF800000> : vector<2x8xf32>
    %118 = vector.multi_reduction <maximumf>, %117, %cst_54 [2] : vector<2x8x8xf32> to vector<2x8xf32>
    %119 = vector.shape_cast %118 : vector<2x8xf32> to vector<2x8x1xf32>
    %120 = vector.broadcast %119 : vector<2x8x1xf32> to vector<2x8x8xf32>
    %121 = arith.subf %117, %120 : vector<2x8x8xf32>
    %122 = math.exp %121 : vector<2x8x8xf32>
    %cst_55 = arith.constant dense<0.000000e+00> : vector<2x8xf32>
    %123 = vector.multi_reduction <add>, %122, %cst_55 [2] : vector<2x8x8xf32> to vector<2x8xf32>
    %124 = vector.shape_cast %123 : vector<2x8xf32> to vector<2x8x1xf32>
    %125 = tpu.reciprocal %124 {approx = true} : vector<2x8x1xf32> -> vector<2x8x1xf32>
    %126 = vector.broadcast %125 : vector<2x8x1xf32> to vector<2x8x8xf32>
    %127 = arith.mulf %122, %126 : vector<2x8x8xf32>
    "tpu.trace_start"() <{level = 10 : i32, message = "bqk,bkd->bqd"}> : () -> ()
    %cst_56 = arith.constant dense<0.000000e+00> : vector<2x8x8xf32>
    %128 = tpu.matmul %127, %115, %cst_56 {dimension_numbers = #tpu.dot_dimension_numbers<[2], [1], [1], [2], [0, 0, 0, 1, 1, 2], [0], [0]>} : vector<2x8x8xf32>, vector<2x8x8xf32>, vector<2x8x8xf32> -> vector<2x8x8xf32>
    "tpu.trace_stop"() : () -> ()
    %129 = vector.shape_cast %128 : vector<2x8x8xf32> to vector<16x8xf32>
    %130 = vector.extract_strided_slice %54 {offsets = [16, 0], sizes = [8, 32], strides = [1, 1]} : vector<32x32xf32> to vector<8x32xf32>
    %cst_57 = arith.constant dense<0.000000e+00> : vector<16x32xf32>
    %131 = tpu.matmul %129, %130, %cst_57 {dimension_numbers = #tpu.dot_dimension_numbers<[1], [0], [0], [1], [0, 0, 1, 1], [], []>} : vector<16x8xf32>, vector<8x32xf32>, vector<16x32xf32> -> vector<16x32xf32>
    %132 = arith.addf %112, %131 : vector<16x32xf32>
    %133 = vector.extract_strided_slice %68 {offsets = [0, 0, 24], sizes = [2, 8, 8], strides = [1, 1, 1]} : vector<2x8x32xf32> to vector<2x8x8xf32>
    %134 = vector.extract_strided_slice %69 {offsets = [0, 0, 24], sizes = [2, 8, 8], strides = [1, 1, 1]} : vector<2x8x32xf32> to vector<2x8x8xf32>
    %135 = vector.extract_strided_slice %70 {offsets = [0, 0, 24], sizes = [2, 8, 8], strides = [1, 1, 1]} : vector<2x8x32xf32> to vector<2x8x8xf32>
    "tpu.trace_start"() <{level = 10 : i32, message = "bqd,bkd->bqk"}> : () -> ()
    %cst_58 = arith.constant dense<0.000000e+00> : vector<2x8x8xf32>
    %136 = tpu.matmul %133, %134, %cst_58 {dimension_numbers = #tpu.dot_dimension_numbers<[2], [2], [1], [1], [0, 0, 0, 1, 1, 1], [0], [0]>} : vector<2x8x8xf32>, vector<2x8x8xf32>, vector<2x8x8xf32> -> vector<2x8x8xf32>
    "tpu.trace_stop"() : () -> ()
    %137 = arith.addf %136, %40 : vector<2x8x8xf32>
    %cst_59 = arith.constant dense<0xFF800000> : vector<2x8xf32>
    %138 = vector.multi_reduction <maximumf>, %137, %cst_59 [2] : vector<2x8x8xf32> to vector<2x8xf32>
    %139 = vector.shape_cast %138 : vector<2x8xf32> to vector<2x8x1xf32>
    %140 = vector.broadcast %139 : vector<2x8x1xf32> to vector<2x8x8xf32>
    %141 = arith.subf %137, %140 : vector<2x8x8xf32>
    %142 = math.exp %141 : vector<2x8x8xf32>
    %cst_60 = arith.constant dense<0.000000e+00> : vector<2x8xf32>
    %143 = vector.multi_reduction <add>, %142, %cst_60 [2] : vector<2x8x8xf32> to vector<2x8xf32>
    %144 = vector.shape_cast %143 : vector<2x8xf32> to vector<2x8x1xf32>
    %145 = tpu.reciprocal %144 {approx = true} : vector<2x8x1xf32> -> vector<2x8x1xf32>
    %146 = vector.broadcast %145 : vector<2x8x1xf32> to vector<2x8x8xf32>
    %147 = arith.mulf %142, %146 : vector<2x8x8xf32>
    "tpu.trace_start"() <{level = 10 : i32, message = "bqk,bkd->bqd"}> : () -> ()
    %cst_61 = arith.constant dense<0.000000e+00> : vector<2x8x8xf32>
    %148 = tpu.matmul %147, %135, %cst_61 {dimension_numbers = #tpu.dot_dimension_numbers<[2], [1], [1], [2], [0, 0, 0, 1, 1, 2], [0], [0]>} : vector<2x8x8xf32>, vector<2x8x8xf32>, vector<2x8x8xf32> -> vector<2x8x8xf32>
    "tpu.trace_stop"() : () -> ()
    %149 = vector.shape_cast %148 : vector<2x8x8xf32> to vector<16x8xf32>
    %150 = vector.extract_strided_slice %54 {offsets = [24, 0], sizes = [8, 32], strides = [1, 1]} : vector<32x32xf32> to vector<8x32xf32>
    %cst_62 = arith.constant dense<0.000000e+00> : vector<16x32xf32>
    %151 = tpu.matmul %149, %150, %cst_62 {dimension_numbers = #tpu.dot_dimension_numbers<[1], [0], [0], [1], [0, 0, 1, 1], [], []>} : vector<16x8xf32>, vector<8x32xf32>, vector<16x32xf32> -> vector<16x32xf32>
    %152 = arith.addf %132, %151 : vector<16x32xf32>
    %153 = arith.addf %32, %152 : vector<16x32xf32>
    %c0_63 = arith.constant 0 : index
    %c0_64 = arith.constant 0 : index
    %c0_65 = arith.constant 0 : index
    %154 = vector.load %arg14[%c0_63, %c0_64, %c0_65] : memref<2x1x32xf32, #tpu.memory_space<vmem>>, vector<1x1x32xf32>
    %155 = vector.shape_cast %154 : vector<1x1x32xf32> to vector<1x32xf32>
    %c0_66 = arith.constant 0 : index
    %c0_67 = arith.constant 0 : index
    %c0_68 = arith.constant 0 : index
    %156 = vector.load %arg15[%c0_66, %c0_67, %c0_68] : memref<2x1x32xf32, #tpu.memory_space<vmem>>, vector<1x1x32xf32>
    %157 = vector.shape_cast %156 : vector<1x1x32xf32> to vector<1x32xf32>
    %cst_69 = arith.constant dense<0.000000e+00> : vector<16xf32>
    %158 = vector.multi_reduction <add>, %153, %cst_69 [1] : vector<16x32xf32> to vector<16xf32>
    %159 = vector.shape_cast %158 : vector<16xf32> to vector<16x1xf32>
    %cst_70 = arith.constant 3.200000e+01 : f32
    %160 = vector.broadcast %cst_70 : f32 to vector<16x1xf32>
    %161 = arith.divf %159, %160 : vector<16x1xf32>
    %162 = vector.broadcast %161 : vector<16x1xf32> to vector<16x32xf32>
    %163 = arith.subf %153, %162 : vector<16x32xf32>
    %164 = arith.mulf %163, %163 : vector<16x32xf32>
    %cst_71 = arith.constant dense<0.000000e+00> : vector<16xf32>
    %165 = vector.multi_reduction <add>, %164, %cst_71 [1] : vector<16x32xf32> to vector<16xf32>
    %166 = vector.shape_cast %165 : vector<16xf32> to vector<16x1xf32>
    %cst_72 = arith.constant 3.200000e+01 : f32
    %167 = vector.broadcast %cst_72 : f32 to vector<16x1xf32>
    %168 = arith.divf %166, %167 : vector<16x1xf32>
    %169 = vector.broadcast %161 : vector<16x1xf32> to vector<16x32xf32>
    %170 = arith.subf %153, %169 : vector<16x32xf32>
    %cst_73 = arith.constant 9.99999996E-13 : f32
    %171 = vector.broadcast %cst_73 : f32 to vector<16x1xf32>
    %172 = arith.addf %168, %171 : vector<16x1xf32>
    %173 = math.rsqrt %172 : vector<16x1xf32>
    %174 = vector.broadcast %173 : vector<16x1xf32> to vector<16x32xf32>
    %175 = arith.mulf %170, %174 : vector<16x32xf32>
    %176 = vector.broadcast %155 : vector<1x32xf32> to vector<16x32xf32>
    %177 = arith.mulf %175, %176 : vector<16x32xf32>
    %178 = vector.broadcast %157 : vector<1x32xf32> to vector<16x32xf32>
    %179 = arith.addf %177, %178 : vector<16x32xf32>
    %c0_74 = arith.constant 0 : index
    %c0_75 = arith.constant 0 : index
    %c0_76 = arith.constant 0 : index
    %180 = vector.load %arg16[%c0_74, %c0_75, %c0_76] : memref<2x32x64xf32, #tpu.memory_space<vmem>>, vector<1x32x64xf32>
    %181 = vector.shape_cast %180 : vector<1x32x64xf32> to vector<32x64xf32>
    %cst_77 = arith.constant dense<0.000000e+00> : vector<16x64xf32>
    %182 = tpu.matmul %179, %181, %cst_77 {dimension_numbers = #tpu.dot_dimension_numbers<[1], [0], [0], [1], [0, 0, 1, 1], [], []>} : vector<16x32xf32>, vector<32x64xf32>, vector<16x64xf32> -> vector<16x64xf32>
    %c0_78 = arith.constant 0 : index
    %c0_79 = arith.constant 0 : index
    %c0_80 = arith.constant 0 : index
    %183 = vector.load %arg17[%c0_78, %c0_79, %c0_80] : memref<2x1x64xf32, #tpu.memory_space<vmem>>, vector<1x1x64xf32>
    %184 = vector.shape_cast %183 : vector<1x1x64xf32> to vector<1x64xf32>
    %185 = vector.broadcast %184 : vector<1x64xf32> to vector<16x64xf32>
    %186 = arith.addf %182, %185 : vector<16x64xf32>
    %cst_81 = arith.constant 5.000000e-01 : f32
    %187 = vector.broadcast %cst_81 : f32 to vector<16x64xf32>
    %188 = arith.mulf %187, %186 : vector<16x64xf32>
    %cst_82 = arith.constant 4.471500e-02 : f32
    %189 = vector.broadcast %cst_82 : f32 to vector<16x64xf32>
    %190 = arith.mulf %189, %186 : vector<16x64xf32>
    %191 = arith.mulf %190, %186 : vector<16x64xf32>
    %192 = arith.mulf %191, %186 : vector<16x64xf32>
    %193 = arith.addf %186, %192 : vector<16x64xf32>
    %cst_83 = arith.constant 0.797884583 : f32
    %194 = vector.broadcast %cst_83 : f32 to vector<16x64xf32>
    %195 = arith.mulf %194, %193 : vector<16x64xf32>
    %196 = math.tanh %195 : vector<16x64xf32>
    %cst_84 = arith.constant 1.000000e+00 : f32
    %197 = vector.broadcast %cst_84 : f32 to vector<16x64xf32>
    %198 = arith.addf %197, %196 : vector<16x64xf32>
    %199 = arith.mulf %188, %198 : vector<16x64xf32>
    %c0_85 = arith.constant 0 : index
    %c0_86 = arith.constant 0 : index
    %c0_87 = arith.constant 0 : index
    %200 = vector.load %arg18[%c0_85, %c0_86, %c0_87] : memref<2x64x32xf32, #tpu.memory_space<vmem>>, vector<1x64x32xf32>
    %201 = vector.shape_cast %200 : vector<1x64x32xf32> to vector<64x32xf32>
    %cst_88 = arith.constant dense<0.000000e+00> : vector<16x32xf32>
    %202 = tpu.matmul %199, %201, %cst_88 {dimension_numbers = #tpu.dot_dimension_numbers<[1], [0], [0], [1], [0, 0, 1, 1], [], []>} : vector<16x64xf32>, vector<64x32xf32>, vector<16x32xf32> -> vector<16x32xf32>
    %c0_89 = arith.constant 0 : index
    %c0_90 = arith.constant 0 : index
    %c0_91 = arith.constant 0 : index
    %203 = vector.load %arg19[%c0_89, %c0_90, %c0_91] : memref<2x1x32xf32, #tpu.memory_space<vmem>>, vector<1x1x32xf32>
    %204 = vector.shape_cast %203 : vector<1x1x32xf32> to vector<1x32xf32>
    %205 = vector.broadcast %204 : vector<1x32xf32> to vector<16x32xf32>
    %206 = arith.addf %202, %205 : vector<16x32xf32>
    %207 = arith.addf %179, %206 : vector<16x32xf32>
    %c0_92 = arith.constant 0 : index
    %c0_93 = arith.constant 0 : index
    %c0_94 = arith.constant 0 : index
    %208 = vector.load %arg20[%c0_92, %c0_93, %c0_94] : memref<2x1x32xf32, #tpu.memory_space<vmem>>, vector<1x1x32xf32>
    %209 = vector.shape_cast %208 : vector<1x1x32xf32> to vector<1x32xf32>
    %c0_95 = arith.constant 0 : index
    %c0_96 = arith.constant 0 : index
    %c0_97 = arith.constant 0 : index
    %210 = vector.load %arg21[%c0_95, %c0_96, %c0_97] : memref<2x1x32xf32, #tpu.memory_space<vmem>>, vector<1x1x32xf32>
    %211 = vector.shape_cast %210 : vector<1x1x32xf32> to vector<1x32xf32>
    %cst_98 = arith.constant dense<0.000000e+00> : vector<16xf32>
    %212 = vector.multi_reduction <add>, %207, %cst_98 [1] : vector<16x32xf32> to vector<16xf32>
    %213 = vector.shape_cast %212 : vector<16xf32> to vector<16x1xf32>
    %cst_99 = arith.constant 3.200000e+01 : f32
    %214 = vector.broadcast %cst_99 : f32 to vector<16x1xf32>
    %215 = arith.divf %213, %214 : vector<16x1xf32>
    %216 = vector.broadcast %215 : vector<16x1xf32> to vector<16x32xf32>
    %217 = arith.subf %207, %216 : vector<16x32xf32>
    %218 = arith.mulf %217, %217 : vector<16x32xf32>
    %cst_100 = arith.constant dense<0.000000e+00> : vector<16xf32>
    %219 = vector.multi_reduction <add>, %218, %cst_100 [1] : vector<16x32xf32> to vector<16xf32>
    %220 = vector.shape_cast %219 : vector<16xf32> to vector<16x1xf32>
    %cst_101 = arith.constant 3.200000e+01 : f32
    %221 = vector.broadcast %cst_101 : f32 to vector<16x1xf32>
    %222 = arith.divf %220, %221 : vector<16x1xf32>
    %223 = vector.broadcast %215 : vector<16x1xf32> to vector<16x32xf32>
    %224 = arith.subf %207, %223 : vector<16x32xf32>
    %cst_102 = arith.constant 9.99999996E-13 : f32
    %225 = vector.broadcast %cst_102 : f32 to vector<16x1xf32>
    %226 = arith.addf %222, %225 : vector<16x1xf32>
    %227 = math.rsqrt %226 : vector<16x1xf32>
    %228 = vector.broadcast %227 : vector<16x1xf32> to vector<16x32xf32>
    %229 = arith.mulf %224, %228 : vector<16x32xf32>
    %230 = vector.broadcast %209 : vector<1x32xf32> to vector<16x32xf32>
    %231 = arith.mulf %229, %230 : vector<16x32xf32>
    %232 = vector.broadcast %211 : vector<1x32xf32> to vector<16x32xf32>
    %233 = arith.addf %231, %232 : vector<16x32xf32>
    %c1 = arith.constant 1 : index
    %c0_103 = arith.constant 0 : index
    %c0_104 = arith.constant 0 : index
    %234 = vector.load %arg6[%c1, %c0_103, %c0_104] : memref<2x32x32xf32, #tpu.memory_space<vmem>>, vector<1x32x32xf32>
    %235 = vector.shape_cast %234 : vector<1x32x32xf32> to vector<32x32xf32>
    %c1_105 = arith.constant 1 : index
    %c0_106 = arith.constant 0 : index
    %c0_107 = arith.constant 0 : index
    %236 = vector.load %arg7[%c1_105, %c0_106, %c0_107] : memref<2x1x32xf32, #tpu.memory_space<vmem>>, vector<1x1x32xf32>
    %237 = vector.shape_cast %236 : vector<1x1x32xf32> to vector<1x32xf32>
    %c1_108 = arith.constant 1 : index
    %c0_109 = arith.constant 0 : index
    %c0_110 = arith.constant 0 : index
    %238 = vector.load %arg8[%c1_108, %c0_109, %c0_110] : memref<2x32x32xf32, #tpu.memory_space<vmem>>, vector<1x32x32xf32>
    %239 = vector.shape_cast %238 : vector<1x32x32xf32> to vector<32x32xf32>
    %c1_111 = arith.constant 1 : index
    %c0_112 = arith.constant 0 : index
    %c0_113 = arith.constant 0 : index
    %240 = vector.load %arg9[%c1_111, %c0_112, %c0_113] : memref<2x1x32xf32, #tpu.memory_space<vmem>>, vector<1x1x32xf32>
    %241 = vector.shape_cast %240 : vector<1x1x32xf32> to vector<1x32xf32>
    %c1_114 = arith.constant 1 : index
    %c0_115 = arith.constant 0 : index
    %c0_116 = arith.constant 0 : index
    %242 = vector.load %arg10[%c1_114, %c0_115, %c0_116] : memref<2x32x32xf32, #tpu.memory_space<vmem>>, vector<1x32x32xf32>
    %243 = vector.shape_cast %242 : vector<1x32x32xf32> to vector<32x32xf32>
    %c1_117 = arith.constant 1 : index
    %c0_118 = arith.constant 0 : index
    %c0_119 = arith.constant 0 : index
    %244 = vector.load %arg11[%c1_117, %c0_118, %c0_119] : memref<2x1x32xf32, #tpu.memory_space<vmem>>, vector<1x1x32xf32>
    %245 = vector.shape_cast %244 : vector<1x1x32xf32> to vector<1x32xf32>
    %c1_120 = arith.constant 1 : index
    %c0_121 = arith.constant 0 : index
    %c0_122 = arith.constant 0 : index
    %246 = vector.load %arg12[%c1_120, %c0_121, %c0_122] : memref<2x32x32xf32, #tpu.memory_space<vmem>>, vector<1x32x32xf32>
    %247 = vector.shape_cast %246 : vector<1x32x32xf32> to vector<32x32xf32>
    %c1_123 = arith.constant 1 : index
    %c0_124 = arith.constant 0 : index
    %c0_125 = arith.constant 0 : index
    %248 = vector.load %arg13[%c1_123, %c0_124, %c0_125] : memref<2x1x32xf32, #tpu.memory_space<vmem>>, vector<1x1x32xf32>
    %249 = vector.shape_cast %248 : vector<1x1x32xf32> to vector<1x32xf32>
    %cst_126 = arith.constant dense<0.000000e+00> : vector<16x32xf32>
    %250 = tpu.matmul %233, %235, %cst_126 {dimension_numbers = #tpu.dot_dimension_numbers<[1], [0], [0], [1], [0, 0, 1, 1], [], []>} : vector<16x32xf32>, vector<32x32xf32>, vector<16x32xf32> -> vector<16x32xf32>
    %251 = vector.broadcast %237 : vector<1x32xf32> to vector<16x32xf32>
    %252 = arith.addf %250, %251 : vector<16x32xf32>
    %cst_127 = arith.constant 0.353553385 : f32
    %253 = vector.broadcast %cst_127 : f32 to vector<16x32xf32>
    %254 = arith.mulf %252, %253 : vector<16x32xf32>
    %cst_128 = arith.constant dense<0.000000e+00> : vector<16x32xf32>
    %255 = tpu.matmul %233, %239, %cst_128 {dimension_numbers = #tpu.dot_dimension_numbers<[1], [0], [0], [1], [0, 0, 1, 1], [], []>} : vector<16x32xf32>, vector<32x32xf32>, vector<16x32xf32> -> vector<16x32xf32>
    %256 = vector.broadcast %241 : vector<1x32xf32> to vector<16x32xf32>
    %257 = arith.addf %255, %256 : vector<16x32xf32>
    %cst_129 = arith.constant dense<0.000000e+00> : vector<16x32xf32>
    %258 = tpu.matmul %233, %243, %cst_129 {dimension_numbers = #tpu.dot_dimension_numbers<[1], [0], [0], [1], [0, 0, 1, 1], [], []>} : vector<16x32xf32>, vector<32x32xf32>, vector<16x32xf32> -> vector<16x32xf32>
    %259 = vector.broadcast %245 : vector<1x32xf32> to vector<16x32xf32>
    %260 = arith.addf %258, %259 : vector<16x32xf32>
    %261 = vector.shape_cast %254 : vector<16x32xf32> to vector<2x8x32xf32>
    %262 = vector.shape_cast %257 : vector<16x32xf32> to vector<2x8x32xf32>
    %263 = vector.shape_cast %260 : vector<16x32xf32> to vector<2x8x32xf32>
    %264 = vector.shape_cast %249 : vector<1x32xf32> to vector<1x32xf32>
    %265 = vector.broadcast %264 : vector<1x32xf32> to vector<16x32xf32>
    %266 = vector.extract_strided_slice %261 {offsets = [0, 0, 0], sizes = [2, 8, 8], strides = [1, 1, 1]} : vector<2x8x32xf32> to vector<2x8x8xf32>
    %267 = vector.extract_strided_slice %262 {offsets = [0, 0, 0], sizes = [2, 8, 8], strides = [1, 1, 1]} : vector<2x8x32xf32> to vector<2x8x8xf32>
    %268 = vector.extract_strided_slice %263 {offsets = [0, 0, 0], sizes = [2, 8, 8], strides = [1, 1, 1]} : vector<2x8x32xf32> to vector<2x8x8xf32>
    "tpu.trace_start"() <{level = 10 : i32, message = "bqd,bkd->bqk"}> : () -> ()
    %cst_130 = arith.constant dense<0.000000e+00> : vector<2x8x8xf32>
    %269 = tpu.matmul %266, %267, %cst_130 {dimension_numbers = #tpu.dot_dimension_numbers<[2], [2], [1], [1], [0, 0, 0, 1, 1, 1], [0], [0]>} : vector<2x8x8xf32>, vector<2x8x8xf32>, vector<2x8x8xf32> -> vector<2x8x8xf32>
    "tpu.trace_stop"() : () -> ()
    %270 = arith.addf %269, %40 : vector<2x8x8xf32>
    %cst_131 = arith.constant dense<0xFF800000> : vector<2x8xf32>
    %271 = vector.multi_reduction <maximumf>, %270, %cst_131 [2] : vector<2x8x8xf32> to vector<2x8xf32>
    %272 = vector.shape_cast %271 : vector<2x8xf32> to vector<2x8x1xf32>
    %273 = vector.broadcast %272 : vector<2x8x1xf32> to vector<2x8x8xf32>
    %274 = arith.subf %270, %273 : vector<2x8x8xf32>
    %275 = math.exp %274 : vector<2x8x8xf32>
    %cst_132 = arith.constant dense<0.000000e+00> : vector<2x8xf32>
    %276 = vector.multi_reduction <add>, %275, %cst_132 [2] : vector<2x8x8xf32> to vector<2x8xf32>
    %277 = vector.shape_cast %276 : vector<2x8xf32> to vector<2x8x1xf32>
    %278 = tpu.reciprocal %277 {approx = true} : vector<2x8x1xf32> -> vector<2x8x1xf32>
    %279 = vector.broadcast %278 : vector<2x8x1xf32> to vector<2x8x8xf32>
    %280 = arith.mulf %275, %279 : vector<2x8x8xf32>
    "tpu.trace_start"() <{level = 10 : i32, message = "bqk,bkd->bqd"}> : () -> ()
    %cst_133 = arith.constant dense<0.000000e+00> : vector<2x8x8xf32>
    %281 = tpu.matmul %280, %268, %cst_133 {dimension_numbers = #tpu.dot_dimension_numbers<[2], [1], [1], [2], [0, 0, 0, 1, 1, 2], [0], [0]>} : vector<2x8x8xf32>, vector<2x8x8xf32>, vector<2x8x8xf32> -> vector<2x8x8xf32>
    "tpu.trace_stop"() : () -> ()
    %282 = vector.shape_cast %281 : vector<2x8x8xf32> to vector<16x8xf32>
    %283 = vector.extract_strided_slice %247 {offsets = [0, 0], sizes = [8, 32], strides = [1, 1]} : vector<32x32xf32> to vector<8x32xf32>
    %cst_134 = arith.constant dense<0.000000e+00> : vector<16x32xf32>
    %284 = tpu.matmul %282, %283, %cst_134 {dimension_numbers = #tpu.dot_dimension_numbers<[1], [0], [0], [1], [0, 0, 1, 1], [], []>} : vector<16x8xf32>, vector<8x32xf32>, vector<16x32xf32> -> vector<16x32xf32>
    %285 = arith.addf %265, %284 : vector<16x32xf32>
    %286 = vector.extract_strided_slice %261 {offsets = [0, 0, 8], sizes = [2, 8, 8], strides = [1, 1, 1]} : vector<2x8x32xf32> to vector<2x8x8xf32>
    %287 = vector.extract_strided_slice %262 {offsets = [0, 0, 8], sizes = [2, 8, 8], strides = [1, 1, 1]} : vector<2x8x32xf32> to vector<2x8x8xf32>
    %288 = vector.extract_strided_slice %263 {offsets = [0, 0, 8], sizes = [2, 8, 8], strides = [1, 1, 1]} : vector<2x8x32xf32> to vector<2x8x8xf32>
    "tpu.trace_start"() <{level = 10 : i32, message = "bqd,bkd->bqk"}> : () -> ()
    %cst_135 = arith.constant dense<0.000000e+00> : vector<2x8x8xf32>
    %289 = tpu.matmul %286, %287, %cst_135 {dimension_numbers = #tpu.dot_dimension_numbers<[2], [2], [1], [1], [0, 0, 0, 1, 1, 1], [0], [0]>} : vector<2x8x8xf32>, vector<2x8x8xf32>, vector<2x8x8xf32> -> vector<2x8x8xf32>
    "tpu.trace_stop"() : () -> ()
    %290 = arith.addf %289, %40 : vector<2x8x8xf32>
    %cst_136 = arith.constant dense<0xFF800000> : vector<2x8xf32>
    %291 = vector.multi_reduction <maximumf>, %290, %cst_136 [2] : vector<2x8x8xf32> to vector<2x8xf32>
    %292 = vector.shape_cast %291 : vector<2x8xf32> to vector<2x8x1xf32>
    %293 = vector.broadcast %292 : vector<2x8x1xf32> to vector<2x8x8xf32>
    %294 = arith.subf %290, %293 : vector<2x8x8xf32>
    %295 = math.exp %294 : vector<2x8x8xf32>
    %cst_137 = arith.constant dense<0.000000e+00> : vector<2x8xf32>
    %296 = vector.multi_reduction <add>, %295, %cst_137 [2] : vector<2x8x8xf32> to vector<2x8xf32>
    %297 = vector.shape_cast %296 : vector<2x8xf32> to vector<2x8x1xf32>
    %298 = tpu.reciprocal %297 {approx = true} : vector<2x8x1xf32> -> vector<2x8x1xf32>
    %299 = vector.broadcast %298 : vector<2x8x1xf32> to vector<2x8x8xf32>
    %300 = arith.mulf %295, %299 : vector<2x8x8xf32>
    "tpu.trace_start"() <{level = 10 : i32, message = "bqk,bkd->bqd"}> : () -> ()
    %cst_138 = arith.constant dense<0.000000e+00> : vector<2x8x8xf32>
    %301 = tpu.matmul %300, %288, %cst_138 {dimension_numbers = #tpu.dot_dimension_numbers<[2], [1], [1], [2], [0, 0, 0, 1, 1, 2], [0], [0]>} : vector<2x8x8xf32>, vector<2x8x8xf32>, vector<2x8x8xf32> -> vector<2x8x8xf32>
    "tpu.trace_stop"() : () -> ()
    %302 = vector.shape_cast %301 : vector<2x8x8xf32> to vector<16x8xf32>
    %303 = vector.extract_strided_slice %247 {offsets = [8, 0], sizes = [8, 32], strides = [1, 1]} : vector<32x32xf32> to vector<8x32xf32>
    %cst_139 = arith.constant dense<0.000000e+00> : vector<16x32xf32>
    %304 = tpu.matmul %302, %303, %cst_139 {dimension_numbers = #tpu.dot_dimension_numbers<[1], [0], [0], [1], [0, 0, 1, 1], [], []>} : vector<16x8xf32>, vector<8x32xf32>, vector<16x32xf32> -> vector<16x32xf32>
    %305 = arith.addf %285, %304 : vector<16x32xf32>
    %306 = vector.extract_strided_slice %261 {offsets = [0, 0, 16], sizes = [2, 8, 8], strides = [1, 1, 1]} : vector<2x8x32xf32> to vector<2x8x8xf32>
    %307 = vector.extract_strided_slice %262 {offsets = [0, 0, 16], sizes = [2, 8, 8], strides = [1, 1, 1]} : vector<2x8x32xf32> to vector<2x8x8xf32>
    %308 = vector.extract_strided_slice %263 {offsets = [0, 0, 16], sizes = [2, 8, 8], strides = [1, 1, 1]} : vector<2x8x32xf32> to vector<2x8x8xf32>
    "tpu.trace_start"() <{level = 10 : i32, message = "bqd,bkd->bqk"}> : () -> ()
    %cst_140 = arith.constant dense<0.000000e+00> : vector<2x8x8xf32>
    %309 = tpu.matmul %306, %307, %cst_140 {dimension_numbers = #tpu.dot_dimension_numbers<[2], [2], [1], [1], [0, 0, 0, 1, 1, 1], [0], [0]>} : vector<2x8x8xf32>, vector<2x8x8xf32>, vector<2x8x8xf32> -> vector<2x8x8xf32>
    "tpu.trace_stop"() : () -> ()
    %310 = arith.addf %309, %40 : vector<2x8x8xf32>
    %cst_141 = arith.constant dense<0xFF800000> : vector<2x8xf32>
    %311 = vector.multi_reduction <maximumf>, %310, %cst_141 [2] : vector<2x8x8xf32> to vector<2x8xf32>
    %312 = vector.shape_cast %311 : vector<2x8xf32> to vector<2x8x1xf32>
    %313 = vector.broadcast %312 : vector<2x8x1xf32> to vector<2x8x8xf32>
    %314 = arith.subf %310, %313 : vector<2x8x8xf32>
    %315 = math.exp %314 : vector<2x8x8xf32>
    %cst_142 = arith.constant dense<0.000000e+00> : vector<2x8xf32>
    %316 = vector.multi_reduction <add>, %315, %cst_142 [2] : vector<2x8x8xf32> to vector<2x8xf32>
    %317 = vector.shape_cast %316 : vector<2x8xf32> to vector<2x8x1xf32>
    %318 = tpu.reciprocal %317 {approx = true} : vector<2x8x1xf32> -> vector<2x8x1xf32>
    %319 = vector.broadcast %318 : vector<2x8x1xf32> to vector<2x8x8xf32>
    %320 = arith.mulf %315, %319 : vector<2x8x8xf32>
    "tpu.trace_start"() <{level = 10 : i32, message = "bqk,bkd->bqd"}> : () -> ()
    %cst_143 = arith.constant dense<0.000000e+00> : vector<2x8x8xf32>
    %321 = tpu.matmul %320, %308, %cst_143 {dimension_numbers = #tpu.dot_dimension_numbers<[2], [1], [1], [2], [0, 0, 0, 1, 1, 2], [0], [0]>} : vector<2x8x8xf32>, vector<2x8x8xf32>, vector<2x8x8xf32> -> vector<2x8x8xf32>
    "tpu.trace_stop"() : () -> ()
    %322 = vector.shape_cast %321 : vector<2x8x8xf32> to vector<16x8xf32>
    %323 = vector.extract_strided_slice %247 {offsets = [16, 0], sizes = [8, 32], strides = [1, 1]} : vector<32x32xf32> to vector<8x32xf32>
    %cst_144 = arith.constant dense<0.000000e+00> : vector<16x32xf32>
    %324 = tpu.matmul %322, %323, %cst_144 {dimension_numbers = #tpu.dot_dimension_numbers<[1], [0], [0], [1], [0, 0, 1, 1], [], []>} : vector<16x8xf32>, vector<8x32xf32>, vector<16x32xf32> -> vector<16x32xf32>
    %325 = arith.addf %305, %324 : vector<16x32xf32>
    %326 = vector.extract_strided_slice %261 {offsets = [0, 0, 24], sizes = [2, 8, 8], strides = [1, 1, 1]} : vector<2x8x32xf32> to vector<2x8x8xf32>
    %327 = vector.extract_strided_slice %262 {offsets = [0, 0, 24], sizes = [2, 8, 8], strides = [1, 1, 1]} : vector<2x8x32xf32> to vector<2x8x8xf32>
    %328 = vector.extract_strided_slice %263 {offsets = [0, 0, 24], sizes = [2, 8, 8], strides = [1, 1, 1]} : vector<2x8x32xf32> to vector<2x8x8xf32>
    "tpu.trace_start"() <{level = 10 : i32, message = "bqd,bkd->bqk"}> : () -> ()
    %cst_145 = arith.constant dense<0.000000e+00> : vector<2x8x8xf32>
    %329 = tpu.matmul %326, %327, %cst_145 {dimension_numbers = #tpu.dot_dimension_numbers<[2], [2], [1], [1], [0, 0, 0, 1, 1, 1], [0], [0]>} : vector<2x8x8xf32>, vector<2x8x8xf32>, vector<2x8x8xf32> -> vector<2x8x8xf32>
    "tpu.trace_stop"() : () -> ()
    %330 = arith.addf %329, %40 : vector<2x8x8xf32>
    %cst_146 = arith.constant dense<0xFF800000> : vector<2x8xf32>
    %331 = vector.multi_reduction <maximumf>, %330, %cst_146 [2] : vector<2x8x8xf32> to vector<2x8xf32>
    %332 = vector.shape_cast %331 : vector<2x8xf32> to vector<2x8x1xf32>
    %333 = vector.broadcast %332 : vector<2x8x1xf32> to vector<2x8x8xf32>
    %334 = arith.subf %330, %333 : vector<2x8x8xf32>
    %335 = math.exp %334 : vector<2x8x8xf32>
    %cst_147 = arith.constant dense<0.000000e+00> : vector<2x8xf32>
    %336 = vector.multi_reduction <add>, %335, %cst_147 [2] : vector<2x8x8xf32> to vector<2x8xf32>
    %337 = vector.shape_cast %336 : vector<2x8xf32> to vector<2x8x1xf32>
    %338 = tpu.reciprocal %337 {approx = true} : vector<2x8x1xf32> -> vector<2x8x1xf32>
    %339 = vector.broadcast %338 : vector<2x8x1xf32> to vector<2x8x8xf32>
    %340 = arith.mulf %335, %339 : vector<2x8x8xf32>
    "tpu.trace_start"() <{level = 10 : i32, message = "bqk,bkd->bqd"}> : () -> ()
    %cst_148 = arith.constant dense<0.000000e+00> : vector<2x8x8xf32>
    %341 = tpu.matmul %340, %328, %cst_148 {dimension_numbers = #tpu.dot_dimension_numbers<[2], [1], [1], [2], [0, 0, 0, 1, 1, 2], [0], [0]>} : vector<2x8x8xf32>, vector<2x8x8xf32>, vector<2x8x8xf32> -> vector<2x8x8xf32>
    "tpu.trace_stop"() : () -> ()
    %342 = vector.shape_cast %341 : vector<2x8x8xf32> to vector<16x8xf32>
    %343 = vector.extract_strided_slice %247 {offsets = [24, 0], sizes = [8, 32], strides = [1, 1]} : vector<32x32xf32> to vector<8x32xf32>
    %cst_149 = arith.constant dense<0.000000e+00> : vector<16x32xf32>
    %344 = tpu.matmul %342, %343, %cst_149 {dimension_numbers = #tpu.dot_dimension_numbers<[1], [0], [0], [1], [0, 0, 1, 1], [], []>} : vector<16x8xf32>, vector<8x32xf32>, vector<16x32xf32> -> vector<16x32xf32>
    %345 = arith.addf %325, %344 : vector<16x32xf32>
    %346 = arith.addf %233, %345 : vector<16x32xf32>
    %c1_150 = arith.constant 1 : index
    %c0_151 = arith.constant 0 : index
    %c0_152 = arith.constant 0 : index
    %347 = vector.load %arg14[%c1_150, %c0_151, %c0_152] : memref<2x1x32xf32, #tpu.memory_space<vmem>>, vector<1x1x32xf32>
    %348 = vector.shape_cast %347 : vector<1x1x32xf32> to vector<1x32xf32>
    %c1_153 = arith.constant 1 : index
    %c0_154 = arith.constant 0 : index
    %c0_155 = arith.constant 0 : index
    %349 = vector.load %arg15[%c1_153, %c0_154, %c0_155] : memref<2x1x32xf32, #tpu.memory_space<vmem>>, vector<1x1x32xf32>
    %350 = vector.shape_cast %349 : vector<1x1x32xf32> to vector<1x32xf32>
    %cst_156 = arith.constant dense<0.000000e+00> : vector<16xf32>
    %351 = vector.multi_reduction <add>, %346, %cst_156 [1] : vector<16x32xf32> to vector<16xf32>
    %352 = vector.shape_cast %351 : vector<16xf32> to vector<16x1xf32>
    %cst_157 = arith.constant 3.200000e+01 : f32
    %353 = vector.broadcast %cst_157 : f32 to vector<16x1xf32>
    %354 = arith.divf %352, %353 : vector<16x1xf32>
    %355 = vector.broadcast %354 : vector<16x1xf32> to vector<16x32xf32>
    %356 = arith.subf %346, %355 : vector<16x32xf32>
    %357 = arith.mulf %356, %356 : vector<16x32xf32>
    %cst_158 = arith.constant dense<0.000000e+00> : vector<16xf32>
    %358 = vector.multi_reduction <add>, %357, %cst_158 [1] : vector<16x32xf32> to vector<16xf32>
    %359 = vector.shape_cast %358 : vector<16xf32> to vector<16x1xf32>
    %cst_159 = arith.constant 3.200000e+01 : f32
    %360 = vector.broadcast %cst_159 : f32 to vector<16x1xf32>
    %361 = arith.divf %359, %360 : vector<16x1xf32>
    %362 = vector.broadcast %354 : vector<16x1xf32> to vector<16x32xf32>
    %363 = arith.subf %346, %362 : vector<16x32xf32>
    %cst_160 = arith.constant 9.99999996E-13 : f32
    %364 = vector.broadcast %cst_160 : f32 to vector<16x1xf32>
    %365 = arith.addf %361, %364 : vector<16x1xf32>
    %366 = math.rsqrt %365 : vector<16x1xf32>
    %367 = vector.broadcast %366 : vector<16x1xf32> to vector<16x32xf32>
    %368 = arith.mulf %363, %367 : vector<16x32xf32>
    %369 = vector.broadcast %348 : vector<1x32xf32> to vector<16x32xf32>
    %370 = arith.mulf %368, %369 : vector<16x32xf32>
    %371 = vector.broadcast %350 : vector<1x32xf32> to vector<16x32xf32>
    %372 = arith.addf %370, %371 : vector<16x32xf32>
    %c1_161 = arith.constant 1 : index
    %c0_162 = arith.constant 0 : index
    %c0_163 = arith.constant 0 : index
    %373 = vector.load %arg16[%c1_161, %c0_162, %c0_163] : memref<2x32x64xf32, #tpu.memory_space<vmem>>, vector<1x32x64xf32>
    %374 = vector.shape_cast %373 : vector<1x32x64xf32> to vector<32x64xf32>
    %cst_164 = arith.constant dense<0.000000e+00> : vector<16x64xf32>
    %375 = tpu.matmul %372, %374, %cst_164 {dimension_numbers = #tpu.dot_dimension_numbers<[1], [0], [0], [1], [0, 0, 1, 1], [], []>} : vector<16x32xf32>, vector<32x64xf32>, vector<16x64xf32> -> vector<16x64xf32>
    %c1_165 = arith.constant 1 : index
    %c0_166 = arith.constant 0 : index
    %c0_167 = arith.constant 0 : index
    %376 = vector.load %arg17[%c1_165, %c0_166, %c0_167] : memref<2x1x64xf32, #tpu.memory_space<vmem>>, vector<1x1x64xf32>
    %377 = vector.shape_cast %376 : vector<1x1x64xf32> to vector<1x64xf32>
    %378 = vector.broadcast %377 : vector<1x64xf32> to vector<16x64xf32>
    %379 = arith.addf %375, %378 : vector<16x64xf32>
    %cst_168 = arith.constant 5.000000e-01 : f32
    %380 = vector.broadcast %cst_168 : f32 to vector<16x64xf32>
    %381 = arith.mulf %380, %379 : vector<16x64xf32>
    %cst_169 = arith.constant 4.471500e-02 : f32
    %382 = vector.broadcast %cst_169 : f32 to vector<16x64xf32>
    %383 = arith.mulf %382, %379 : vector<16x64xf32>
    %384 = arith.mulf %383, %379 : vector<16x64xf32>
    %385 = arith.mulf %384, %379 : vector<16x64xf32>
    %386 = arith.addf %379, %385 : vector<16x64xf32>
    %cst_170 = arith.constant 0.797884583 : f32
    %387 = vector.broadcast %cst_170 : f32 to vector<16x64xf32>
    %388 = arith.mulf %387, %386 : vector<16x64xf32>
    %389 = math.tanh %388 : vector<16x64xf32>
    %cst_171 = arith.constant 1.000000e+00 : f32
    %390 = vector.broadcast %cst_171 : f32 to vector<16x64xf32>
    %391 = arith.addf %390, %389 : vector<16x64xf32>
    %392 = arith.mulf %381, %391 : vector<16x64xf32>
    %c1_172 = arith.constant 1 : index
    %c0_173 = arith.constant 0 : index
    %c0_174 = arith.constant 0 : index
    %393 = vector.load %arg18[%c1_172, %c0_173, %c0_174] : memref<2x64x32xf32, #tpu.memory_space<vmem>>, vector<1x64x32xf32>
    %394 = vector.shape_cast %393 : vector<1x64x32xf32> to vector<64x32xf32>
    %cst_175 = arith.constant dense<0.000000e+00> : vector<16x32xf32>
    %395 = tpu.matmul %392, %394, %cst_175 {dimension_numbers = #tpu.dot_dimension_numbers<[1], [0], [0], [1], [0, 0, 1, 1], [], []>} : vector<16x64xf32>, vector<64x32xf32>, vector<16x32xf32> -> vector<16x32xf32>
    %c1_176 = arith.constant 1 : index
    %c0_177 = arith.constant 0 : index
    %c0_178 = arith.constant 0 : index
    %396 = vector.load %arg19[%c1_176, %c0_177, %c0_178] : memref<2x1x32xf32, #tpu.memory_space<vmem>>, vector<1x1x32xf32>
    %397 = vector.shape_cast %396 : vector<1x1x32xf32> to vector<1x32xf32>
    %398 = vector.broadcast %397 : vector<1x32xf32> to vector<16x32xf32>
    %399 = arith.addf %395, %398 : vector<16x32xf32>
    %400 = arith.addf %372, %399 : vector<16x32xf32>
    %c1_179 = arith.constant 1 : index
    %c0_180 = arith.constant 0 : index
    %c0_181 = arith.constant 0 : index
    %401 = vector.load %arg20[%c1_179, %c0_180, %c0_181] : memref<2x1x32xf32, #tpu.memory_space<vmem>>, vector<1x1x32xf32>
    %402 = vector.shape_cast %401 : vector<1x1x32xf32> to vector<1x32xf32>
    %c1_182 = arith.constant 1 : index
    %c0_183 = arith.constant 0 : index
    %c0_184 = arith.constant 0 : index
    %403 = vector.load %arg21[%c1_182, %c0_183, %c0_184] : memref<2x1x32xf32, #tpu.memory_space<vmem>>, vector<1x1x32xf32>
    %404 = vector.shape_cast %403 : vector<1x1x32xf32> to vector<1x32xf32>
    %cst_185 = arith.constant dense<0.000000e+00> : vector<16xf32>
    %405 = vector.multi_reduction <add>, %400, %cst_185 [1] : vector<16x32xf32> to vector<16xf32>
    %406 = vector.shape_cast %405 : vector<16xf32> to vector<16x1xf32>
    %cst_186 = arith.constant 3.200000e+01 : f32
    %407 = vector.broadcast %cst_186 : f32 to vector<16x1xf32>
    %408 = arith.divf %406, %407 : vector<16x1xf32>
    %409 = vector.broadcast %408 : vector<16x1xf32> to vector<16x32xf32>
    %410 = arith.subf %400, %409 : vector<16x32xf32>
    %411 = arith.mulf %410, %410 : vector<16x32xf32>
    %cst_187 = arith.constant dense<0.000000e+00> : vector<16xf32>
    %412 = vector.multi_reduction <add>, %411, %cst_187 [1] : vector<16x32xf32> to vector<16xf32>
    %413 = vector.shape_cast %412 : vector<16xf32> to vector<16x1xf32>
    %cst_188 = arith.constant 3.200000e+01 : f32
    %414 = vector.broadcast %cst_188 : f32 to vector<16x1xf32>
    %415 = arith.divf %413, %414 : vector<16x1xf32>
    %416 = vector.broadcast %408 : vector<16x1xf32> to vector<16x32xf32>
    %417 = arith.subf %400, %416 : vector<16x32xf32>
    %cst_189 = arith.constant 9.99999996E-13 : f32
    %418 = vector.broadcast %cst_189 : f32 to vector<16x1xf32>
    %419 = arith.addf %415, %418 : vector<16x1xf32>
    %420 = math.rsqrt %419 : vector<16x1xf32>
    %421 = vector.broadcast %420 : vector<16x1xf32> to vector<16x32xf32>
    %422 = arith.mulf %417, %421 : vector<16x32xf32>
    %423 = vector.broadcast %402 : vector<1x32xf32> to vector<16x32xf32>
    %424 = arith.mulf %422, %423 : vector<16x32xf32>
    %425 = vector.broadcast %404 : vector<1x32xf32> to vector<16x32xf32>
    %426 = arith.addf %424, %425 : vector<16x32xf32>
    %c0_190 = arith.constant 0 : index
    %c0_191 = arith.constant 0 : index
    %427 = vector.load %arg26[%c0_190, %c0_191] : memref<16x32xf32, #tpu.memory_space<vmem>>, vector<16x32xf32>
    tpu.vector_store %arg26[%c0_190, %c0_191], %426 {strides = array<i32>} : memref<16x32xf32, #tpu.memory_space<vmem>>, vector<16x32xf32>,
    %428 = vector.extract_strided_slice %426 {offsets = [0, 0], sizes = [1, 32], strides = [1, 1]} : vector<16x32xf32> to vector<1x32xf32>
    %429 = vector.extract_strided_slice %426 {offsets = [8, 0], sizes = [1, 32], strides = [1, 1]} : vector<16x32xf32> to vector<1x32xf32>
    %430 = tpu.concatenate %428, %429 in 0 : vector<1x32xf32>, vector<1x32xf32> -> vector<2x32xf32>
    %c0_192 = arith.constant 0 : index
    %c0_193 = arith.constant 0 : index
    %431 = vector.load %arg22[%c0_192, %c0_193] : memref<32x32xf32, #tpu.memory_space<vmem>>, vector<32x32xf32>
    %cst_194 = arith.constant dense<0.000000e+00> : vector<2x32xf32>
    %432 = tpu.matmul %430, %431, %cst_194 {dimension_numbers = #tpu.dot_dimension_numbers<[1], [0], [0], [1], [0, 0, 1, 1], [], []>} : vector<2x32xf32>, vector<32x32xf32>, vector<2x32xf32> -> vector<2x32xf32>
    %c0_195 = arith.constant 0 : index
    %c0_196 = arith.constant 0 : index
    %433 = vector.load %arg23[%c0_195, %c0_196] : memref<1x32xf32, #tpu.memory_space<vmem>>, vector<1x32xf32>
    %434 = vector.broadcast %433 : vector<1x32xf32> to vector<2x32xf32>
    %435 = arith.addf %432, %434 : vector<2x32xf32>
    %436 = math.tanh %435 : vector<2x32xf32>
    %c0_197 = arith.constant 0 : index
    %c0_198 = arith.constant 0 : index
    %437 = vector.load %arg27[%c0_197, %c0_198] : memref<2x32xf32, #tpu.memory_space<vmem>>, vector<2x32xf32>
    tpu.vector_store %arg27[%c0_197, %c0_198], %436 {strides = array<i32>} : memref<2x32xf32, #tpu.memory_space<vmem>>, vector<2x32xf32>,
    %c0_199 = arith.constant 0 : index
    %c0_200 = arith.constant 0 : index
    %438 = vector.load %arg24[%c0_199, %c0_200] : memref<32x3xf32, #tpu.memory_space<vmem>>, vector<32x3xf32>
    %cst_201 = arith.constant dense<0.000000e+00> : vector<2x3xf32>
    %439 = tpu.matmul %436, %438, %cst_201 {dimension_numbers = #tpu.dot_dimension_numbers<[1], [0], [0], [1], [0, 0, 1, 1], [], []>} : vector<2x32xf32>, vector<32x3xf32>, vector<2x3xf32> -> vector<2x3xf32>
    %c0_202 = arith.constant 0 : index
    %c0_203 = arith.constant 0 : index
    %440 = vector.load %arg25[%c0_202, %c0_203] : memref<1x3xf32, #tpu.memory_space<vmem>>, vector<1x3xf32>
    %441 = vector.broadcast %440 : vector<1x3xf32> to vector<2x3xf32>
    %442 = arith.addf %439, %441 : vector<2x3xf32>
    %c0_204 = arith.constant 0 : index
    %c0_205 = arith.constant 0 : index
    %443 = vector.load %arg28[%c0_204, %c0_205] : memref<2x3xf32, #tpu.memory_space<vmem>>, vector<2x3xf32>
    tpu.vector_store %arg28[%c0_204, %c0_205], %442 {strides = array<i32>} : memref<2x3xf32, #tpu.memory_space<vmem>>, vector<2x3xf32>,
    return
  }
  func.func @transform_0(%arg0: i32) -> (i32, i32) {
    %c0_i32 = arith.constant 0 : i32
    %c0_i32_0 = arith.constant 0 : i32
    %c0_i32_1 = arith.constant 0 : i32
    return %c0_i32, %c0_i32_0 : i32, i32
  }
  func.func @transform_1(%arg0: i32) -> (i32, i32) {
    %c0_i32 = arith.constant 0 : i32
    %c0_i32_0 = arith.constant 0 : i32
    %c0_i32_1 = arith.constant 0 : i32
    return %c0_i32, %c0_i32_0 : i32, i32
  }
  func.func @transform_2(%arg0: i32) -> (i32, i32) {
    %c0_i32 = arith.constant 0 : i32
    %c0_i32_0 = arith.constant 0 : i32
    %c0_i32_1 = arith.constant 0 : i32
    return %c0_i32, %c0_i32_0 : i32, i32
  }
  func.func @transform_3(%arg0: i32) -> (i32, i32) {
    %c0_i32 = arith.constant 0 : i32
    %c0_i32_0 = arith.constant 0 : i32
    %c0_i32_1 = arith.constant 0 : i32
    return %c0_i32, %c0_i32_0 : i32, i32
  }
  func.func @transform_4(%arg0: i32) -> (i32, i32) {
    %c0_i32 = arith.constant 0 : i32
    %c0_i32_0 = arith.constant 0 : i32
    %c0_i32_1 = arith.constant 0 : i32
    return %c0_i32, %c0_i32_0 : i32, i32
  }
  func.func @transform_5(%arg0: i32) -> (i32, i32, i32) {
    %c0_i32 = arith.constant 0 : i32
    %c0_i32_0 = arith.constant 0 : i32
    %c0_i32_1 = arith.constant 0 : i32
    %c0_i32_2 = arith.constant 0 : i32
    return %c0_i32, %c0_i32_0, %c0_i32_1 : i32, i32, i32
  }
  func.func @transform_6(%arg0: i32) -> (i32, i32, i32) {
    %c0_i32 = arith.constant 0 : i32
    %c0_i32_0 = arith.constant 0 : i32
    %c0_i32_1 = arith.constant 0 : i32
    %c0_i32_2 = arith.constant 0 : i32
    return %c0_i32, %c0_i32_0, %c0_i32_1 : i32, i32, i32
  }
  func.func @transform_7(%arg0: i32) -> (i32, i32, i32) {
    %c0_i32 = arith.constant 0 : i32
    %c0_i32_0 = arith.constant 0 : i32
    %c0_i32_1 = arith.constant 0 : i32
    %c0_i32_2 = arith.constant 0 : i32
    return %c0_i32, %c0_i32_0, %c0_i32_1 : i32, i32, i32
  }
  func.func @transform_8(%arg0: i32) -> (i32, i32, i32) {
    %c0_i32 = arith.constant 0 : i32
    %c0_i32_0 = arith.constant 0 : i32
    %c0_i32_1 = arith.constant 0 : i32
    %c0_i32_2 = arith.constant 0 : i32
    return %c0_i32, %c0_i32_0, %c0_i32_1 : i32, i32, i32
  }
  func.func @transform_9(%arg0: i32) -> (i32, i32, i32) {
    %c0_i32 = arith.constant 0 : i32
    %c0_i32_0 = arith.constant 0 : i32
    %c0_i32_1 = arith.constant 0 : i32
    %c0_i32_2 = arith.constant 0 : i32
    return %c0_i32, %c0_i32_0, %c0_i32_1 : i32, i32, i32
  }
  func.func @transform_10(%arg0: i32) -> (i32, i32, i32) {
    %c0_i32 = arith.constant 0 : i32
    %c0_i32_0 = arith.constant 0 : i32
    %c0_i32_1 = arith.constant 0 : i32
    %c0_i32_2 = arith.constant 0 : i32
    return %c0_i32, %c0_i32_0, %c0_i32_1 : i32, i32, i32
  }
  func.func @transform_11(%arg0: i32) -> (i32, i32, i32) {
    %c0_i32 = arith.constant 0 : i32
    %c0_i32_0 = arith.constant 0 : i32
    %c0_i32_1 = arith.constant 0 : i32
    %c0_i32_2 = arith.constant 0 : i32
    return %c0_i32, %c0_i32_0, %c0_i32_1 : i32, i32, i32
  }
  func.func @transform_12(%arg0: i32) -> (i32, i32, i32) {
    %c0_i32 = arith.constant 0 : i32
    %c0_i32_0 = arith.constant 0 : i32
    %c0_i32_1 = arith.constant 0 : i32
    %c0_i32_2 = arith.constant 0 : i32
    return %c0_i32, %c0_i32_0, %c0_i32_1 : i32, i32, i32
  }
  func.func @transform_13(%arg0: i32) -> (i32, i32, i32) {
    %c0_i32 = arith.constant 0 : i32
    %c0_i32_0 = arith.constant 0 : i32
    %c0_i32_1 = arith.constant 0 : i32
    %c0_i32_2 = arith.constant 0 : i32
    return %c0_i32, %c0_i32_0, %c0_i32_1 : i32, i32, i32
  }
  func.func @transform_14(%arg0: i32) -> (i32, i32, i32) {
    %c0_i32 = arith.constant 0 : i32
    %c0_i32_0 = arith.constant 0 : i32
    %c0_i32_1 = arith.constant 0 : i32
    %c0_i32_2 = arith.constant 0 : i32
    return %c0_i32, %c0_i32_0, %c0_i32_1 : i32, i32, i32
  }
  func.func @transform_15(%arg0: i32) -> (i32, i32, i32) {
    %c0_i32 = arith.constant 0 : i32
    %c0_i32_0 = arith.constant 0 : i32
    %c0_i32_1 = arith.constant 0 : i32
    %c0_i32_2 = arith.constant 0 : i32
    return %c0_i32, %c0_i32_0, %c0_i32_1 : i32, i32, i32
  }
  func.func @transform_16(%arg0: i32) -> (i32, i32, i32) {
    %c0_i32 = arith.constant 0 : i32
    %c0_i32_0 = arith.constant 0 : i32
    %c0_i32_1 = arith.constant 0 : i32
    %c0_i32_2 = arith.constant 0 : i32
    return %c0_i32, %c0_i32_0, %c0_i32_1 : i32, i32, i32
  }
  func.func @transform_17(%arg0: i32) -> (i32, i32, i32) {
    %c0_i32 = arith.constant 0 : i32
    %c0_i32_0 = arith.constant 0 : i32
    %c0_i32_1 = arith.constant 0 : i32
    %c0_i32_2 = arith.constant 0 : i32
    return %c0_i32, %c0_i32_0, %c0_i32_1 : i32, i32, i32
  }
  func.func @transform_18(%arg0: i32) -> (i32, i32, i32) {
    %c0_i32 = arith.constant 0 : i32
    %c0_i32_0 = arith.constant 0 : i32
    %c0_i32_1 = arith.constant 0 : i32
    %c0_i32_2 = arith.constant 0 : i32
    return %c0_i32, %c0_i32_0, %c0_i32_1 : i32, i32, i32
  }
  func.func @transform_19(%arg0: i32) -> (i32, i32, i32) {
    %c0_i32 = arith.constant 0 : i32
    %c0_i32_0 = arith.constant 0 : i32
    %c0_i32_1 = arith.constant 0 : i32
    %c0_i32_2 = arith.constant 0 : i32
    return %c0_i32, %c0_i32_0, %c0_i32_1 : i32, i32, i32
  }
  func.func @transform_20(%arg0: i32) -> (i32, i32, i32) {
    %c0_i32 = arith.constant 0 : i32
    %c0_i32_0 = arith.constant 0 : i32
    %c0_i32_1 = arith.constant 0 : i32
    %c0_i32_2 = arith.constant 0 : i32
    return %c0_i32, %c0_i32_0, %c0_i32_1 : i32, i32, i32
  }
  func.func @transform_21(%arg0: i32) -> (i32, i32) {
    %c0_i32 = arith.constant 0 : i32
    %c0_i32_0 = arith.constant 0 : i32
    %c0_i32_1 = arith.constant 0 : i32
    return %c0_i32, %c0_i32_0 : i32, i32
  }
  func.func @transform_22(%arg0: i32) -> (i32, i32) {
    %c0_i32 = arith.constant 0 : i32
    %c0_i32_0 = arith.constant 0 : i32
    %c0_i32_1 = arith.constant 0 : i32
    return %c0_i32, %c0_i32_0 : i32, i32
  }
  func.func @transform_23(%arg0: i32) -> (i32, i32) {
    %c0_i32 = arith.constant 0 : i32
    %c0_i32_0 = arith.constant 0 : i32
    %c0_i32_1 = arith.constant 0 : i32
    return %c0_i32, %c0_i32_0 : i32, i32
  }
  func.func @transform_24(%arg0: i32) -> (i32, i32) {
    %c0_i32 = arith.constant 0 : i32
    %c0_i32_0 = arith.constant 0 : i32
    %c0_i32_1 = arith.constant 0 : i32
    return %c0_i32, %c0_i32_0 : i32, i32
  }
  func.func @transform_25(%arg0: i32) -> (i32, i32) {
    %c0_i32 = arith.constant 0 : i32
    %c0_i32_0 = arith.constant 0 : i32
    %c0_i32_1 = arith.constant 0 : i32
    return %c0_i32, %c0_i32_0 : i32, i32
  }
  func.func @transform_26(%arg0: i32) -> (i32, i32) {
    %c0_i32 = arith.constant 0 : i32
    %c0_i32_0 = arith.constant 0 : i32
    %c0_i32_1 = arith.constant 0 : i32
    return %c0_i32, %c0_i32_0 : i32, i32
  }
  func.func @transform_27(%arg0: i32) -> (i32, i32) {
    %c0_i32 = arith.constant 0 : i32
    %c0_i32_0 = arith.constant 0 : i32
    %c0_i32_1 = arith.constant 0 : i32
    return %c0_i32, %c0_i32_0 : i32, i32
  }
}

</mosaic_0001>

<bundles_post_ra>
// kernel: model_forward.1
= control target key start
LH: loop header
LB: loop body
LE: loop exit
PB: predicated region body
PF: predicated region fallthrough
CT: control target
= control target key end

     0   :  { %s6676_s0 = inlined_call_operand.vmem [shape: f32[16,32], index: 0, kind: input, shape index: {}]   ;;  %s6677_s1 = inlined_call_operand.vmem [shape: f32[8,32], index: 1, kind: input, shape index: {}]   ;;  %s6678_s2 = inlined_call_operand.vmem [shape: f32[2,8], index: 2, kind: input, shape index: {}]   ;;  %s6679_s3 = inlined_call_operand.vmem [shape: f32[1,32], index: 3, kind: input, shape index: {}]   ;;  %s6680_s4 = inlined_call_operand.vmem [shape: f32[1,32], index: 4, kind: input, shape index: {}]   ;;  %s6681_s5 = inlined_call_operand.vmem [shape: f32[2,32,32], index: 5, kind: input, shape index: {}]   ;;  %s6682_s6 = inlined_call_operand.vmem [shape: f32[2,1,32], index: 6, kind: input, shape index: {}]   ;;  %s6683_s7 = inlined_call_operand.vmem [shape: f32[2,32,32], index: 7, kind: input, shape index: {}]   ;;  %s6684_s8 = inlined_call_operand.vmem [shape: f32[2,1,32], index: 8, kind: input, shape index: {}]   ;;  %s6685_s9 = inlined_call_operand.vmem [shape: f32[2,32,32], index: 9, kind: input, shape index: {}]   ;;  %s6686_s10 = inlined_call_operand.vmem [shape: f32[2,1,32], index: 10, kind: input, shape index: {}]   ;;  %s6687_s11 = inlined_call_operand.vmem [shape: f32[2,32,32], index: 11, kind: input, shape index: {}]   ;;  %s6688_s12 = inlined_call_operand.vmem [shape: f32[2,1,32], index: 12, kind: input, shape index: {}]   ;;  %s6689_s13 = inlined_call_operand.vmem [shape: f32[2,1,32], index: 13, kind: input, shape index: {}]   ;;  %s6690_s14 = inlined_call_operand.vmem [shape: f32[2,1,32], index: 14, kind: input, shape index: {}]   ;;  %s6691_s15 = inlined_call_operand.vmem [shape: f32[2,32,64], index: 15, kind: input, shape index: {}]   ;;  %s6692_s16 = inlined_call_operand.vmem [shape: f32[2,1,64], index: 16, kind: input, shape index: {}]   ;;  %s6693_s17 = inlined_call_operand.vmem [shape: f32[2,64,32], index: 17, kind: input, shape index: {}]   ;;  %s6694_s18 = inlined_call_operand.vmem [shape: f32[2,1,32], index: 18, kind: input, shape index: {}]   ;;  %s6695_s19 = inlined_call_operand.vmem [shape: f32[2,1,32], index: 19, kind: input, shape index: {}]   ;;  %s6696_s20 = inlined_call_operand.vmem [shape: f32[2,1,32], index: 20, kind: input, shape index: {}]   ;;  %s6697_s21 = inlined_call_operand.vmem [shape: f32[32,32], index: 21, kind: input, shape index: {}]   ;;  %s6698_s22 = inlined_call_operand.vmem [shape: f32[1,32], index: 22, kind: input, shape index: {}]   ;;  %s6699_s23 = inlined_call_operand.vmem [shape: f32[32,3], index: 23, kind: input, shape index: {}]   ;;  %s6700_s24 = inlined_call_operand.vmem [shape: f32[1,3], index: 24, kind: input, shape index: {}]   ;;  %s6701_s25 = inlined_call_operand.hbm [shape: f32[16,32], index: 25, kind: output, shape index: {0}]   ;;  %s6702_s26 = inlined_call_operand.hbm [shape: f32[2,32], index: 26, kind: output, shape index: {1}]   ;;  %s6703_s27 = inlined_call_operand.hbm [shape: f32[2,3], index: 27, kind: output, shape index: {2}]  }
   0x1   :  { %6719 = sst [smem:[#allocation9_spill]] %s6676_s0 }
   0x2   :  { %6720 = sst [smem:[#allocation10_spill]] %s6677_s1 }
   0x3   :  { %6721 = sst [smem:[#allocation11_spill]] %s6678_s2 }
   0x4   :  { %6722 = sst [smem:[#allocation12_spill]] %s6679_s3 }
   0x5   :  { %6723 = sst [smem:[#allocation13_spill]] %s6680_s4 }
   0x6   :  { %6724 = sst [smem:[#allocation14_spill]] %s6681_s5 }
   0x7   :  { %6725 = sst [smem:[#allocation15_spill]] %s6682_s6 }
   0x8   :  { %6726 = sst [smem:[#allocation16_spill]] %s6683_s7 }
   0x9   :  { %6727 = sst [smem:[#allocation17_spill]] %s6684_s8 }
   0xa   :  { %6728 = sst [smem:[#allocation18_spill]] %s6685_s9 }
   0xb   :  { %6729 = sst [smem:[#allocation19_spill]] %s6686_s10 }
   0xc   :  { %6730 = sst [smem:[#allocation20_spill]] %s6687_s11 }
   0xd   :  { %6731 = sst [smem:[#allocation21_spill]] %s6700_s24 }
   0xe   :  { %6732 = sst [smem:[#allocation22_spill]] %s6703_s27 }
   0xf   :  { %33 = vsyncpa [#allocation3], 0  ;;  %s6733_s8 = sld [smem:[#allocation9_spill]]  ;;  %s6734_s5 = sld [smem:[#allocation10_spill]]  ;;  %vm92_vm0 = vcmask 261120  }
  0x15   :  { %v85_v0 = vld [vmem:[%s6733_s8] sm:$0xff]  ;;  %v86_v2 = vld [vmem:[%s6733_s8 + $0x8] sm:$0xff] }
  0x16   :  { %v87_v1 = vld [vmem:[%s6734_s5] sm:$0xff] }
  0x17   :  { %v88_v3 = vadd.f32 %v87_v1, %v85_v0  ;;  %v89_v4 = vadd.f32 %v87_v1, %v86_v2 }
  0x18   :  { %34 = vsyncpa [#allocation5], 0  ;;  %s6735_s1 = sld [smem:[#allocation14_spill]]  ;;  %s6736_s7 = sld [smem:[#allocation16_spill]]  ;;  %v5813_v51 = vmov 0.0   ;;  %vm5814_vm1 = vmmov 0  }
  0x19   :  { %v93_v5 = vsel %vm92_vm0, %v88_v3, 0.0  ;;  %v96_v6 = vsel %vm92_vm0, %v89_v4, 0.0  ;;  %s6737_s3 = sld [smem:[#allocation18_spill]]  ;;  %s6738_s5 = sld [smem:[#allocation12_spill]]  ;;  %vm449_vm2 = vcmask 64512   ;;  %vm2265_vm3 = vcmask 523264  }
  0x1a   :  { %94 = vadd.xlane.f32.xlu0 %v93_v5  ;;  %s6739_s10 = sld [smem:[#allocation13_spill]]  ;;  %s6740_s30 = sld [smem:[#allocation15_spill]]  ;;  %v5815_v5 = vmov 1966171168   ;;  %vm4633_vm4 = vcmask 1040384   ;;  %vm4720_vm5 = vcmask 254976  }
  0x1b   :  { %s6741_s28 = sld [smem:[#allocation17_spill]]  ;;  %s6742_s29 = sld [smem:[#allocation19_spill]] }
  0x1c   :  { %s6743_s2 = sld [smem:[#allocation11_spill]]  ;;  %s6716_s4 = smov 120  }
  0x1d   :  { %s6714_s8 = smov 112   ;;  %s6744_s0 = sld [smem:[#allocation20_spill]] }
  0x1e   :  { %97 = vadd.xlane.f32.xlu0 %v96_v6  ;;  %v172_v17 = vld [vmem:[%s6735_s1] sm:$0xff]  ;;  %v173_v18 = vld [vmem:[%s6735_s1 + $0x8] sm:$0xff]  ;;  %v174_v22 = vld [vmem:[%s6735_s1 + $0x10] sm:$0xff]  ;;  %v141_v6 = vunpack.c.l.s4 %v5815_v5 }
  0x1f   :  { %v177_v19 = vld [vmem:[%s6736_s7] sm:$0xff]  ;;  %v5513_v20 = vpack.c.bf16 %v173_v18, %v172_v17  ;;  %v178_v21 = vld [vmem:[%s6736_s7 + $0x8] sm:$0xff]  ;;  %v175_v23 = vld [vmem:[%s6735_s1 + $0x18] sm:$0xff] }
  0x20   :  { %v5521_v24 = vpack.c.bf16 %v178_v21, %v177_v19  ;;  %v5517_v25 = vpack.c.bf16 %v175_v23, %v174_v22  ;;  %v179_v26 = vld [vmem:[%s6736_s7 + $0x10] sm:$0xff]  ;;  %v180_v27 = vld [vmem:[%s6736_s7 + $0x18] sm:$0xff]  ;;  %v182_v29 = vld [vmem:[%s6737_s3] sm:$0xff] }
  0x21   :  { %5514 = vmatprep.subr.bf16.mxu0 %v5513_v20  ;;  %v5525_v28 = vpack.c.bf16 %v180_v27, %v179_v26  ;;  %v183_v30 = vld [vmem:[%s6737_s3 + $0x8] sm:$0xff]  ;;  %v4851_v39 = vld [vmem:[%s6738_s5] ss:$0 sm:$0xff]  ;;  %v184_v46 = vld [vmem:[%s6737_s3 + $0x10] sm:$0xff]  ;;  %s6747_s5 = smov 104  }
  0x22   :  { %5516 = vmatpush3.bf16.msra.mxu0 %v5513_v20  ;;  %5522 = vmatprep.subr.bf16.mxu1 %v5521_v24  ;;  %v5529_v31 = vpack.c.bf16 %v183_v30, %v182_v29  ;;  %v4852_v41 = vld [vmem:[%s6739_s10] ss:$0 sm:$0xff]  ;;  %v185_v47 = vld [vmem:[%s6737_s3 + $0x18] sm:$0xff]  ;;  %s6712_s10 = smov 104  }
  0x23   :  { %5524 = vmatpush3.bf16.msra.mxu1 %v5521_v24  ;;  %5518 = vmatprep.subr.bf16.mxu0 %v5517_v25  ;;  %v5533_v50 = vpack.c.bf16 %v185_v47, %v184_v46  ;;  %v4853_v52 = vld [vmem:[%s6740_s30] ss:$0 sm:$0xff] }
  0x24   :  { %5526 = vmatprep.subr.bf16.mxu1 %v5525_v28  ;;  %v4856_v53 = vld [vmem:[%s6741_s28] ss:$0 sm:$0xff] }
  0x25   :  { %v4859_v63 = vld [vmem:[%s6742_s29] ss:$0 sm:$0xff] }
  0x26   :  { %5520 = vmatpush3.bf16.msra.mxu0 %v5517_v25 }
  0x27   :  { %5528 = vmatpush3.bf16.msra.mxu1 %v5525_v28  ;;  %5530 = vmatprep.subr.bf16.mxu0 %v5529_v31 }
  0x28   :  { %5198 = vmatprep.subr.mxu1 %v5813_v51 }
  0xa7   :  { %v95_v7 = vpop.xlane.xlu0 %94 }
  0xa8   :  { %v100_v8 = vmul.f32 0.03125, %v95_v7  ;;  %v143_v7 = vlaneseq }
  0xaa   :  { %v102_v9 = vsub.f32 %v88_v3, %v100_v8  ;;  %v136_v8 = vld [vmem:[%s6743_s2] sm:$0x3] }
  0xab   :  { %v98_v10 = vpop.xlane.xlu0 %97 }
  0xac   :  { %v101_v11 = vmul.f32 0.03125, %v98_v10  ;;  %v104_v12 = vmul.f32 %v102_v9, %v102_v9  ;;  %v142_v10 = vunpack.c.0.s8 %v141_v6 }
  0xae   :  { %v103_v13 = vsub.f32 %v89_v4, %v101_v11  ;;  %v106_v14 = vsel %vm92_vm0, %v104_v12, 0.0  ;;  %v144_v11 = vshrl.u32 %v143_v7, 7 }
  0xaf   :  { %107 = vadd.xlane.f32.xlu1 %v106_v14 }
  0xb0   :  { %v105_v15 = vmul.f32 %v103_v13, %v103_v13 }
  0xb2   :  { %v109_v16 = vsel %vm92_vm0, %v105_v15, 0.0 }
  0xb3   :  { %110 = vadd.xlane.f32.xlu1 %v109_v16  ;;  %v164_v16 = vsub.s32 0, %v144_v11 }
 0x13c   :  { %v108_v32 = vpop.xlane.xlu1 %107 }
 0x13d   :  { %v112_v33 = vmul.f32 0.03125, %v108_v32 }
 0x13f   :  { %v114_v34 = vadd.f32 1e-12, %v112_v33 }
 0x140   :  { %v111_v35 = vpop.xlane.xlu1 %110 }
 0x141   :  { %5649 = vrsqrt.f32 %v114_v34  ;;  %v113_v36 = vmul.f32 0.03125, %v111_v35 }
 0x143   :  { %v115_v37 = vadd.f32 1e-12, %v113_v36 }
 0x145   :  { %5651 = vrsqrt.f32 %v115_v37 }
 0x14b   :  { %v5650_v38 = vpop.eup %5649 }
 0x14c   :  { %v118_v40 = vmul.f32 %v5650_v38, %v102_v9  ;;  %v137_v9 = vsub.f32 1.0, %v136_v8 }
 0x14e   :  { %v126_v42 = vmul.f32 %v4851_v39, %v118_v40  ;;  %v138_v12 = vmul.f32 -1e+09, %v137_v9 }
 0x14f   :  { %v5652_v43 = vpop.eup %5651 }
 0x150   :  { %v6014_v44 = vadd.f32 %v4852_v41, %v126_v42  ;;  %v119_v45 = vmul.f32 %v5652_v43, %v103_v13  ;;  %v145_v13 = vsub.s32 %v142_v10, %v144_v11 }
 0x152   :  { %5173 = vmatprep.mubr.msk.f32.mxu0 %vm92_vm0, %v6014_v44  ;;  %5184 = vmatprep.mubr.msk.f32.mxu1 %vm92_vm0, %v6014_v44  ;;  %v127_v48 = vmul.f32 %v4851_v39, %v119_v45  ;;  %v146_v14 = vrot.slane %v138_v12, %v145_v13  ;;  %v187_v39 = vld [vmem:[%s6744_s0] sm:$0xff] }
 0x154   :  { %v6026_v49 = vadd.f32 %v4852_v41, %v127_v48  ;;  %v154_v15 = vrot.slane %v146_v14, %v145_v13  ;;  %v147_v17 = vcombine.high %v146_v14, %v146_v14 }
 0x156   :  { %5174 = vmatmul.mubr.msk.f32.vlgmr.msra.gmra.mrb[0].mxu0 %vm92_vm0, %v6026_v49  ;;  %5185 = vmatmul.mubr.msk.f32.vlgmr.msra.gmra.mrb[0].mxu1 %vm92_vm0, %v6026_v49  ;;  %v6083_v18 = vrot.slane %v154_v15, %v164_v16  ;;  %v161_v19 = vrot.slane %v147_v17, %v145_v13 }
 0x157   :  { %5532 = vmatpush3.bf16.msra.mxu0 %v5529_v31  ;;  %5195 = vmatprep.mubr.msk.f32.mxu0 %vm92_vm0, %v6014_v44 }
 0x158   :  { %5534 = vmatprep.subr.bf16.mxu0 %v5533_v50  ;;  %5200 = vmatprep.mubr.msk.f32.mxu1 %vm5814_vm1, %v5813_v51  ;;  %v6086_v23 = vrot.slane %v161_v19, %v164_v16 }
 0x15b   :  { %5536 = vmatpush3.bf16.msra.mxu0 %v5533_v50 }
 0x15c   :  { %5208 = vmatprep.subr.mxu0 %v5813_v51 }
 0x15e   :  { %5196 = vmatmul.mubr.msk.f32.vlgmr.msra.gmra.mrb[2].mxu0 %vm92_vm0, %v6026_v49 }
 0x15f   :  { %5210 = vmatprep.mubr.msk.f32.mxu0 %vm5814_vm1, %v5813_v51 }
 0x229   :  { %v5175_v54 = vpop.f32.mrb[0].mxu0  ;;  %v5186_v55 = vpop.f32.mrb[0].mxu1 }
 0x22a   :  { %v270_v56 = vpop.f32.mrb[1].mxu0  ;;  %v353_v57 = vpop.f32.mrb[1].mxu1  ;;  %v276_v61 = vadd.f32 %v5175_v54, %v4853_v52  ;;  %v6055_v62 = vadd.f32 %v5186_v55, %v4856_v53 }
 0x22b   :  { %v271_v58 = vadd.f32 %v4853_v52, %v270_v56  ;;  %v6048_v59 = vadd.f32 %v4856_v53, %v353_v57 }
 0x22c   :  { %v6066_v1 = vmul.f32 0.35355338, %v276_v61 }
 0x22d   :  { %v6050_v60 = vmul.f32 0.35355338, %v271_v58  ;;  %5199 = vmatpush3.xpose.msk.msra.mxu1 %vm449_vm2, %v6048_v59 }
 0x22e   :  { %5203 = vmatprep.subr.mxu1 %v5813_v51 }
 0x230   :  { %5201 = vmatmul.mubr.msk.f32.vlgmr.msra.gmra.mrb[2].mxu1 %vm449_vm2, %v6050_v60 }
 0x231   :  { %v5197_v0 = vpop.f32.mrb[2].mxu0  ;;  %5204 = vmatpush3.xpose.msk.msra.mxu1 %vm449_vm2, %v6055_v62  ;;  %5205 = vmatprep.mubr.msk.f32.mxu1 %vm5814_vm1, %v5813_v51 }
 0x232   :  { %v434_v2 = vpop.f32.mrb[3].mxu0  ;;  %5213 = vmatprep.subr.mxu1 %v5813_v51  ;;  %v6069_v3 = vadd.f32 %v5197_v0, %v4859_v63 }
 0x233   :  { %v6071_v4 = vadd.f32 %v4859_v63, %v434_v2 }
 0x234   :  { %5206 = vmatmul.mubr.msk.f32.vlgmr.msra.gmra.mrb[4].mxu1 %vm449_vm2, %v6066_v1 }
 0x235   :  { %5209 = vmatpush3.msra.mxu0 %v6071_v4  ;;  %5214 = vmatpush3.msra.mxu1 %v6069_v3 }
 0x236   :  { %5215 = vmatprep.mubr.msk.f32.mxu1 %vm5814_vm1, %v5813_v51  ;;  %5223 = vmatprep.subr.mxu1 %v5813_v51 }
 0x237   :  { %5218 = vmatprep.subr.mxu0 %v187_v39 }
 0x303   :  { %v522_v20 = vpop.f32.mrb[2].mxu1 }
 0x304   :  { %v523_v21 = vadd.f32 %v522_v20, %v6083_v18  ;;  %v5202_v22 = vpop.f32.mrb[3].mxu1 }
 0x306   :  { %v602_v24 = vsel %vm449_vm2, %v523_v21, -inf }
 0x307   :  { %603 = vmax.xlane.f32.xlu0 %v602_v24  ;;  %v598_v25 = vpop.f32.mrb[4].mxu1 }
 0x308   :  { %v599_v26 = vadd.f32 %v598_v25, %v6086_v23  ;;  %v5207_v27 = vpop.f32.mrb[5].mxu1 }
 0x30a   :  { %v605_v28 = vsel %vm449_vm2, %v599_v26, -inf }
 0x30b   :  { %606 = vmax.xlane.f32.xlu1 %v605_v28 }
 0x394   :  { %v604_v29 = vpop.xlane.xlu0 %603 }
 0x395   :  { %v608_v30 = vsub.f32 %v523_v21, %v604_v29 }
 0x397   :  { %v610_v31 = vmul.f32 1.442695, %v608_v30 }
 0x398   :  { %v607_v32 = vpop.xlane.xlu1 %606 }
 0x399   :  { %5653 = vpow2.f32 %v610_v31  ;;  %v609_v33 = vsub.f32 %v599_v26, %v607_v32 }
 0x39b   :  { %v612_v34 = vmul.f32 1.442695, %v609_v33 }
 0x39d   :  { %5655 = vpow2.f32 %v612_v34 }
 0x3a3   :  { %v5654_v35 = vpop.eup %5653 }
 0x3a4   :  { %v614_v36 = vsel %vm449_vm2, %v5654_v35, 0.0 }
 0x3a5   :  { %615 = vadd.xlane.f32.xlu0 %v614_v36 }
 0x3a7   :  { %v5656_v37 = vpop.eup %5655 }
 0x3a8   :  { %v617_v38 = vsel %vm449_vm2, %v5656_v37, 0.0 }
 0x3a9   :  { %618 = vadd.xlane.f32.xlu1 %v617_v38 }
 0x3ba   :  { %853 = vrot.lane.b32.xlu1 %v6050_v60, %s6716_s4 }
 0x3bb   :  { %855 = vrot.lane.b32.xlu0 %v6048_v59, %s6716_s4 }
 0x3be   :  { %933 = vrot.lane.b32.xlu1 %v6055_v62, %s6716_s4 }
 0x3c2   :  { %931 = vrot.lane.b32.xlu1 %v6066_v1, %s6716_s4 }
 0x3c6   :  { %1270 = vrot.lane.b32.xlu1 %v6048_v59, %s6714_s8 }
 0x432   :  { %v616_v40 = vpop.xlane.xlu0 %615 }
 0x433   :  { %5657 = vrcp.f32 %v616_v40 }
 0x436   :  { %v619_v41 = vpop.xlane.xlu1 %618  ;;  %v856_v47 = vpop.permute.xlu0 %855 }
 0x437   :  { %5659 = vrcp.f32 %v619_v41 }
 0x43a   :  { %v854_v48 = vpop.permute.xlu1 %853 }
 0x43d   :  { %v5658_v42 = vpop.eup %5657 }
 0x43e   :  { %v622_v43 = vmul.f32 %v5658_v42, %v5654_v35  ;;  %v934_v53 = vpop.permute.xlu1 %933 }
 0x440   :  { %5211 = vmatmul.mubr.msk.f32.vlgmr.msra.gmra.mrb[4].mxu0 %vm449_vm2, %v622_v43 }
 0x441   :  { %v5660_v45 = vpop.eup %5659  ;;  %5219 = vmatpush3.msra.mxu0 %v187_v39  ;;  %v188_v39 = vld [vmem:[%s6744_s0 + $0x8] sm:$0xff] }
 0x442   :  { %v623_v46 = vmul.f32 %v5660_v45, %v5656_v37  ;;  %5228 = vmatprep.subr.mxu0 %v5813_v51  ;;  %v932_v56 = vpop.permute.xlu1 %931 }
 0x444   :  { %5216 = vmatmul.mubr.msk.f32.vlgmr.msra.gmra.mrb[6].mxu1 %vm449_vm2, %v623_v46 }
 0x445   :  { %5224 = vmatpush3.xpose.msk.msra.mxu1 %vm449_vm2, %v856_v47  ;;  %5225 = vmatprep.mubr.msk.f32.mxu1 %vm5814_vm1, %v5813_v51 }
 0x446   :  { %5233 = vmatprep.subr.mxu1 %v5813_v51  ;;  %v1271_v13 = vpop.permute.xlu1 %1270 }
 0x448   :  { %5226 = vmatmul.mubr.msk.f32.vlgmr.msra.gmra.mrb[8].mxu1 %vm449_vm2, %v854_v48 }
 0x449   :  { %5235 = vmatprep.mubr.msk.f32.mxu1 %vm5814_vm1, %v5813_v51 }
 0x513   :  { %v693_v50 = vpop.f32.mrb[4].mxu0 }
 0x514   :  { %v5212_v52 = vpop.f32.mrb[5].mxu0  ;;  %5220 = vmatprep.mubr.msk.f32.mxu0 %vm449_vm2, %v693_v50 }
 0x517   :  { %v766_v54 = vpop.f32.mrb[6].mxu1 }
 0x518   :  { %v5217_v55 = vpop.f32.mrb[7].mxu1  ;;  %5221 = vmatmul.mubr.msk.f32.vlgmr.msra.gmra.mrb[6].mxu0 %vm449_vm2, %v766_v54 }
 0x519   :  { %5229 = vmatpush3.xpose.msk.msra.mxu0 %vm449_vm2, %v934_v53  ;;  %5230 = vmatprep.mubr.msk.f32.mxu0 %vm5814_vm1, %v5813_v51 }
 0x51a   :  { %5238 = vmatprep.subr.mxu0 %v5813_v51 }
 0x51b   :  { %v927_v57 = vpop.f32.mrb[8].mxu1 }
 0x51c   :  { %v928_v58 = vadd.f32 %v927_v57, %v6083_v18  ;;  %v5227_v61 = vpop.f32.mrb[9].mxu1  ;;  %5231 = vmatmul.mubr.msk.f32.vlgmr.msra.gmra.mrb[8].mxu0 %vm449_vm2, %v932_v56  ;;  %v189_v57 = vld [vmem:[%s6744_s0 + $0x10] sm:$0xff] }
 0x51d   :  { %5240 = vmatprep.mubr.msk.f32.mxu0 %vm5814_vm1, %v5813_v51 }
 0x51e   :  { %v1009_v63 = vsel %vm449_vm2, %v928_v58, -inf }
 0x51f   :  { %1010 = vmax.xlane.f32.xlu0 %v1009_v63 }
 0x535   :  { %1032 = vrot.lane.b32.xlu0 %v6071_v4, %s6716_s4 }
 0x539   :  { %1268 = vrot.lane.b32.xlu0 %v6050_v60, %s6714_s8 }
 0x53d   :  { %1346 = vrot.lane.b32.xlu0 %v6066_v1, %s6714_s8 }
 0x5ac   :  { %v1011_v0 = vpop.xlane.xlu0 %1010 }
 0x5ad   :  { %v1015_v2 = vsub.f32 %v928_v58, %v1011_v0 }
 0x5af   :  { %v1017_v5 = vmul.f32 1.442695, %v1015_v2 }
 0x5b0   :  { %v1033_v6 = vpop.permute.xlu0 %1032 }
 0x5b1   :  { %5661 = vpow2.f32 %v1017_v5  ;;  %5234 = vmatpush3.msra.mxu1 %v1033_v6 }
 0x5b2   :  { %5248 = vmatprep.subr.mxu1 %v5813_v51 }
 0x5b4   :  { %v1269_v17 = vpop.permute.xlu0 %1268 }
 0x5b8   :  { %v1347_v20 = vpop.permute.xlu0 %1346 }
 0x5bb   :  { %v5662_v7 = vpop.eup %5661 }
 0x5bc   :  { %v1021_v8 = vsel %vm449_vm2, %v5662_v7, 0.0 }
 0x5bd   :  { %1022 = vadd.xlane.f32.xlu1 %v1021_v8 }
 0x5ce   :  { %1348 = vrot.lane.b32.xlu1 %v6055_v62, %s6714_s8 }
 0x5ef   :  { %v1005_v9 = vpop.f32.mrb[8].mxu0 }
 0x5f0   :  { %v1006_v10 = vadd.f32 %v1005_v9, %v6086_v23  ;;  %v5232_v11 = vpop.f32.mrb[9].mxu0 }
 0x5f2   :  { %v1012_v12 = vsel %vm449_vm2, %v1006_v10, -inf }
 0x5f3   :  { %1013 = vmax.xlane.f32.xlu1 %v1012_v12 }
 0x64a   :  { %v1023_v14 = vpop.xlane.xlu1 %1022 }
 0x64b   :  { %5663 = vrcp.f32 %v1023_v14 }
 0x64e   :  { %v1349_v19 = vpop.permute.xlu1 %1348 }
 0x655   :  { %v5664_v15 = vpop.eup %5663 }
 0x656   :  { %v1029_v16 = vmul.f32 %v5664_v15, %v5662_v7 }
 0x658   :  { %5236 = vmatmul.mubr.msk.f32.vlgmr.msra.gmra.mrb[10].mxu1 %vm449_vm2, %v1029_v16 }
 0x659   :  { %5249 = vmatpush3.xpose.msk.msra.mxu1 %vm449_vm2, %v1271_v13  ;;  %5250 = vmatprep.mubr.msk.f32.mxu1 %vm5814_vm1, %v5813_v51 }
 0x65a   :  { %5253 = vmatprep.subr.mxu1 %v5813_v51 }
 0x65c   :  { %5251 = vmatmul.mubr.msk.f32.vlgmr.msra.gmra.mrb[12].mxu1 %vm449_vm2, %v1269_v17 }
 0x65d   :  { %5254 = vmatpush3.xpose.msk.msra.mxu1 %vm449_vm2, %v1349_v19  ;;  %5255 = vmatprep.mubr.msk.f32.mxu1 %vm5814_vm1, %v5813_v51 }
 0x65e   :  { %5263 = vmatprep.subr.mxu1 %v5813_v51 }
 0x660   :  { %5256 = vmatmul.mubr.msk.f32.vlgmr.msra.gmra.mrb[14].mxu1 %vm449_vm2, %v1347_v20 }
 0x661   :  { %5265 = vmatprep.mubr.msk.f32.mxu1 %vm5814_vm1, %v5813_v51 }
 0x680   :  { %v1014_v21 = vpop.xlane.xlu1 %1013 }
 0x681   :  { %v1016_v22 = vsub.f32 %v1006_v10, %v1014_v21 }
 0x683   :  { %v1019_v24 = vmul.f32 1.442695, %v1016_v22 }
 0x685   :  { %5665 = vpow2.f32 %v1019_v24 }
 0x68f   :  { %v5666_v25 = vpop.eup %5665 }
 0x690   :  { %v1024_v26 = vsel %vm449_vm2, %v5666_v25, 0.0 }
 0x691   :  { %1025 = vadd.xlane.f32.xlu0 %v1024_v26 }
 0x6a7   :  { %1109 = vrot.lane.b32.xlu0 %v6069_v3, %s6716_s4 }
 0x6ab   :  { %1522 = vrot.lane.b32.xlu0 %v6069_v3, %s6714_s8 }
 0x6af   :  { %1683 = vrot.lane.b32.xlu0 %v6048_v59, %s6712_s10 }
 0x6b3   :  { %1761 = vrot.lane.b32.xlu0 %v6055_v62, %s6712_s10 }
 0x6b7   :  { %1681 = vrot.lane.b32.xlu0 %v6050_v60, %s6712_s10 }
 0x71e   :  { %v1026_v27 = vpop.xlane.xlu0 %1025 }
 0x71f   :  { %5667 = vrcp.f32 %v1026_v27 }
 0x722   :  { %v1110_v28 = vpop.permute.xlu0 %1109 }
 0x723   :  { %5239 = vmatpush3.msra.mxu0 %v1110_v28 }
 0x724   :  { %5243 = vmatprep.subr.mxu0 %v188_v39 }
 0x726   :  { %v1523_v29 = vpop.permute.xlu0 %1522 }
 0x727   :  { %5264 = vmatpush3.msra.mxu1 %v1523_v29 }
 0x728   :  { %5273 = vmatprep.subr.mxu1 %v5813_v51 }
 0x729   :  { %v5668_v30 = vpop.eup %5667 }
 0x72a   :  { %v1030_v31 = vmul.f32 %v5668_v30, %v5666_v25  ;;  %v1684_v61 = vpop.permute.xlu0 %1683 }
 0x72b   :  { %v1104_v32 = vpop.f32.mrb[10].mxu1 }
 0x72c   :  { %v5237_v33 = vpop.f32.mrb[11].mxu1  ;;  %5241 = vmatmul.mubr.msk.f32.vlgmr.msra.gmra.mrb[10].mxu0 %vm449_vm2, %v1030_v31 }
 0x72d   :  { %5245 = vmatprep.mubr.msk.f32.mxu0 %vm449_vm2, %v1104_v32  ;;  %5244 = vmatpush3.msra.mxu0 %v188_v39 }
 0x72e   :  { %5258 = vmatprep.subr.mxu0 %v5813_v51  ;;  %v1762_v2 = vpop.permute.xlu0 %1761 }
 0x72f   :  { %v1342_v59 = vpop.f32.mrb[12].mxu1 }
 0x730   :  { %v1343_v62 = vadd.f32 %v1342_v59, %v6083_v18  ;;  %v5252_v60 = vpop.f32.mrb[13].mxu1 }
 0x732   :  { %v1424_v34 = vsel %vm449_vm2, %v1343_v62, -inf  ;;  %v1682_v6 = vpop.permute.xlu0 %1681 }
 0x733   :  { %1425 = vmax.xlane.f32.xlu1 %v1424_v34  ;;  %v1420_v35 = vpop.f32.mrb[14].mxu1 }
 0x734   :  { %v1421_v36 = vadd.f32 %v1420_v35, %v6086_v23  ;;  %v5257_v37 = vpop.f32.mrb[15].mxu1 }
 0x736   :  { %v1427_v38 = vsel %vm449_vm2, %v1421_v36, -inf }
 0x737   :  { %1428 = vmax.xlane.f32.xlu1 %v1427_v38 }
 0x7c0   :  { %v1426_v40 = vpop.xlane.xlu1 %1425 }
 0x7c1   :  { %v1430_v41 = vsub.f32 %v1343_v62, %v1426_v40  ;;  %v4862_v40 = vld [vmem:[%s6688_s12] ss:$0 sm:$0xff] }
 0x7c3   :  { %v1432_v42 = vmul.f32 1.442695, %v1430_v41 }
 0x7c4   :  { %v1429_v43 = vpop.xlane.xlu1 %1428 }
 0x7c5   :  { %5669 = vpow2.f32 %v1432_v42  ;;  %v1431_v45 = vsub.f32 %v1421_v36, %v1429_v43  ;;  %v190_v36 = vld [vmem:[%s6744_s0 + $0x18] sm:$0xff] }
 0x7c7   :  { %v1434_v46 = vmul.f32 1.442695, %v1431_v45 }
 0x7c9   :  { %5671 = vpow2.f32 %v1434_v46 }
 0x7cf   :  { %v5670_v47 = vpop.eup %5669 }
 0x7d0   :  { %v1436_v48 = vsel %vm449_vm2, %v5670_v47, 0.0 }
 0x7d1   :  { %1437 = vadd.xlane.f32.xlu1 %v1436_v48 }
 0x7d3   :  { %v5672_v50 = vpop.eup %5671 }
 0x7d4   :  { %v1439_v52 = vsel %vm449_vm2, %v5672_v50, 0.0 }
 0x7d5   :  { %1440 = vadd.xlane.f32.xlu1 %v1439_v52 }
 0x7e6   :  { %1446 = vrot.lane.b32.xlu1 %v6071_v4, %s6714_s8 }
 0x7ea   :  { %1759 = vrot.lane.b32.xlu1 %v6066_v1, %s6712_s10 }
 0x7ff   :  { %v1181_v53 = vpop.f32.mrb[10].mxu0 }
 0x800   :  { %v5242_v54 = vpop.f32.mrb[11].mxu0  ;;  %5246 = vmatmul.mubr.msk.f32.vlgmr.msra.gmra.mrb[6].mxu0 %vm449_vm2, %v1181_v53 }
 0x801   :  { %5260 = vmatprep.mubr.msk.f32.mxu0 %vm5814_vm1, %v5813_v51 }
 0x85e   :  { %v1438_v55 = vpop.xlane.xlu1 %1437 }
 0x85f   :  { %5673 = vrcp.f32 %v1438_v55 }
 0x862   :  { %v1441_v56 = vpop.xlane.xlu1 %1440 }
 0x863   :  { %5675 = vrcp.f32 %v1441_v56 }
 0x866   :  { %v1447_v58 = vpop.permute.xlu1 %1446 }
 0x867   :  { %5259 = vmatpush3.msra.mxu0 %v1447_v58 }
 0x868   :  { %5268 = vmatprep.subr.mxu0 %v189_v57 }
 0x869   :  { %v5674_v1 = vpop.eup %5673 }
 0x86a   :  { %v1444_v63 = vmul.f32 %v5674_v1, %v5670_v47  ;;  %v1760_v11 = vpop.permute.xlu1 %1759 }
 0x86c   :  { %5261 = vmatmul.mubr.msk.f32.vlgmr.msra.gmra.mrb[12].mxu0 %vm449_vm2, %v1444_v63  ;;  %v2141_v63 = vld [vmem:[%s6691_s15 + $0x8] sm:$0xff] }
 0x86d   :  { %v5676_v0 = vpop.eup %5675  ;;  %5269 = vmatpush3.msra.mxu0 %v189_v57 }
 0x86e   :  { %v1445_v5 = vmul.f32 %v5676_v0, %v5672_v50  ;;  %5278 = vmatprep.subr.mxu0 %v5813_v51 }
 0x870   :  { %5266 = vmatmul.mubr.msk.f32.vlgmr.msra.gmra.mrb[16].mxu1 %vm449_vm2, %v1445_v5  ;;  %v2143_v5 = vld [vmem:[%s6691_s15 + $0x18] sm:$0xff] }
 0x871   :  { %5274 = vmatpush3.xpose.msk.msra.mxu1 %vm449_vm2, %v1684_v61  ;;  %5275 = vmatprep.mubr.msk.f32.mxu1 %vm5814_vm1, %v5813_v51 }
 0x872   :  { %5283 = vmatprep.subr.mxu1 %v5813_v51 }
 0x874   :  { %5276 = vmatmul.mubr.msk.f32.vlgmr.msra.gmra.mrb[18].mxu1 %vm449_vm2, %v1682_v6 }
 0x875   :  { %5285 = vmatprep.mubr.msk.f32.mxu1 %vm5814_vm1, %v5813_v51 }
 0x93f   :  { %v1518_v7 = vpop.f32.mrb[12].mxu0 }
 0x940   :  { %v5262_v8 = vpop.f32.mrb[13].mxu0  ;;  %5270 = vmatprep.mubr.msk.f32.mxu0 %vm449_vm2, %v1518_v7 }
 0x943   :  { %v1594_v9 = vpop.f32.mrb[16].mxu1 }
 0x944   :  { %v5267_v10 = vpop.f32.mrb[17].mxu1  ;;  %5271 = vmatmul.mubr.msk.f32.vlgmr.msra.gmra.mrb[6].mxu0 %vm449_vm2, %v1594_v9 }
 0x945   :  { %5279 = vmatpush3.xpose.msk.msra.mxu0 %vm449_vm2, %v1762_v2  ;;  %5280 = vmatprep.mubr.msk.f32.mxu0 %vm5814_vm1, %v5813_v51  ;;  %v2142_v2 = vld [vmem:[%s6691_s15 + $0x10] sm:$0xff] }
 0x946   :  { %5288 = vmatprep.subr.mxu0 %v5813_v51  ;;  %v5541_v6 = vpack.c.bf16 %v2143_v5, %v2142_v2 }
 0x947   :  { %v1755_v12 = vpop.f32.mrb[18].mxu1 }
 0x948   :  { %v1756_v13 = vadd.f32 %v1755_v12, %v6083_v18  ;;  %v5277_v14 = vpop.f32.mrb[19].mxu1  ;;  %5281 = vmatmul.mubr.msk.f32.vlgmr.msra.gmra.mrb[14].mxu0 %vm449_vm2, %v1760_v11 }
 0x949   :  { %5290 = vmatprep.mubr.msk.f32.mxu0 %vm5814_vm1, %v5813_v51  ;;  %v4895_v14 = vld [vmem:[%s6689_s13] ss:$0 sm:$0xff] }
 0x94a   :  { %v1837_v15 = vsel %vm449_vm2, %v1756_v13, -inf }
 0x94b   :  { %1838 = vmax.xlane.f32.xlu0 %v1837_v15 }
 0x9d8   :  { %v1839_v16 = vpop.xlane.xlu0 %1838 }
 0x9d9   :  { %v1843_v17 = vsub.f32 %v1756_v13, %v1839_v16 }
 0x9db   :  { %v1845_v19 = vmul.f32 1.442695, %v1843_v17 }
 0x9dd   :  { %5677 = vpow2.f32 %v1845_v19  ;;  %v4896_v19 = vld [vmem:[%s6690_s14] ss:$0 sm:$0xff] }
 0x9e7   :  { %v5678_v20 = vpop.eup %5677 }
 0x9e8   :  { %v1849_v21 = vsel %vm449_vm2, %v5678_v20, 0.0 }
 0x9e9   :  { %1850 = vadd.xlane.f32.xlu0 %v1849_v21 }
 0xa1b   :  { %v1833_v22 = vpop.f32.mrb[14].mxu0 }
 0xa1c   :  { %v1834_v24 = vadd.f32 %v1833_v22, %v6086_v23  ;;  %v5282_v25 = vpop.f32.mrb[15].mxu0 }
 0xa1d   :  { %v2250_v25 = vld [vmem:[%s6693_s17] sm:$0xff] }
 0xa1e   :  { %v1840_v26 = vsel %vm449_vm2, %v1834_v24, -inf }
 0xa1f   :  { %1841 = vmax.xlane.f32.xlu1 %v1840_v26  ;;  %v2251_v26 = vld [vmem:[%s6693_s17 + $0x8] sm:$0xff] }
 0xa30   :  { %1935 = vrot.lane.b32.xlu1 %v6069_v3, %s6712_s10 }
 0xa76   :  { %v1851_v33 = vpop.xlane.xlu0 %1850 }
 0xaac   :  { %v1842_v27 = vpop.xlane.xlu1 %1841 }
 0xaad   :  { %v1844_v28 = vsub.f32 %v1834_v24, %v1842_v27  ;;  %v5545_v27 = vpack.c.bf16 %v2251_v26, %v2250_v25  ;;  %v4908_v25 = vld [vmem:[%s6735_s1 + $0x38] sm:$0xff]  ;;  %v4917_v26 = vld [vmem:[%s6737_s3 + $0x30] sm:$0xff] }
 0xaaf   :  { %v1847_v29 = vmul.f32 1.442695, %v1844_v28  ;;  %v2252_v28 = vld [vmem:[%s6693_s17 + $0x10] sm:$0xff] }
 0xab0   :  { %v1936_v30 = vpop.permute.xlu1 %1935 }
 0xab1   :  { %5679 = vpow2.f32 %v1847_v29  ;;  %5289 = vmatpush3.msra.mxu0 %v1936_v30  ;;  %v2253_v29 = vld [vmem:[%s6693_s17 + $0x18] sm:$0xff] }
 0xab2   :  { %5681 = vrcp.f32 %v1851_v33  ;;  %5293 = vmatprep.subr.mxu0 %v190_v36  ;;  %v5549_v30 = vpack.c.bf16 %v2253_v29, %v2252_v28  ;;  %v4918_v28 = vld [vmem:[%s6737_s3 + $0x38] sm:$0xff] }
 0xab3   :  { %v5581_v29 = vpack.c.bf16 %v4918_v28, %v4917_v26  ;;  %v4920_v26 = vld [vmem:[%s6744_s0 + $0x20] sm:$0xff] }
 0xabb   :  { %v5680_v31 = vpop.eup %5679 }
 0xabc   :  { %v1852_v32 = vsel %vm449_vm2, %v5680_v31, 0.0  ;;  %v5682_v62 = vpop.eup %5681 }
 0xabd   :  { %1853 = vadd.xlane.f32.xlu0 %v1852_v32  ;;  %v1857_v60 = vmul.f32 %v5682_v62, %v5678_v20  ;;  %v2255_v32 = vld [vmem:[%s6693_s17 + $0x28] sm:$0xff]  ;;  %v2257_v62 = vld [vmem:[%s6693_s17 + $0x38] sm:$0xff] }
 0xad3   :  { %1859 = vrot.lane.b32.xlu0 %v6071_v4, %s6712_s10 }
 0xb4a   :  { %v1854_v59 = vpop.xlane.xlu0 %1853 }
 0xb4b   :  { %5683 = vrcp.f32 %v1854_v59  ;;  %v2256_v59 = vld [vmem:[%s6693_s17 + $0x30] sm:$0xff] }
 0xb4e   :  { %v1860_v3 = vpop.permute.xlu0 %1859 }
 0xb4f   :  { %5284 = vmatpush3.msra.mxu1 %v1860_v3  ;;  %v4897_v3 = vld [vmem:[%s6692_s16] ss:$0 sm:$0xff] }
 0xb50   :  { %5286 = vmatmul.mubr.msk.f32.vlgmr.msra.gmra.mrb[20].mxu1 %vm449_vm2, %v1857_v60  ;;  %v5557_v60 = vpack.c.bf16 %v2257_v62, %v2256_v59 }
 0xb55   :  { %v5684_v34 = vpop.eup %5683 }
 0xb56   :  { %v1858_v35 = vmul.f32 %v5684_v34, %v5680_v31  ;;  %v2254_v31 = vld [vmem:[%s6693_s17 + $0x20] sm:$0xff] }
 0xb57   :  { %v5553_v33 = vpack.c.bf16 %v2255_v32, %v2254_v31  ;;  %v4911_v31 = vld [vmem:[%s6736_s7 + $0x28] sm:$0xff] }
 0xb58   :  { %5291 = vmatmul.mubr.msk.f32.vlgmr.msra.gmra.mrb[16].mxu0 %vm449_vm2, %v1858_v35 }
 0xb59   :  { %5294 = vmatpush3.msra.mxu0 %v190_v36 }
 0xb5a   :  { %5546 = vmatprep.subr.bf16.mxu0 %v5545_v27 }
 0xc23   :  { %v1931_v4 = vpop.f32.mrb[20].mxu1 }
 0xc24   :  { %v5287_v37 = vpop.f32.mrb[21].mxu1  ;;  %5295 = vmatprep.mubr.msk.f32.mxu0 %vm449_vm2, %v1931_v4 }
 0xc2b   :  { %v2007_v38 = vpop.f32.mrb[16].mxu0 }
 0xc2c   :  { %v5292_v39 = vpop.f32.mrb[17].mxu0  ;;  %5296 = vmatmul.mubr.msk.f32.vlgmr.msra.gmra.mrb[6].mxu0 %vm449_vm2, %v2007_v38 }
 0xc2d   :  { %5548 = vmatpush3.bf16.msra.mxu0 %v5545_v27 }
 0xc2e   :  { %5550 = vmatprep.subr.bf16.mxu0 %v5549_v30 }
 0xc31   :  { %5552 = vmatpush3.bf16.msra.mxu0 %v5549_v30  ;;  %v4910_v30 = vld [vmem:[%s6736_s7 + $0x20] sm:$0xff] }
 0xc32   :  { %5554 = vmatprep.subr.bf16.mxu0 %v5553_v33  ;;  %v5569_v32 = vpack.c.bf16 %v4911_v31, %v4910_v30 }
 0xc35   :  { %5556 = vmatpush3.bf16.msra.mxu0 %v5553_v33 }
 0xc36   :  { %5558 = vmatprep.subr.bf16.mxu0 %v5557_v60 }
 0xc39   :  { %5560 = vmatpush3.bf16.msra.mxu0 %v5557_v60 }
 0xcff   :  { %v5297_v41 = vpop.f32.mrb[6].mxu0 }
 0xd00   :  { %v5621_v42 = vadd.f32 %v5297_v41, %v4862_v40  ;;  %v2083_v43 = vpop.f32.mrb[7].mxu0 }
 0xd01   :  { %v5622_v45 = vadd.f32 %v4862_v40, %v2083_v43 }
 0xd02   :  { %v2095_v46 = vadd.f32 %v5621_v42, %v6026_v49 }
 0xd03   :  { %v2094_v47 = vadd.f32 %v5622_v45, %v6014_v44  ;;  %v2140_v44 = vld [vmem:[%s6691_s15] sm:$0xff] }
 0xd04   :  { %v2101_v48 = vsel %vm92_vm0, %v2095_v46, 0.0  ;;  %v5537_v0 = vpack.c.bf16 %v2141_v63, %v2140_v44 }
 0xd05   :  { %2102 = vadd.xlane.f32.xlu0 %v2101_v48  ;;  %v2098_v50 = vsel %vm92_vm0, %v2094_v47, 0.0 }
 0xd06   :  { %2099 = vadd.xlane.f32.xlu1 %v2098_v50  ;;  %5538 = vmatprep.subr.bf16.mxu1 %v5537_v0 }
 0xd07   :  { %5540 = vmatpush3.bf16.msra.mxu1 %v5537_v0 }
 0xd08   :  { %5542 = vmatprep.subr.bf16.mxu1 %v5541_v6 }
 0xd0b   :  { %5544 = vmatpush3.bf16.msra.mxu1 %v5541_v6 }
 0xd92   :  { %v2103_v52 = vpop.xlane.xlu0 %2102 }
 0xd93   :  { %v2105_v53 = vmul.f32 0.03125, %v2103_v52  ;;  %v2100_v54 = vpop.xlane.xlu1 %2099 }
 0xd94   :  { %v2104_v55 = vmul.f32 0.03125, %v2100_v54 }
 0xd95   :  { %v2107_v56 = vsub.f32 %v2095_v46, %v2105_v53 }
 0xd96   :  { %v2106_v57 = vsub.f32 %v2094_v47, %v2104_v55 }
 0xd97   :  { %v2109_v58 = vmul.f32 %v2107_v56, %v2107_v56 }
 0xd98   :  { %v2108_v61 = vmul.f32 %v2106_v57, %v2106_v57 }
 0xd99   :  { %v2113_v1 = vsel %vm92_vm0, %v2109_v58, 0.0  ;;  %v4900_v58 = vld [vmem:[%s6694_s18] ss:$0 sm:$0xff] }
 0xd9a   :  { %2114 = vadd.xlane.f32.xlu1 %v2113_v1  ;;  %v2110_v49 = vsel %vm92_vm0, %v2108_v61, 0.0 }
 0xd9b   :  { %2111 = vadd.xlane.f32.xlu0 %v2110_v49 }
 0xe27   :  { %v2115_v7 = vpop.xlane.xlu1 %2114 }
 0xe28   :  { %v2117_v8 = vmul.f32 0.03125, %v2115_v7  ;;  %v2112_v9 = vpop.xlane.xlu0 %2111 }
 0xe29   :  { %v2116_v10 = vmul.f32 0.03125, %v2112_v9 }
 0xe2a   :  { %v2119_v11 = vadd.f32 1e-12, %v2117_v8 }
 0xe2b   :  { %v2118_v12 = vadd.f32 1e-12, %v2116_v10 }
 0xe2c   :  { %5685 = vrsqrt.f32 %v2119_v11 }
 0xe2d   :  { %5687 = vrsqrt.f32 %v2118_v12 }
 0xe36   :  { %v5686_v13 = vpop.eup %5685 }
 0xe37   :  { %v5688_v15 = vpop.eup %5687  ;;  %v2123_v16 = vmul.f32 %v5686_v13, %v2107_v56 }
 0xe38   :  { %v2122_v17 = vmul.f32 %v5688_v15, %v2106_v57 }
 0xe39   :  { %v2131_v20 = vmul.f32 %v4895_v14, %v2123_v16  ;;  %v4905_v16 = vld [vmem:[%s6735_s1 + $0x20] sm:$0xff] }
 0xe3a   :  { %v2130_v21 = vmul.f32 %v4895_v14, %v2122_v17  ;;  %v4906_v17 = vld [vmem:[%s6735_s1 + $0x28] sm:$0xff] }
 0xe3b   :  { %v2139_v24 = vadd.f32 %v4896_v19, %v2131_v20  ;;  %v4915_v20 = vld [vmem:[%s6737_s3 + $0x20] sm:$0xff] }
 0xe3c   :  { %v2138_v22 = vadd.f32 %v4896_v19, %v2130_v21  ;;  %v5561_v19 = vpack.c.bf16 %v4906_v17, %v4905_v16  ;;  %v4916_v21 = vld [vmem:[%s6737_s3 + $0x28] sm:$0xff] }
 0xe3e   :  { %5306 = vmatprep.mubr.msk.f32.mxu1 %vm92_vm0, %v2138_v22  ;;  %5562 = vmatprep.subr.bf16.mxu1 %v5561_v19 }
 0xe3f   :  { %5307 = vmatmul.mubr.msk.f32.vlgmr.msra.gmra.mrb[22].mxu1 %vm92_vm0, %v2139_v24 }
 0xe40   :  { %5564 = vmatpush3.bf16.msra.mxu1 %v5561_v19 }
 0xf12   :  { %v5308_v34 = vpop.f32.mrb[22].mxu1 }
 0xf13   :  { %v2229_v35 = vadd.f32 %v5308_v34, %v4897_v3  ;;  %v2223_v36 = vpop.f32.mrb[23].mxu1 }
 0xf14   :  { %v2224_v4 = vadd.f32 %v4897_v3, %v2223_v36  ;;  %v4903_v36 = vld [vmem:[%s6695_s19] ss:$0 sm:$0xff] }
 0xf15   :  { %v2235_v37 = vmul.f32 0.044715, %v2229_v35  ;;  %v2233_v55 = vmul.f32 0.5, %v2229_v35 }
 0xf16   :  { %v2234_v38 = vmul.f32 0.044715, %v2224_v4  ;;  %v2232_v53 = vmul.f32 0.5, %v2224_v4 }
 0xf17   :  { %v2237_v39 = vmul.f32 %v2235_v37, %v2229_v35 }
 0xf18   :  { %v2236_v40 = vmul.f32 %v2234_v38, %v2224_v4 }
 0xf19   :  { %v2239_v41 = vmul.f32 %v2237_v39, %v2229_v35  ;;  %v4904_v39 = vld [vmem:[%s6696_s20] ss:$0 sm:$0xff] }
 0xf1a   :  { %v2238_v42 = vmul.f32 %v2236_v40, %v2224_v4 }
 0xf1b   :  { %v2241_v43 = vadd.f32 %v2239_v41, %v2229_v35 }
 0xf1c   :  { %v2240_v45 = vadd.f32 %v2238_v42, %v2224_v4  ;;  %v4912_v42 = vld [vmem:[%s6736_s7 + $0x30] sm:$0xff] }
 0xf1d   :  { %v2243_v46 = vmul.f32 0.7978846, %v2241_v43  ;;  %v4913_v43 = vld [vmem:[%s6736_s7 + $0x38] sm:$0xff] }
 0xf1e   :  { %v2242_v47 = vmul.f32 0.7978846, %v2240_v45 }
 0xf1f   :  { %5689 = vtanh.f32 %v2243_v46 }
 0xf20   :  { %5691 = vtanh.f32 %v2242_v47  ;;  %v5573_v47 = vpack.c.bf16 %v4913_v43, %v4912_v42 }
 0xf29   :  { %v5690_v48 = vpop.eup %5689 }
 0xf2a   :  { %v5692_v50 = vpop.eup %5691  ;;  %v2247_v52 = vadd.f32 1.0, %v5690_v48  ;;  %v4931_v48 = vld [vmem:[%s6742_s29 + $0x1] ss:$0 sm:$0xff] }
 0xf2b   :  { %v2246_v54 = vadd.f32 1.0, %v5692_v50 }
 0xf2c   :  { %v2249_v57 = vmul.f32 %v2247_v52, %v2233_v55 }
 0xf2d   :  { %v2248_v56 = vmul.f32 %v2246_v54, %v2232_v53 }
 0xf2f   :  { %5325 = vmatprep.mubr.msk.f32.mxu0 %vm2265_vm3, %v2248_v56  ;;  %v4925_v56 = vld [vmem:[%s6740_s30 + $0x1] ss:$0 sm:$0xff]  ;;  %s6745_s30 = smov 120  }
 0xf30   :  { %5326 = vmatmul.mubr.msk.f32.vlgmr.msra.gmra.mrb[18].mxu0 %vm2265_vm3, %v2249_v57  ;;  %v4928_v57 = vld [vmem:[%s6741_s28 + $0x1] ss:$0 sm:$0xff]  ;;  %s6746_s28 = smov 112  }
0x1003   :  { %v5327_v61 = vpop.f32.mrb[18].mxu0 }
0x1004   :  { %v2344_v1 = vadd.f32 %v5327_v61, %v4900_v58  ;;  %v2338_v49 = vpop.f32.mrb[19].mxu0 }
0x1005   :  { %v2339_v44 = vadd.f32 %v4900_v58, %v2338_v49 }
0x1006   :  { %v2348_v63 = vadd.f32 %v2344_v1, %v2139_v24  ;;  %v4907_v24 = vld [vmem:[%s6735_s1 + $0x30] sm:$0xff] }
0x1007   :  { %v2347_v0 = vadd.f32 %v2339_v44, %v2138_v22  ;;  %v5577_v22 = vpack.c.bf16 %v4916_v21, %v4915_v20  ;;  %v5565_v27 = vpack.c.bf16 %v4908_v25, %v4907_v24 }
0x1008   :  { %v2354_v2 = vsel %vm92_vm0, %v2348_v63, 0.0 }
0x1009   :  { %2355 = vadd.xlane.f32.xlu1 %v2354_v2  ;;  %v2351_v5 = vsel %vm92_vm0, %v2347_v0, 0.0  ;;  %5578 = vmatprep.subr.bf16.mxu0 %v5577_v22 }
0x100a   :  { %2352 = vadd.xlane.f32.xlu0 %v2351_v5  ;;  %5580 = vmatpush3.bf16.msra.mxu0 %v5577_v22 }
0x100b   :  { %5566 = vmatprep.subr.bf16.mxu1 %v5565_v27  ;;  %5582 = vmatprep.subr.bf16.mxu0 %v5581_v29 }
0x100c   :  { %5568 = vmatpush3.bf16.msra.mxu1 %v5565_v27 }
0x100d   :  { %5570 = vmatprep.subr.bf16.mxu1 %v5569_v32 }
0x100e   :  { %5584 = vmatpush3.bf16.msra.mxu0 %v5581_v29 }
0x100f   :  { %5371 = vmatprep.subr.mxu0 %v5813_v51 }
0x1096   :  { %v2356_v6 = vpop.xlane.xlu1 %2355 }
0x1097   :  { %v2358_v7 = vmul.f32 0.03125, %v2356_v6  ;;  %v2353_v8 = vpop.xlane.xlu0 %2352 }
0x1098   :  { %v2357_v9 = vmul.f32 0.03125, %v2353_v8 }
0x1099   :  { %v2360_v10 = vsub.f32 %v2348_v63, %v2358_v7 }
0x109a   :  { %v2359_v11 = vsub.f32 %v2347_v0, %v2357_v9 }
0x109b   :  { %v2362_v12 = vmul.f32 %v2360_v10, %v2360_v10 }
0x109c   :  { %v2361_v13 = vmul.f32 %v2359_v11, %v2359_v11 }
0x109d   :  { %v2366_v14 = vsel %vm92_vm0, %v2362_v12, 0.0 }
0x109e   :  { %2367 = vadd.xlane.f32.xlu1 %v2366_v14  ;;  %v2363_v15 = vsel %vm92_vm0, %v2361_v13, 0.0 }
0x109f   :  { %2364 = vadd.xlane.f32.xlu0 %v2363_v15 }
0x112b   :  { %v2368_v33 = vpop.xlane.xlu1 %2367 }
0x112c   :  { %v2370_v59 = vmul.f32 0.03125, %v2368_v33  ;;  %v2365_v62 = vpop.xlane.xlu0 %2364 }
0x112d   :  { %v2369_v60 = vmul.f32 0.03125, %v2365_v62 }
0x112e   :  { %v2372_v3 = vadd.f32 1e-12, %v2370_v59 }
0x112f   :  { %v2371_v34 = vadd.f32 1e-12, %v2369_v60 }
0x1130   :  { %5693 = vrsqrt.f32 %v2372_v3 }
0x1131   :  { %5695 = vrsqrt.f32 %v2371_v34 }
0x113a   :  { %v5694_v35 = vpop.eup %5693 }
0x113b   :  { %v5696_v4 = vpop.eup %5695  ;;  %v2376_v37 = vmul.f32 %v5694_v35, %v2360_v10 }
0x113c   :  { %v2375_v38 = vmul.f32 %v5696_v4, %v2359_v11 }
0x113d   :  { %v2384_v40 = vmul.f32 %v4903_v36, %v2376_v37 }
0x113e   :  { %v2383_v41 = vmul.f32 %v4903_v36, %v2375_v38 }
0x113f   :  { %v6332_v46 = vadd.f32 %v4904_v39, %v2384_v40 }
0x1140   :  { %v6330_v45 = vadd.f32 %v4904_v39, %v2383_v41 }
0x1142   :  { %5336 = vmatprep.mubr.msk.f32.mxu1 %vm92_vm0, %v6330_v45  ;;  %5358 = vmatprep.mubr.msk.f32.mxu0 %vm92_vm0, %v6330_v45 }
0x1143   :  { %5337 = vmatmul.mubr.msk.f32.vlgmr.msra.gmra.mrb[24].mxu1 %vm92_vm0, %v6332_v46  ;;  %5359 = vmatmul.mubr.msk.f32.vlgmr.msra.gmra.mrb[20].mxu0 %vm92_vm0, %v6332_v46 }
0x1144   :  { %5572 = vmatpush3.bf16.msra.mxu1 %v5569_v32  ;;  %5347 = vmatprep.mubr.msk.f32.mxu1 %vm92_vm0, %v6330_v45 }
0x1145   :  { %5574 = vmatprep.subr.bf16.mxu1 %v5573_v47  ;;  %5373 = vmatprep.mubr.msk.f32.mxu0 %vm5814_vm1, %v5813_v51 }
0x1148   :  { %5576 = vmatpush3.bf16.msra.mxu1 %v5573_v47 }
0x1149   :  { %5361 = vmatprep.subr.mxu1 %v5813_v51 }
0x114b   :  { %5348 = vmatmul.mubr.msk.f32.vlgmr.msra.gmra.mrb[26].mxu1 %vm92_vm0, %v6332_v46 }
0x114c   :  { %5363 = vmatprep.mubr.msk.f32.mxu1 %vm5814_vm1, %v5813_v51 }
0x1216   :  { %v5338_v50 = vpop.f32.mrb[24].mxu1  ;;  %v5360_v52 = vpop.f32.mrb[20].mxu0 }
0x1217   :  { %v2499_v53 = vpop.f32.mrb[25].mxu1  ;;  %v2663_v54 = vpop.f32.mrb[21].mxu0  ;;  %v2505_v44 = vadd.f32 %v5338_v50, %v4925_v56  ;;  %v6381_v5 = vadd.f32 %v5360_v52, %v4931_v48 }
0x1218   :  { %v6354_v55 = vadd.f32 %v4931_v48, %v2663_v54  ;;  %v2500_v61 = vadd.f32 %v4925_v56, %v2499_v53 }
0x1219   :  { %v6378_v2 = vmul.f32 0.35355338, %v2505_v44 }
0x121a   :  { %5372 = vmatpush3.msra.mxu0 %v6354_v55  ;;  %v6367_v63 = vmul.f32 0.35355338, %v2500_v61 }
0x121b   :  { %5381 = vmatprep.subr.mxu0 %v4920_v26 }
0x121e   :  { %v5349_v58 = vpop.f32.mrb[26].mxu1 }
0x121f   :  { %v2582_v1 = vpop.f32.mrb[27].mxu1  ;;  %v6370_v0 = vadd.f32 %v5349_v58, %v4928_v57 }
0x1220   :  { %v6363_v49 = vadd.f32 %v4928_v57, %v2582_v1 }
0x1222   :  { %5362 = vmatpush3.xpose.msk.msra.mxu1 %vm449_vm2, %v6363_v49 }
0x1223   :  { %5366 = vmatprep.subr.mxu1 %v5813_v51 }
0x1225   :  { %5364 = vmatmul.mubr.msk.f32.vlgmr.msra.gmra.mrb[28].mxu1 %vm449_vm2, %v6367_v63 }
0x1226   :  { %5367 = vmatpush3.xpose.msk.msra.mxu1 %vm449_vm2, %v6370_v0  ;;  %5368 = vmatprep.mubr.msk.f32.mxu1 %vm5814_vm1, %v5813_v51 }
0x1227   :  { %5376 = vmatprep.subr.mxu1 %v5813_v51 }
0x1229   :  { %5369 = vmatmul.mubr.msk.f32.vlgmr.msra.gmra.mrb[30].mxu1 %vm449_vm2, %v6378_v2 }
0x122a   :  { %5377 = vmatpush3.msra.mxu1 %v6381_v5  ;;  %5378 = vmatprep.mubr.msk.f32.mxu1 %vm5814_vm1, %v5813_v51 }
0x122b   :  { %5386 = vmatprep.subr.mxu1 %v5813_v51 }
0x12f8   :  { %v2750_v6 = vpop.f32.mrb[28].mxu1 }
0x12f9   :  { %v2751_v7 = vadd.f32 %v2750_v6, %v6083_v18  ;;  %v5365_v8 = vpop.f32.mrb[29].mxu1 }
0x12fb   :  { %v2830_v9 = vsel %vm449_vm2, %v2751_v7, -inf }
0x12fc   :  { %2831 = vmax.xlane.f32.xlu0 %v2830_v9  ;;  %v2826_v10 = vpop.f32.mrb[30].mxu1 }
0x12fd   :  { %v2827_v11 = vadd.f32 %v2826_v10, %v6086_v23  ;;  %v5370_v12 = vpop.f32.mrb[31].mxu1 }
0x12ff   :  { %v2833_v13 = vsel %vm449_vm2, %v2827_v11, -inf }
0x1300   :  { %2834 = vmax.xlane.f32.xlu1 %v2833_v13 }
0x1389   :  { %v2832_v14 = vpop.xlane.xlu0 %2831 }
0x138a   :  { %v2836_v15 = vsub.f32 %v2751_v7, %v2832_v14 }
0x138c   :  { %v2838_v16 = vmul.f32 1.442695, %v2836_v15 }
0x138d   :  { %v2835_v17 = vpop.xlane.xlu1 %2834 }
0x138e   :  { %5697 = vpow2.f32 %v2838_v16  ;;  %v2837_v19 = vsub.f32 %v2827_v11, %v2835_v17 }
0x1390   :  { %v2840_v20 = vmul.f32 1.442695, %v2837_v19 }
0x1392   :  { %5699 = vpow2.f32 %v2840_v20 }
0x1398   :  { %v5698_v21 = vpop.eup %5697 }
0x1399   :  { %v2842_v22 = vsel %vm449_vm2, %v5698_v21, 0.0 }
0x139a   :  { %2843 = vadd.xlane.f32.xlu0 %v2842_v22 }
0x139c   :  { %v5700_v24 = vpop.eup %5699 }
0x139d   :  { %v2845_v25 = vsel %vm449_vm2, %v5700_v24, 0.0 }
0x139e   :  { %2846 = vadd.xlane.f32.xlu1 %v2845_v25 }
0x13af   :  { %3081 = vrot.lane.b32.xlu1 %v6367_v63, %s6745_s30 }
0x13b0   :  { %3083 = vrot.lane.b32.xlu0 %v6363_v49, %s6745_s30 }
0x13b3   :  { %3161 = vrot.lane.b32.xlu1 %v6370_v0, %s6745_s30 }
0x13b7   :  { %3159 = vrot.lane.b32.xlu1 %v6378_v2, %s6745_s30 }
0x13bb   :  { %3498 = vrot.lane.b32.xlu1 %v6363_v49, %s6746_s28 }
0x1427   :  { %v2844_v27 = vpop.xlane.xlu0 %2843 }
0x1428   :  { %5701 = vrcp.f32 %v2844_v27 }
0x142b   :  { %v2847_v28 = vpop.xlane.xlu1 %2846  ;;  %v3084_v33 = vpop.permute.xlu0 %3083 }
0x142c   :  { %5703 = vrcp.f32 %v2847_v28 }
0x142f   :  { %v3082_v59 = vpop.permute.xlu1 %3081 }
0x1432   :  { %v5702_v29 = vpop.eup %5701 }
0x1433   :  { %v2850_v30 = vmul.f32 %v5702_v29, %v5698_v21  ;;  %v3162_v3 = vpop.permute.xlu1 %3161 }
0x1435   :  { %5374 = vmatmul.mubr.msk.f32.vlgmr.msra.gmra.mrb[22].mxu0 %vm449_vm2, %v2850_v30 }
0x1436   :  { %v5704_v31 = vpop.eup %5703  ;;  %5382 = vmatpush3.msra.mxu0 %v4920_v26  ;;  %v4921_v26 = vld [vmem:[%s6744_s0 + $0x28] sm:$0xff] }
0x1437   :  { %v2851_v32 = vmul.f32 %v5704_v31, %v5700_v24  ;;  %5391 = vmatprep.subr.mxu0 %v5813_v51  ;;  %v3160_v36 = vpop.permute.xlu1 %3159 }
0x1439   :  { %5379 = vmatmul.mubr.msk.f32.vlgmr.msra.gmra.mrb[32].mxu1 %vm449_vm2, %v2851_v32 }
0x143a   :  { %5387 = vmatpush3.xpose.msk.msra.mxu1 %vm449_vm2, %v3084_v33  ;;  %5388 = vmatprep.mubr.msk.f32.mxu1 %vm5814_vm1, %v5813_v51 }
0x143b   :  { %5396 = vmatprep.subr.mxu1 %v5813_v51  ;;  %v3499_v56 = vpop.permute.xlu1 %3498 }
0x143d   :  { %5389 = vmatmul.mubr.msk.f32.vlgmr.msra.gmra.mrb[34].mxu1 %vm449_vm2, %v3082_v59 }
0x143e   :  { %5398 = vmatprep.mubr.msk.f32.mxu1 %vm5814_vm1, %v5813_v51 }
0x1508   :  { %v2921_v62 = vpop.f32.mrb[22].mxu0 }
0x1509   :  { %v5375_v60 = vpop.f32.mrb[23].mxu0  ;;  %5383 = vmatprep.mubr.msk.f32.mxu0 %vm449_vm2, %v2921_v62 }
0x150c   :  { %v2994_v34 = vpop.f32.mrb[32].mxu1 }
0x150d   :  { %v5380_v35 = vpop.f32.mrb[33].mxu1  ;;  %5384 = vmatmul.mubr.msk.f32.vlgmr.msra.gmra.mrb[24].mxu0 %vm449_vm2, %v2994_v34 }
0x150e   :  { %5392 = vmatpush3.xpose.msk.msra.mxu0 %vm449_vm2, %v3162_v3  ;;  %5393 = vmatprep.mubr.msk.f32.mxu0 %vm5814_vm1, %v5813_v51 }
0x150f   :  { %5401 = vmatprep.subr.mxu0 %v5813_v51 }
0x1510   :  { %v3155_v4 = vpop.f32.mrb[34].mxu1 }
0x1511   :  { %v3156_v37 = vadd.f32 %v3155_v4, %v6083_v18  ;;  %v5390_v38 = vpop.f32.mrb[35].mxu1  ;;  %5394 = vmatmul.mubr.msk.f32.vlgmr.msra.gmra.mrb[26].mxu0 %vm449_vm2, %v3160_v36  ;;  %v4922_v4 = vld [vmem:[%s6744_s0 + $0x30] sm:$0xff] }
0x1512   :  { %5403 = vmatprep.mubr.msk.f32.mxu0 %vm5814_vm1, %v5813_v51 }
0x1513   :  { %v3237_v39 = vsel %vm449_vm2, %v3156_v37, -inf }
0x1514   :  { %3238 = vmax.xlane.f32.xlu0 %v3237_v39 }
0x152a   :  { %3260 = vrot.lane.b32.xlu0 %v6354_v55, %s6745_s30 }
0x152e   :  { %3496 = vrot.lane.b32.xlu0 %v6367_v63, %s6746_s28 }
0x1532   :  { %3574 = vrot.lane.b32.xlu0 %v6378_v2, %s6746_s28 }
0x15a1   :  { %v3239_v40 = vpop.xlane.xlu0 %3238 }
0x15a2   :  { %v3243_v41 = vsub.f32 %v3156_v37, %v3239_v40 }
0x15a4   :  { %v3245_v42 = vmul.f32 1.442695, %v3243_v41 }
0x15a5   :  { %v3261_v43 = vpop.permute.xlu0 %3260 }
0x15a6   :  { %5705 = vpow2.f32 %v3245_v42  ;;  %5397 = vmatpush3.msra.mxu1 %v3261_v43 }
0x15a7   :  { %5411 = vmatprep.subr.mxu1 %v5813_v51 }
0x15a9   :  { %v3497_v1 = vpop.permute.xlu0 %3496 }
0x15ad   :  { %v3575_v6 = vpop.permute.xlu0 %3574 }
0x15b0   :  { %v5706_v47 = vpop.eup %5705 }
0x15b1   :  { %v3249_v48 = vsel %vm449_vm2, %v5706_v47, 0.0 }
0x15b2   :  { %3250 = vadd.xlane.f32.xlu1 %v3249_v48 }
0x15c3   :  { %3576 = vrot.lane.b32.xlu1 %v6370_v0, %s6746_s28 }
0x15e4   :  { %v3233_v50 = vpop.f32.mrb[26].mxu0 }
0x15e5   :  { %v3234_v52 = vadd.f32 %v3233_v50, %v6086_v23  ;;  %v5395_v53 = vpop.f32.mrb[27].mxu0 }
0x15e7   :  { %v3240_v54 = vsel %vm449_vm2, %v3234_v52, -inf }
0x15e8   :  { %3241 = vmax.xlane.f32.xlu1 %v3240_v54 }
0x163f   :  { %v3251_v57 = vpop.xlane.xlu1 %3250 }
0x1640   :  { %5707 = vrcp.f32 %v3251_v57 }
0x1643   :  { %v3577_v44 = vpop.permute.xlu1 %3576 }
0x164a   :  { %v5708_v58 = vpop.eup %5707 }
0x164b   :  { %v3257_v61 = vmul.f32 %v5708_v58, %v5706_v47 }
0x164d   :  { %5399 = vmatmul.mubr.msk.f32.vlgmr.msra.gmra.mrb[36].mxu1 %vm449_vm2, %v3257_v61 }
0x164e   :  { %5412 = vmatpush3.xpose.msk.msra.mxu1 %vm449_vm2, %v3499_v56  ;;  %5413 = vmatprep.mubr.msk.f32.mxu1 %vm5814_vm1, %v5813_v51 }
0x164f   :  { %5416 = vmatprep.subr.mxu1 %v5813_v51 }
0x1651   :  { %5414 = vmatmul.mubr.msk.f32.vlgmr.msra.gmra.mrb[38].mxu1 %vm449_vm2, %v3497_v1 }
0x1652   :  { %5417 = vmatpush3.xpose.msk.msra.mxu1 %vm449_vm2, %v3577_v44  ;;  %5418 = vmatprep.mubr.msk.f32.mxu1 %vm5814_vm1, %v5813_v51 }
0x1653   :  { %5426 = vmatprep.subr.mxu1 %v5813_v51 }
0x1655   :  { %5419 = vmatmul.mubr.msk.f32.vlgmr.msra.gmra.mrb[40].mxu1 %vm449_vm2, %v3575_v6 }
0x1656   :  { %5428 = vmatprep.mubr.msk.f32.mxu1 %vm5814_vm1, %v5813_v51 }
0x1675   :  { %v3242_v7 = vpop.xlane.xlu1 %3241 }
0x1676   :  { %v3244_v8 = vsub.f32 %v3234_v52, %v3242_v7 }
0x1678   :  { %v3247_v9 = vmul.f32 1.442695, %v3244_v8 }
0x167a   :  { %5709 = vpow2.f32 %v3247_v9 }
0x1684   :  { %v5710_v10 = vpop.eup %5709 }
0x1685   :  { %v3252_v11 = vsel %vm449_vm2, %v5710_v10, 0.0 }
0x1686   :  { %3253 = vadd.xlane.f32.xlu0 %v3252_v11 }
0x169c   :  { %3337 = vrot.lane.b32.xlu0 %v6381_v5, %s6745_s30 }
0x16a0   :  { %3750 = vrot.lane.b32.xlu0 %v6381_v5, %s6746_s28 }
0x16a4   :  { %3911 = vrot.lane.b32.xlu0 %v6363_v49, %s6747_s5 }
0x16a8   :  { %3989 = vrot.lane.b32.xlu0 %v6370_v0, %s6747_s5 }
0x16ac   :  { %3909 = vrot.lane.b32.xlu0 %v6367_v63, %s6747_s5 }
0x1713   :  { %v3254_v12 = vpop.xlane.xlu0 %3253 }
0x1714   :  { %5711 = vrcp.f32 %v3254_v12 }
0x1717   :  { %v3338_v13 = vpop.permute.xlu0 %3337 }
0x1718   :  { %5402 = vmatpush3.msra.mxu0 %v3338_v13 }
0x1719   :  { %5406 = vmatprep.subr.mxu0 %v4921_v26 }
0x171b   :  { %v3751_v14 = vpop.permute.xlu0 %3750 }
0x171c   :  { %5427 = vmatpush3.msra.mxu1 %v3751_v14 }
0x171d   :  { %5436 = vmatprep.subr.mxu1 %v5813_v51 }
0x171e   :  { %v5712_v15 = vpop.eup %5711 }
0x171f   :  { %v3258_v16 = vmul.f32 %v5712_v15, %v5710_v10  ;;  %v3912_v38 = vpop.permute.xlu0 %3911 }
0x1720   :  { %v3332_v17 = vpop.f32.mrb[36].mxu1 }
0x1721   :  { %v5400_v19 = vpop.f32.mrb[37].mxu1  ;;  %5404 = vmatmul.mubr.msk.f32.vlgmr.msra.gmra.mrb[28].mxu0 %vm449_vm2, %v3258_v16 }
0x1722   :  { %5408 = vmatprep.mubr.msk.f32.mxu0 %vm449_vm2, %v3332_v17  ;;  %5407 = vmatpush3.msra.mxu0 %v4921_v26 }
0x1723   :  { %5421 = vmatprep.subr.mxu0 %v5813_v51  ;;  %v3990_v41 = vpop.permute.xlu0 %3989 }
0x1724   :  { %v3570_v49 = vpop.f32.mrb[38].mxu1 }
0x1725   :  { %v3571_v0 = vadd.f32 %v3570_v49, %v6083_v18  ;;  %v5415_v63 = vpop.f32.mrb[39].mxu1 }
0x1727   :  { %v3652_v20 = vsel %vm449_vm2, %v3571_v0, -inf  ;;  %v3910_v43 = vpop.permute.xlu0 %3909 }
0x1728   :  { %3653 = vmax.xlane.f32.xlu1 %v3652_v20  ;;  %v3648_v21 = vpop.f32.mrb[40].mxu1  ;;  %v4923_v20 = vld [vmem:[%s6744_s0 + $0x38] sm:$0xff] }
0x1729   :  { %v3649_v22 = vadd.f32 %v3648_v21, %v6086_v23  ;;  %v5420_v24 = vpop.f32.mrb[41].mxu1 }
0x172b   :  { %v3655_v25 = vsel %vm449_vm2, %v3649_v22, -inf }
0x172c   :  { %3656 = vmax.xlane.f32.xlu1 %v3655_v25  ;;  %v4934_v25 = vld [vmem:[%s6688_s12 + $0x1] ss:$0 sm:$0xff] }
0x17b5   :  { %v3654_v27 = vpop.xlane.xlu1 %3653 }
0x17b6   :  { %v3658_v28 = vsub.f32 %v3571_v0, %v3654_v27 }
0x17b8   :  { %v3660_v29 = vmul.f32 1.442695, %v3658_v28 }
0x17b9   :  { %v3657_v30 = vpop.xlane.xlu1 %3656 }
0x17ba   :  { %5713 = vpow2.f32 %v3660_v29  ;;  %v3659_v31 = vsub.f32 %v3649_v22, %v3657_v30 }
0x17bc   :  { %v3662_v32 = vmul.f32 1.442695, %v3659_v31 }
0x17be   :  { %5715 = vpow2.f32 %v3662_v32 }
0x17c4   :  { %v5714_v33 = vpop.eup %5713 }
0x17c5   :  { %v3664_v59 = vsel %vm449_vm2, %v5714_v33, 0.0 }
0x17c6   :  { %3665 = vadd.xlane.f32.xlu1 %v3664_v59 }
0x17c8   :  { %v5716_v62 = vpop.eup %5715 }
0x17c9   :  { %v3667_v60 = vsel %vm449_vm2, %v5716_v62, 0.0 }
0x17ca   :  { %3668 = vadd.xlane.f32.xlu1 %v3667_v60 }
0x17db   :  { %3674 = vrot.lane.b32.xlu1 %v6354_v55, %s6746_s28  ;;  %s5820_s28 = smov [#allocation4]  }
0x17dc   :  { %s4826_s29 = sshll.u32 %s5820_s28, 4  ;;  %s4827_s29 = int_to_ptr.vmem [resolvable:$true] %s4826_s29 }
0x17dd   :  { %p5748_p1 = scmp.lt.s32.totalorder %s4827_s29, %s4827_s29 }
0x17df   :  { %3987 = vrot.lane.b32.xlu1 %v6378_v2, %s6747_s5 }
0x17f4   :  { %v3409_v3 = vpop.f32.mrb[28].mxu0 }
0x17f5   :  { %v5405_v34 = vpop.f32.mrb[29].mxu0  ;;  %5409 = vmatmul.mubr.msk.f32.vlgmr.msra.gmra.mrb[24].mxu0 %vm449_vm2, %v3409_v3 }
0x17f6   :  { %5423 = vmatprep.mubr.msk.f32.mxu0 %vm5814_vm1, %v5813_v51 }
0x1853   :  { %v3666_v35 = vpop.xlane.xlu1 %3665 }
0x1854   :  { %5717 = vrcp.f32 %v3666_v35 }
0x1857   :  { %v3669_v36 = vpop.xlane.xlu1 %3668 }
0x1858   :  { %5719 = vrcp.f32 %v3669_v36 }
0x185b   :  { %v3675_v37 = vpop.permute.xlu1 %3674 }
0x185c   :  { %5422 = vmatpush3.msra.mxu0 %v3675_v37 }
0x185d   :  { %5431 = vmatprep.subr.mxu0 %v4922_v4 }
0x185e   :  { %v5718_v2 = vpop.eup %5717 }
0x185f   :  { %v3672_v39 = vmul.f32 %v5718_v2, %v5714_v33  ;;  %v3988_v53 = vpop.permute.xlu1 %3987 }
0x1861   :  { %5424 = vmatmul.mubr.msk.f32.vlgmr.msra.gmra.mrb[30].mxu0 %vm449_vm2, %v3672_v39  ;;  %v4973_v39 = vld [vmem:[%s6691_s15 + $0x30] sm:$0xff] }
0x1862   :  { %v5720_v40 = vpop.eup %5719  ;;  %5432 = vmatpush3.msra.mxu0 %v4922_v4 }
0x1863   :  { %v3673_v42 = vmul.f32 %v5720_v40, %v5716_v62  ;;  %5441 = vmatprep.subr.mxu0 %v5813_v51  ;;  %v4974_v40 = vld [vmem:[%s6691_s15 + $0x38] sm:$0xff] }
0x1865   :  { %5429 = vmatmul.mubr.msk.f32.vlgmr.msra.gmra.mrb[42].mxu1 %vm449_vm2, %v3673_v42 }
0x1866   :  { %5437 = vmatpush3.xpose.msk.msra.mxu1 %vm449_vm2, %v3912_v38  ;;  %5438 = vmatprep.mubr.msk.f32.mxu1 %vm5814_vm1, %v5813_v51  ;;  %v4972_v38 = vld [vmem:[%s6691_s15 + $0x28] sm:$0xff] }
0x1867   :  { %5446 = vmatprep.subr.mxu1 %v5813_v51 }
0x1869   :  { %5439 = vmatmul.mubr.msk.f32.vlgmr.msra.gmra.mrb[44].mxu1 %vm449_vm2, %v3910_v43 }
0x186a   :  { %5448 = vmatprep.mubr.msk.f32.mxu1 %vm5814_vm1, %v5813_v51 }
0x1934   :  { %v3746_v47 = vpop.f32.mrb[30].mxu0 }
0x1935   :  { %v5425_v48 = vpop.f32.mrb[31].mxu0  ;;  %5433 = vmatprep.mubr.msk.f32.mxu0 %vm449_vm2, %v3746_v47 }
0x1938   :  { %v3822_v50 = vpop.f32.mrb[42].mxu1 }
0x1939   :  { %v5430_v52 = vpop.f32.mrb[43].mxu1  ;;  %5434 = vmatmul.mubr.msk.f32.vlgmr.msra.gmra.mrb[24].mxu0 %vm449_vm2, %v3822_v50 }
0x193a   :  { %5442 = vmatpush3.xpose.msk.msra.mxu0 %vm449_vm2, %v3990_v41  ;;  %5443 = vmatprep.mubr.msk.f32.mxu0 %vm5814_vm1, %v5813_v51  ;;  %v5589_v41 = vpack.c.bf16 %v4974_v40, %v4973_v39 }
0x193b   :  { %5451 = vmatprep.subr.mxu0 %v5813_v51 }
0x193c   :  { %v3983_v54 = vpop.f32.mrb[44].mxu1 }
0x193d   :  { %v3984_v56 = vadd.f32 %v3983_v54, %v6083_v18  ;;  %v5440_v57 = vpop.f32.mrb[45].mxu1  ;;  %5444 = vmatmul.mubr.msk.f32.vlgmr.msra.gmra.mrb[32].mxu0 %vm449_vm2, %v3988_v53  ;;  %v4969_v54 = vld [vmem:[%s6689_s13 + $0x1] ss:$0 sm:$0xff] }
0x193e   :  { %5453 = vmatprep.mubr.msk.f32.mxu0 %vm5814_vm1, %v5813_v51 }
0x193f   :  { %v4065_v58 = vsel %vm449_vm2, %v3984_v56, -inf }
0x1940   :  { %4066 = vmax.xlane.f32.xlu0 %v4065_v58 }
0x19cd   :  { %v4067_v61 = vpop.xlane.xlu0 %4066 }
0x19ce   :  { %v4071_v1 = vsub.f32 %v3984_v56, %v4067_v61  ;;  %v4970_v61 = vld [vmem:[%s6690_s14 + $0x1] ss:$0 sm:$0xff] }
0x19d0   :  { %v4073_v44 = vmul.f32 1.442695, %v4071_v1 }
0x19d2   :  { %5721 = vpow2.f32 %v4073_v44 }
0x19dc   :  { %v5722_v6 = vpop.eup %5721 }
0x19dd   :  { %v4077_v7 = vsel %vm449_vm2, %v5722_v6, 0.0 }
0x19de   :  { %4078 = vadd.xlane.f32.xlu0 %v4077_v7 }
0x1a10   :  { %v4061_v8 = vpop.f32.mrb[32].mxu0 }
0x1a11   :  { %v4062_v18 = vadd.f32 %v4061_v8, %v6086_v23  ;;  %v5445_v9 = vpop.f32.mrb[33].mxu0  ;;  %v4979_v8 = vld [vmem:[%s6693_s17 + $0x40] sm:$0xff] }
0x1a13   :  { %v4068_v10 = vsel %vm449_vm2, %v4062_v18, -inf }
0x1a14   :  { %4069 = vmax.xlane.f32.xlu1 %v4068_v10  ;;  %v4981_v10 = vld [vmem:[%s6693_s17 + $0x50] sm:$0xff] }
0x1a25   :  { %4163 = vrot.lane.b32.xlu1 %v6381_v5, %s6747_s5 }
0x1a6b   :  { %v4079_v23 = vpop.xlane.xlu0 %4078 }
0x1aa1   :  { %v4070_v11 = vpop.xlane.xlu1 %4069 }
0x1aa2   :  { %v4072_v12 = vsub.f32 %v4062_v18, %v4070_v11  ;;  %v4980_v18 = vld [vmem:[%s6693_s17 + $0x48] sm:$0xff]  ;;  %v4982_v11 = vld [vmem:[%s6693_s17 + $0x58] sm:$0xff] }
0x1aa3   :  { %v5593_v9 = vpack.c.bf16 %v4980_v18, %v4979_v8 }
0x1aa4   :  { %v4075_v13 = vmul.f32 1.442695, %v4072_v12  ;;  %v5597_v12 = vpack.c.bf16 %v4982_v11, %v4981_v10 }
0x1aa5   :  { %v4164_v14 = vpop.permute.xlu1 %4163 }
0x1aa6   :  { %5723 = vpow2.f32 %v4075_v13  ;;  %5452 = vmatpush3.msra.mxu0 %v4164_v14  ;;  %v4983_v13 = vld [vmem:[%s6693_s17 + $0x60] sm:$0xff]  ;;  %v4984_v14 = vld [vmem:[%s6693_s17 + $0x68] sm:$0xff] }
0x1aa7   :  { %5725 = vrcp.f32 %v4079_v23  ;;  %5456 = vmatprep.subr.mxu0 %v4923_v20  ;;  %v4986_v23 = vld [vmem:[%s6693_s17 + $0x78] sm:$0xff] }
0x1ab0   :  { %v5724_v15 = vpop.eup %5723 }
0x1ab1   :  { %v4080_v16 = vsel %vm449_vm2, %v5724_v15, 0.0  ;;  %v5726_v19 = vpop.eup %5725 }
0x1ab2   :  { %4081 = vadd.xlane.f32.xlu0 %v4080_v16  ;;  %v4085_v49 = vmul.f32 %v5726_v19, %v5722_v6  ;;  %v4985_v16 = vld [vmem:[%s6693_s17 + $0x70] sm:$0xff]  ;;  %v4976_v19 = vld [vmem:[%s6692_s16 + $0x1] ss:$0 sm:$0xff]  ;;  %s5743_s16 = scalar_lea.vmem %s4827_s29, 32 }
0x1ab3   :  { %p5744_p0 = scmp.ne.s32.totalorder %s4827_s29, %s5743_s16  ;;  %p5749_p2 = scmp.lt.s32.totalorder %s5743_s16, %s5743_s16 }
0x1ab5   :  { %p5750_p3 = por %p5749_p2, %p5748_p1 }
0x1ab7   :  { %p5751_p4 = pnand %p5750_p3, %p5744_p0 }
0x1ac8   :  { %4087 = vrot.lane.b32.xlu0 %v6354_v55, %s6747_s5 }
0x1b3f   :  { %v4082_v17 = vpop.xlane.xlu0 %4081 }
0x1b40   :  { %5727 = vrcp.f32 %v4082_v17  ;;  %v5605_v17 = vpack.c.bf16 %v4986_v23, %v4985_v16  ;;  %v4994_v16 = vld [vmem:[%s6696_s20 + $0x1] ss:$0 sm:$0xff] }
0x1b43   :  { %v4088_v5 = vpop.permute.xlu0 %4087 }
0x1b44   :  { %5447 = vmatpush3.msra.mxu1 %v4088_v5 }
0x1b45   :  { %5449 = vmatmul.mubr.msk.f32.vlgmr.msra.gmra.mrb[46].mxu1 %vm449_vm2, %v4085_v49 }
0x1b4a   :  { %v5728_v0 = vpop.eup %5727 }
0x1b4b   :  { %v4086_v63 = vmul.f32 %v5728_v0, %v5724_v15  ;;  %v5601_v15 = vpack.c.bf16 %v4984_v14, %v4983_v13 }
0x1b4d   :  { %5454 = vmatmul.mubr.msk.f32.vlgmr.msra.gmra.mrb[34].mxu0 %vm449_vm2, %v4086_v63 }
0x1b4e   :  { %5457 = vmatpush3.msra.mxu0 %v4923_v20 }
0x1b4f   :  { %5594 = vmatprep.subr.bf16.mxu0 %v5593_v9 }
0x1c18   :  { %v4159_v55 = vpop.f32.mrb[46].mxu1 }
0x1c19   :  { %v5450_v21 = vpop.f32.mrb[47].mxu1  ;;  %5458 = vmatprep.mubr.msk.f32.mxu0 %vm449_vm2, %v4159_v55 }
0x1c20   :  { %v4235_v22 = vpop.f32.mrb[34].mxu0 }
0x1c21   :  { %v5455_v24 = vpop.f32.mrb[35].mxu0  ;;  %5459 = vmatmul.mubr.msk.f32.vlgmr.msra.gmra.mrb[24].mxu0 %vm449_vm2, %v4235_v22 }
0x1c22   :  { %5596 = vmatpush3.bf16.msra.mxu0 %v5593_v9 }
0x1c23   :  { %5598 = vmatprep.subr.bf16.mxu0 %v5597_v12 }
0x1c26   :  { %5600 = vmatpush3.bf16.msra.mxu0 %v5597_v12  ;;  %v4993_v12 = vld [vmem:[%s6695_s19 + $0x1] ss:$0 sm:$0xff] }
0x1c27   :  { %5602 = vmatprep.subr.bf16.mxu0 %v5601_v15 }
0x1c2a   :  { %5604 = vmatpush3.bf16.msra.mxu0 %v5601_v15 }
0x1c2b   :  { %5606 = vmatprep.subr.bf16.mxu0 %v5605_v17 }
0x1c2e   :  { %5608 = vmatpush3.bf16.msra.mxu0 %v5605_v17 }
0x1cf4   :  { %v5460_v26 = vpop.f32.mrb[24].mxu0 }
0x1cf5   :  { %v5623_v27 = vadd.f32 %v5460_v26, %v4934_v25  ;;  %v4311_v28 = vpop.f32.mrb[25].mxu0 }
0x1cf6   :  { %v5624_v29 = vadd.f32 %v4934_v25, %v4311_v28 }
0x1cf7   :  { %v4323_v30 = vadd.f32 %v5623_v27, %v6332_v46 }
0x1cf8   :  { %v4322_v31 = vadd.f32 %v5624_v29, %v6330_v45  ;;  %v4971_v45 = vld [vmem:[%s6691_s15 + $0x20] sm:$0xff] }
0x1cf9   :  { %v4331_v32 = vsel %vm92_vm0, %v4323_v30, 0.0  ;;  %v5585_v2 = vpack.c.bf16 %v4972_v38, %v4971_v45 }
0x1cfa   :  { %4332 = vadd.xlane.f32.xlu0 %v4331_v32  ;;  %v4328_v33 = vsel %vm92_vm0, %v4322_v31, 0.0 }
0x1cfb   :  { %4329 = vadd.xlane.f32.xlu1 %v4328_v33  ;;  %5586 = vmatprep.subr.bf16.mxu1 %v5585_v2 }
0x1cfc   :  { %5588 = vmatpush3.bf16.msra.mxu1 %v5585_v2 }
0x1cfd   :  { %5590 = vmatprep.subr.bf16.mxu1 %v5589_v41 }
0x1d00   :  { %5592 = vmatpush3.bf16.msra.mxu1 %v5589_v41 }
0x1d87   :  { %v4333_v59 = vpop.xlane.xlu0 %4332 }
0x1d88   :  { %v4335_v62 = vmul.f32 0.03125, %v4333_v59  ;;  %v4330_v60 = vpop.xlane.xlu1 %4329 }
0x1d89   :  { %v4334_v3 = vmul.f32 0.03125, %v4330_v60 }
0x1d8a   :  { %v4337_v34 = vsub.f32 %v4323_v30, %v4335_v62 }
0x1d8b   :  { %v4336_v35 = vsub.f32 %v4322_v31, %v4334_v3 }
0x1d8c   :  { %v4339_v36 = vmul.f32 %v4337_v34, %v4337_v34 }
0x1d8d   :  { %v4338_v4 = vmul.f32 %v4336_v35, %v4336_v35 }
0x1d8e   :  { %v4343_v37 = vsel %vm92_vm0, %v4339_v36, 0.0 }
0x1d8f   :  { %4344 = vadd.xlane.f32.xlu1 %v4343_v37  ;;  %v4340_v46 = vsel %vm92_vm0, %v4338_v4, 0.0 }
0x1d90   :  { %4341 = vadd.xlane.f32.xlu0 %v4340_v46 }
0x1e1c   :  { %v4345_v42 = vpop.xlane.xlu1 %4344 }
0x1e1d   :  { %v4347_v43 = vmul.f32 0.03125, %v4345_v42  ;;  %v4342_v47 = vpop.xlane.xlu0 %4341 }
0x1e1e   :  { %v4346_v48 = vmul.f32 0.03125, %v4342_v47 }
0x1e1f   :  { %v4349_v50 = vadd.f32 1e-12, %v4347_v43 }
0x1e20   :  { %v4348_v52 = vadd.f32 1e-12, %v4346_v48 }
0x1e21   :  { %5729 = vrsqrt.f32 %v4349_v50 }
0x1e22   :  { %5731 = vrsqrt.f32 %v4348_v52 }
0x1e2b   :  { %v5730_v53 = vpop.eup %5729 }
0x1e2c   :  { %v5732_v56 = vpop.eup %5731  ;;  %v4353_v57 = vmul.f32 %v5730_v53, %v4337_v34  ;;  %v4988_v34 = vld [vmem:[%s6694_s18 + $0x1] ss:$0 sm:$0xff] }
0x1e2d   :  { %v4352_v58 = vmul.f32 %v5732_v56, %v4336_v35  ;;  %v4636_v56 = vld [vmem:[%s6697_s21 + $0x8] sm:$0xff] }
0x1e2e   :  { %v4361_v1 = vmul.f32 %v4969_v54, %v4353_v57 }
0x1e2f   :  { %v4360_v44 = vmul.f32 %v4969_v54, %v4352_v58  ;;  %v4635_v54 = vld [vmem:[%s6697_s21] sm:$0xff]  ;;  %v4637_v58 = vld [vmem:[%s6697_s21 + $0x10] sm:$0xff] }
0x1e30   :  { %v4369_v7 = vadd.f32 %v4970_v61, %v4361_v1  ;;  %v5610_v57 = vpack.c.bf16 %v4636_v56, %v4635_v54  ;;  %v5819_v1 = vmov 0.0|0.0  }
0x1e31   :  { %v4368_v6 = vadd.f32 %v4970_v61, %v4360_v44  ;;  %v4638_v61 = vld [vmem:[%s6697_s21 + $0x18] sm:$0xff]  ;;  %5609 = vmatprep.subr.bf16.mxu1 %v5819_v1 }
0x1e32   :  { %v5613_v44 = vpack.c.bf16 %v4638_v61, %v4637_v58 }
0x1e33   :  { %5469 = vmatprep.mubr.msk.f32.mxu1 %vm92_vm0, %v4368_v6 }
0x1e34   :  { %5470 = vmatmul.mubr.msk.f32.vlgmr.msra.gmra.mrb[48].mxu1 %vm92_vm0, %v4369_v7 }
0x1e35   :  { %5499 = vmatprep.mubr.msk.f32.mxu1 %vm5814_vm1, %v5813_v51  ;;  %5611 = vmatpush3.bf16.msra.mxu1 %v5610_v57 }
0x1e36   :  { %5612 = vmatprep.subr.bf16.mxu1 %v5819_v1 }
0x1e39   :  { %5614 = vmatpush3.bf16.msra.mxu1 %v5613_v44 }
0x1e3a   :  { %5615 = vmatprep.subr.bf16.mxu1 %v5819_v1 }
0x1f07   :  { %v5471_v49 = vpop.f32.mrb[48].mxu1 }
0x1f08   :  { %v4461_v5 = vadd.f32 %v5471_v49, %v4976_v19  ;;  %v4455_v0 = vpop.f32.mrb[49].mxu1 }
0x1f09   :  { %v4456_v63 = vadd.f32 %v4976_v19, %v4455_v0 }
0x1f0a   :  { %v4467_v20 = vmul.f32 0.044715, %v4461_v5  ;;  %v4465_v62 = vmul.f32 0.5, %v4461_v5 }
0x1f0b   :  { %v4466_v55 = vmul.f32 0.044715, %v4456_v63  ;;  %v4464_v33 = vmul.f32 0.5, %v4456_v63 }
0x1f0c   :  { %v4469_v21 = vmul.f32 %v4467_v20, %v4461_v5  ;;  %v4723_v20 = vld [vmem:[%s6699_s23 + $0x8] sm:$0xff] }
0x1f0d   :  { %v4468_v22 = vmul.f32 %v4466_v55, %v4456_v63  ;;  %v4724_v55 = vld [vmem:[%s6699_s23 + $0x10] sm:$0xff] }
0x1f0e   :  { %v4471_v24 = vmul.f32 %v4469_v21, %v4461_v5 }
0x1f0f   :  { %v4470_v25 = vmul.f32 %v4468_v22, %v4456_v63  ;;  %v4725_v22 = vld [vmem:[%s6699_s23 + $0x18] sm:$0xff] }
0x1f10   :  { %v4473_v26 = vadd.f32 %v4471_v24, %v4461_v5  ;;  %v5619_v24 = vpack.c.bf16 %v4725_v22, %v4724_v55 }
0x1f11   :  { %v4472_v27 = vadd.f32 %v4470_v25, %v4456_v63  ;;  %v4722_v63 = vld [vmem:[%s6699_s23] sm:$0xff]  ;;  %s5821_s23 = smov [#allocation2]  }
0x1f12   :  { %v4475_v28 = vmul.f32 0.7978846, %v4473_v26  ;;  %v5616_v21 = vpack.c.bf16 %v4723_v20, %v4722_v63  ;;  %s4813_s8 = sshll.u32 %s5821_s23, 4  ;;  %s6630_s8 = int_to_ptr.vmem [resolvable:$true] %s4813_s8 }
0x1f13   :  { %v4474_v29 = vmul.f32 0.7978846, %v4472_v27 }
0x1f14   :  { %5733 = vtanh.f32 %v4475_v28 }
0x1f15   :  { %5735 = vtanh.f32 %v4474_v29 }
0x1f1e   :  { %v5734_v30 = vpop.eup %5733 }
0x1f1f   :  { %v5736_v31 = vpop.eup %5735  ;;  %v4479_v32 = vadd.f32 1.0, %v5734_v30 }
0x1f20   :  { %v4478_v59 = vadd.f32 1.0, %v5736_v31 }
0x1f21   :  { %v4481_v3 = vmul.f32 %v4479_v32, %v4465_v62 }
0x1f22   :  { %v4480_v60 = vmul.f32 %v4478_v59, %v4464_v33 }
0x1f24   :  { %5488 = vmatprep.mubr.msk.f32.mxu0 %vm2265_vm3, %v4480_v60 }
0x1f25   :  { %5489 = vmatmul.mubr.msk.f32.vlgmr.msra.gmra.mrb[36].mxu0 %vm2265_vm3, %v4481_v3 }
0x1ff8   :  { %v5490_v35 = vpop.f32.mrb[36].mxu0 }
0x1ff9   :  { %v4577_v36 = vadd.f32 %v5490_v35, %v4988_v34  ;;  %v4571_v4 = vpop.f32.mrb[37].mxu0 }
0x1ffa   :  { %v4572_v37 = vadd.f32 %v4988_v34, %v4571_v4 }
0x1ffb   :  { %v4581_v46 = vadd.f32 %v4577_v36, %v4369_v7 }
0x1ffc   :  { %v4580_v45 = vadd.f32 %v4572_v37, %v4368_v6 }
0x1ffd   :  { %v4589_v38 = vsel %vm92_vm0, %v4581_v46, 0.0 }
0x1ffe   :  { %4590 = vadd.xlane.f32.xlu0 %v4589_v38  ;;  %v4586_v2 = vsel %vm92_vm0, %v4580_v45, 0.0 }
0x1fff   :  { %4587 = vadd.xlane.f32.xlu1 %v4586_v2 }
0x208b   :  { %v4591_v39 = vpop.xlane.xlu0 %4590 }
0x208c   :  { %v4593_v40 = vmul.f32 0.03125, %v4591_v39  ;;  %v4588_v41 = vpop.xlane.xlu1 %4587 }
0x208d   :  { %v4592_v42 = vmul.f32 0.03125, %v4588_v41 }
0x208e   :  { %v4595_v43 = vsub.f32 %v4581_v46, %v4593_v40 }
0x208f   :  { %v4594_v47 = vsub.f32 %v4580_v45, %v4592_v42 }
0x2090   :  { %v4597_v48 = vmul.f32 %v4595_v43, %v4595_v43 }
0x2091   :  { %v4596_v50 = vmul.f32 %v4594_v47, %v4594_v47 }
0x2092   :  { %v4601_v52 = vsel %vm92_vm0, %v4597_v48, 0.0 }
0x2093   :  { %4602 = vadd.xlane.f32.xlu0 %v4601_v52  ;;  %v4598_v53 = vsel %vm92_vm0, %v4596_v50, 0.0 }
0x2094   :  { %4599 = vadd.xlane.f32.xlu1 %v4598_v53 }
0x2120   :  { %v4603_v6 = vpop.xlane.xlu0 %4602 }
0x2121   :  { %v4605_v7 = vmul.f32 0.03125, %v4603_v6  ;;  %v4600_v8 = vpop.xlane.xlu1 %4599 }
0x2122   :  { %v4604_v18 = vmul.f32 0.03125, %v4600_v8 }
0x2123   :  { %v4607_v9 = vadd.f32 1e-12, %v4605_v7 }
0x2124   :  { %v4606_v10 = vadd.f32 1e-12, %v4604_v18 }
0x2125   :  { %5737 = vrsqrt.f32 %v4607_v9 }
0x2126   :  { %5739 = vrsqrt.f32 %v4606_v10 }
0x212f   :  { %v5738_v11 = vpop.eup %5737 }
0x2130   :  { %v5740_v13 = vpop.eup %5739  ;;  %v4611_v14 = vmul.f32 %v5738_v11, %v4595_v43 }
0x2131   :  { %v4610_v15 = vmul.f32 %v5740_v13, %v4594_v47 }
0x2132   :  { %v4619_v23 = vmul.f32 %v4993_v12, %v4611_v14 }
0x2133   :  { %v4618_v17 = vmul.f32 %v4993_v12, %v4610_v15 }
0x2134   :  { %v4627_v19 = vadd.f32 %v4994_v16, %v4619_v23 }
0x2135   :  { %v4626_v49 = vadd.f32 %v4994_v16, %v4618_v17 }
0x2136   :  { %v4631_v5 = vrot.slane %v4627_v19, 7  ;;  %4629 = vst.msk [vmem:[#allocation2 + $0x8] sm:$0xff] %vm92_vm0, %v4627_v19 }
0x2137   :  { %4628 = vst.msk [vmem:[#allocation2] sm:$0xff] %vm92_vm0, %v4626_v49 }
0x2138   :  { %v4634_v0 = vsel %vm4633_vm4, %v4626_v49, %v4631_v5 }
0x2139   :  { %5500 = vmatmul.mubr.msk.f32.vlgmr.msra.gmra.mrb[50].mxu1 %vm92_vm0, %v4634_v0 }
0x213a   :  { %5510 = vmatprep.mubr.msk.f32.mxu1 %vm5814_vm1, %v5813_v51  ;;  %5617 = vmatpush3.bf16.msra.mxu1 %v5616_v21  ;;  %v4995_v51 = vld [vmem:[%s6698_s22] ss:$0 sm:$0xff] }
0x213b   :  { %5618 = vmatprep.subr.bf16.mxu1 %v5819_v1 }
0x213e   :  { %5620 = vmatpush3.bf16.msra.mxu1 %v5619_v24 }
0x220c   :  { %v4715_v25 = vpop.f32.mrb[50].mxu1 }
0x220d   :  { %v4716_v26 = vadd.f32 %v4995_v51, %v4715_v25  ;;  %v5501_v27 = vpop.f32.mrb[51].mxu1 }
0x220f   :  { %5741 = vtanh.f32 %v4716_v26 }
0x2219   :  { %v5742_v28 = vpop.eup %5741 }
0x221a   :  { %5511 = vmatmul.mubr.msk.f32.vlgmr.msra.gmra.mrb[52].mxu1 %vm92_vm0, %v5742_v28  ;;  %4721 = vst.msk [vmem:[#allocation4] sm:$0x3] %vm4720_vm5, %v5742_v28 }
0x221b   :  { %5754 = shalt.err (!%p5751_p4)
}
0x221c   :  { %s5755_s18 = scalar_lea.hbm %s6702_s26, 32 }
0x221d   :  { %p5756_p5 = scmp.ne.s32.totalorder %s6702_s26, %s5755_s18  ;;  %p5759_p6 = scmp.lt.u32.totalorder %s5755_s18, %s6702_s26 }
0x221f   :  { %p5761_p7 = pnand %p5759_p6, %p5756_p5 }
0x2221   :  { %5764 = shalt.err (!%p5761_p7)
}
0x2222   :  { %4829 = dma.vmem_to_hbm [thread:$0]  %s4827_s29, 32, %s6702_s26, [#allocation5]  }
0x2223   :  { %s5765_s10 = scalar_lea.vmem %s6630_s8, 256  ;;  %p5770_p9 = scmp.lt.s32.totalorder %s6630_s8, %s6630_s8 }
0x2224   :  { %p5766_p8 = scmp.ne.s32.totalorder %s6630_s8, %s5765_s10  ;;  %p5771_p10 = scmp.lt.s32.totalorder %s5765_s10, %s5765_s10 }
0x2226   :  { %p5772_p11 = por %p5771_p10, %p5770_p9 }
0x2228   :  { %p5773_p12 = pnand %p5772_p11, %p5766_p8 }
0x222a   :  { %5776 = shalt.err (!%p5773_p12)
}
0x222b   :  { %s5777_s21 = scalar_lea.hbm %s6701_s25, 256 }
0x222c   :  { %p5778_p13 = scmp.ne.s32.totalorder %s6701_s25, %s5777_s21  ;;  %p5781_p0 = scmp.lt.u32.totalorder %s5777_s21, %s6701_s25 }
0x222e   :  { %p5783_p1 = pnand %p5781_p0, %p5778_p13 }
0x2230   :  { %5786 = shalt.err (!%p5783_p1)
}
0x2231   :  { %s5822_s26 = smov 128   ;;  %s5823_s27 = smov 8   ;;  %vm4806_vm6 = vcmask 17408  }
0x2232   :  { %4819 = dma.vmem_to_hbm [thread:$0]  %s6630_s8, 256, %s6701_s25, [#allocation3], %s5822_s26, %s5822_s26, %s5823_s27  }
0x2233   :  { %s6748_s3 = sld [smem:[#allocation21_spill]]  ;;  %s5824_s30 = smov [#allocation6]  }
0x2234   :  { %s4836_s28 = sshll.u32 %s5824_s30, 4  ;;  %s4837_s28 = int_to_ptr.vmem [resolvable:$true] %s4836_s28 }
0x2235   :  { %s5787_s29 = scalar_lea.vmem %s4837_s28, 32  ;;  %p5792_p3 = scmp.lt.s32.totalorder %s4837_s28, %s4837_s28 }
0x2236   :  { %p5788_p2 = scmp.ne.s32.totalorder %s4837_s28, %s5787_s29  ;;  %p5793_p4 = scmp.lt.s32.totalorder %s5787_s29, %s5787_s29 }
0x2238   :  { %p5794_p5 = por %p5793_p4, %p5792_p3 }
0x2239   :  { %v4997_v29 = vld [vmem:[%s6748_s3] ss:$0 sm:$0xff] }
0x223a   :  { %p5795_p6 = pnand %p5794_p5, %p5788_p2 }
0x22ed   :  { %v4802_v30 = vpop.f32.mrb[52].mxu1 }
0x22ee   :  { %v4803_v31 = vadd.f32 %v4997_v29, %v4802_v30  ;;  %v5512_v32 = vpop.f32.mrb[53].mxu1 }
0x22f0   :  { %4807 = vst.msk [vmem:[#allocation6] sm:$0x3] %vm4806_vm6, %v4803_v31 }
0x22f1   :  { %5798 = shalt.err (!%p5795_p6)
}
0x22f2   :  { %s6749_s8 = sld [smem:[#allocation22_spill]] }
0x22f8   :  { %s5799_s16 = scalar_lea.hbm %s6749_s8, 32 }
0x22f9   :  { %p5800_p7 = scmp.ne.s32.totalorder %s6749_s8, %s5799_s16  ;;  %p5803_p8 = scmp.lt.u32.totalorder %s5799_s16, %s6749_s8 }
0x22fb   :  { %p5805_p9 = pnand %p5803_p8, %p5800_p7 }
0x22fd   :  { %5808 = shalt.err (!%p5805_p9)
}
0x22fe   :  { %4839 = dma.vmem_to_hbm [thread:$0]  %s4837_s28, 32, %s6749_s8, [#allocation5]  }
0x22ff   :  { %5809 = dma.done.wait [#allocation3], 256  }
0x2300   :  { %5810 = vsyncadd [#allocation3], 4294967040 }
0x2301   :  { %5811 = dma.done.wait [#allocation5], 64  }
0x2302   :  { %5812 = vsyncadd [#allocation5], 4294967232 }
0x2303   :  { %4849 = vsyncpa [#allocation3], 1 }
0x2304   :  { %4850 = vsyncpa [#allocation5], 1 }

</bundles_post_ra>
